<compile_context>
chip_gen: v7x
topology: tpu7x:2x2x1
jax: 0.10.0
libtpu: 0.0.40
codegen_flags: <defaults>
</compile_context>

<pallas_src>
import jax
import jax.numpy as jnp
from jax.experimental import pallas as pl
from jax.experimental.pallas import tpu as pltpu

D_IN, H1, H2, D_OUT = 784, 1024, 128, 10
D_OUT_PAD = 128     # lane-dense output block; real logits live in [:, :D_OUT]


def _round_up(n, m):
    return (n + m - 1) // m * m


def mlp_kernel(x_ref, w1_ref, b1_ref, w2_ref, b2_ref, w3_ref, b3_ref, o_ref):
    # Layer 1: (tb, 784)bf16 @ (784, 1024)bf16 -> f32 acc, + bias, ReLU
    h = jnp.dot(x_ref[...], w1_ref[...], preferred_element_type=jnp.float32)
    h = jnp.maximum(h + b1_ref[...], 0.0)
    # Layer 2: (tb, 1024)bf16 @ (1024, 128)bf16 -> f32 acc, + bias, ReLU
    h = jnp.dot(h.astype(w2_ref.dtype), w2_ref[...],
                preferred_element_type=jnp.float32)
    h = jnp.maximum(h + b2_ref[...], 0.0)
    # Layer 3: (tb, 128)bf16 @ (128, 128)bf16 -> f32 acc, + (lane-padded) bias
    o = jnp.dot(h.astype(w3_ref.dtype), w3_ref[...],
                preferred_element_type=jnp.float32)
    o_ref[...] = (o + b3_ref[...]).astype(o_ref.dtype)


def prepare_params(params):
    """One-time parameter prep (do NOT call per forward pass): cast weights to bf16,
    zero-pad layer 3 to 128 output lanes, keep biases f32 as (1, out) rows."""
    w1, b1, w2, b2, w3, b3 = params
    w1_b = jnp.asarray(w1, jnp.bfloat16)                              # (784, 1024)
    w2_b = jnp.asarray(w2, jnp.bfloat16)                              # (1024, 128)
    w3_p = jnp.zeros((H2, D_OUT_PAD), jnp.bfloat16).at[:, :D_OUT].set(
        jnp.asarray(w3, jnp.bfloat16))                                # (128, 128)
    b1_f = jnp.asarray(b1, jnp.float32).reshape(1, H1)
    b2_f = jnp.asarray(b2, jnp.float32).reshape(1, H2)
    b3_p = jnp.zeros((1, D_OUT_PAD), jnp.float32).at[:, :D_OUT].set(
        jnp.asarray(b3, jnp.float32).reshape(1, D_OUT))
    return (w1_b, b1_f, w2_b, b2_f, w3_p, b3_p)


def _build_call(B, tb, single_buffer_weights):
    # Weights/biases have constant index_maps (fetched once); Buffered(1) drops the
    # unused second pipeline buffer for them.
    pm = pl.Buffered(1) if single_buffer_weights else None
    inv = lambda shape: pl.BlockSpec(shape, lambda i: (0, 0), pipeline_mode=pm)

    flops = 2 * B * (D_IN * H1 + H1 * H2 + H2 * D_OUT_PAD)
    bytes_accessed = (
        B * D_IN * 2                                    # x (bf16)
        + (D_IN * H1 + H1 * H2 + H2 * D_OUT_PAD) * 2    # weights (bf16)
        + (H1 + H2 + D_OUT_PAD) * 4                     # biases (f32)
        + B * D_OUT_PAD * 4)                            # logits (f32)

    return pl.pallas_call(
        mlp_kernel,
        out_shape=jax.ShapeDtypeStruct((B, D_OUT_PAD), jnp.float32),
        grid_spec=pltpu.PrefetchScalarGridSpec(
            num_scalar_prefetch=0,
            grid=(pl.cdiv(B, tb),),
            in_specs=[
                pl.BlockSpec((tb, D_IN), lambda i: (i, 0)),   # x: batch-tiled
                inv((D_IN, H1)),
                inv((1, H1)),
                inv((H1, H2)),
                inv((1, H2)),
                inv((H2, D_OUT_PAD)),
                inv((1, D_OUT_PAD)),
            ],
            out_specs=pl.BlockSpec((tb, D_OUT_PAD), lambda i: (i, 0)),
        ),
        compiler_params=pltpu.CompilerParams(
            dimension_semantics=("parallel",),
            # v5e default scoped VMEM limit is only 16 MiB; 48 MiB keeps headroom
            # under v7x's 64 MiB physical VMEM.
            vmem_limit_bytes=48 * 1024 * 1024,
        ),
        cost_estimate=pl.CostEstimate(
            flops=flops, transcendentals=0, bytes_accessed=bytes_accessed),
    )


def mlp_mnist1(x, prepared_params, *, tb=512):
    """Forward pass. x: any shape whose rows flatten to 784 (e.g. (B, 1, 28, 28)).
    prepared_params: output of prepare_params(). tb: batch tile -- ~512 is right for
    v5e/v7x; 1024-2048 can help large-batch throughput on v6e."""
    x2d = x.reshape(-1, D_IN).astype(jnp.bfloat16)
    B = x2d.shape[0]

    # Batch tile: multiple of 16 (bf16 sublane packing), never larger than the
    # rounded-up batch, and small enough that the grid has >= 2 programs whenever the
    # batch allows it (so v7x's two TensorCores both get work).
    tb_cap = _round_up(B, 16)
    if tb_cap > 16:
        tb_cap = _round_up(tb_cap // 2, 16)
    tb = _round_up(max(16, min(tb, tb_cap)), 16)

    try:
        out = _build_call(B, tb, single_buffer_weights=True)(x2d, *prepared_params)
    except Exception:
        # Fallback for JAX versions whose TPU lowering rejects Buffered(1) operands.
        out = _build_call(B, tb, single_buffer_weights=False)(x2d, *prepared_params)

    # Strip output-lane padding (no batch padding was added).
    return out[:, :D_OUT]


def init_params(key):
    """Deterministic init matching nn.Linear's U(-1/sqrt(fan_in), 1/sqrt(fan_in))."""
    ks = jax.random.split(key, 6)

    def linear(kw, kb, fan_in, fan_out):
        bound = 1.0 / jnp.sqrt(fan_in)
        w = jax.random.uniform(kw, (fan_in, fan_out), jnp.float32, -bound, bound)
        b = jax.random.uniform(kb, (1, fan_out), jnp.float32, -bound, bound)
        return w, b

    w1, b1 = linear(ks[0], ks[1], D_IN, H1)
    w2, b2 = linear(ks[2], ks[3], H1, H2)
    w3, b3 = linear(ks[4], ks[5], H2, D_OUT)
    return (w1, b1, w2, b2, w3, b3)


if __name__ == "__main__":
    key = jax.random.PRNGKey(0)
    k_x, k_p = jax.random.split(key)

    B = 30  # ragged on purpose: exercises the partial last block / masked output path
    x = jax.random.normal(k_x, (B, 1, 28, 28), jnp.float32)  # MNIST-like NCHW input
    params = init_params(k_p)

    prepared = prepare_params(params)        # one-time weight cast/pad (hoisted)
    out = mlp_mnist1(x, prepared)
    out = jax.block_until_ready(out)
    assert out.shape == (B, D_OUT)

    w1, b1, w2, b2, w3, b3 = params
    x2d = x.reshape(-1, D_IN)

    # Reference 1: same bf16-input / f32-accumulation math as the kernel (tight check).
    hb = jnp.dot(x2d.astype(jnp.bfloat16), w1.astype(jnp.bfloat16),
                 preferred_element_type=jnp.float32)
    hb = jnp.maximum(hb + b1, 0.0)
    hb = jnp.dot(hb.astype(jnp.bfloat16), w2.astype(jnp.bfloat16),
                 preferred_element_type=jnp.float32)
    hb = jnp.maximum(hb + b2, 0.0)
    ref_bf16 = jnp.dot(hb.astype(jnp.bfloat16), w3.astype(jnp.bfloat16),
                       preferred_element_type=jnp.float32) + b3
    assert jnp.allclose(out, ref_bf16, atol=1e-2, rtol=1e-2)

    # Reference 2: full-f32 PyTorch-equivalent forward (loose check, bf16 rounding only).
    hf = jnp.maximum(x2d @ w1 + b1, 0.0)
    hf = jnp.maximum(hf @ w2 + b2, 0.0)
    ref_f32 = hf @ w3 + b3
    assert jnp.allclose(out, ref_f32, atol=5e-2, rtol=5e-2)

    print("KERNEL_OK")
</pallas_src>

<mosaic_0001>
module attributes {stable_mosaic.version = 11 : i64} {
  func.func @mlp_kernel(%arg0: i32, %arg1: memref<16x784xbf16, #tpu.memory_space<vmem>>, %arg2: memref<784x1024xbf16, #tpu.memory_space<vmem>>, %arg3: memref<1x1024xf32, #tpu.memory_space<vmem>>, %arg4: memref<1024x128xbf16, #tpu.memory_space<vmem>>, %arg5: memref<1x128xf32, #tpu.memory_space<vmem>>, %arg6: memref<128x128xbf16, #tpu.memory_space<vmem>>, %arg7: memref<1x128xf32, #tpu.memory_space<vmem>>, %arg8: memref<16x128xf32, #tpu.memory_space<vmem>>) attributes {dimension_semantics = [#tpu.dimension_semantics<parallel>], iteration_bounds = array<i64: 2>, scalar_prefetch = 0 : i64, scratch_operands = 0 : i64, tpu.core_type = #tpu.core_type<tc>, window_params = [{transform_indices = @transform_0, window_bounds = array<i64: 16, 784>}, {pipeline_mode = #tpu.pipeline_mode<synchronous>, transform_indices = @transform_1, window_bounds = array<i64: 784, 1024>}, {pipeline_mode = #tpu.pipeline_mode<synchronous>, transform_indices = @transform_2, window_bounds = array<i64: 1, 1024>}, {pipeline_mode = #tpu.pipeline_mode<synchronous>, transform_indices = @transform_3, window_bounds = array<i64: 1024, 128>}, {pipeline_mode = #tpu.pipeline_mode<synchronous>, transform_indices = @transform_4, window_bounds = array<i64: 1, 128>}, {pipeline_mode = #tpu.pipeline_mode<synchronous>, transform_indices = @transform_5, window_bounds = array<i64: 128, 128>}, {pipeline_mode = #tpu.pipeline_mode<synchronous>, transform_indices = @transform_6, window_bounds = array<i64: 1, 128>}, {transform_indices = @transform_7, window_bounds = array<i64: 16, 128>}]} {
    %c0 = arith.constant 0 : index
    %c0_0 = arith.constant 0 : index
    %0 = vector.load %arg1[%c0, %c0_0] : memref<16x784xbf16, #tpu.memory_space<vmem>>, vector<16x784xbf16>
    %c0_1 = arith.constant 0 : index
    %c0_2 = arith.constant 0 : index
    %1 = vector.load %arg2[%c0_1, %c0_2] : memref<784x1024xbf16, #tpu.memory_space<vmem>>, vector<784x1024xbf16>
    %cst = arith.constant dense<0.000000e+00> : vector<16x1024xf32>
    %2 = tpu.matmul %0, %1, %cst {dimension_numbers = #tpu.dot_dimension_numbers<[1], [0], [0], [1], [0, 0, 1, 1], [], []>} : vector<16x784xbf16>, vector<784x1024xbf16>, vector<16x1024xf32> -> vector<16x1024xf32>
    %c0_3 = arith.constant 0 : index
    %c0_4 = arith.constant 0 : index
    %3 = vector.load %arg3[%c0_3, %c0_4] : memref<1x1024xf32, #tpu.memory_space<vmem>>, vector<1x1024xf32>
    %4 = vector.broadcast %3 : vector<1x1024xf32> to vector<16x1024xf32>
    %5 = arith.addf %2, %4 : vector<16x1024xf32>
    %cst_5 = arith.constant 0.000000e+00 : f32
    %6 = vector.broadcast %cst_5 : f32 to vector<16x1024xf32>
    %7 = arith.maximumf %5, %6 : vector<16x1024xf32>
    %8 = arith.truncf %7 : vector<16x1024xf32> to vector<16x1024xbf16>
    %c0_6 = arith.constant 0 : index
    %c0_7 = arith.constant 0 : index
    %9 = vector.load %arg4[%c0_6, %c0_7] : memref<1024x128xbf16, #tpu.memory_space<vmem>>, vector<1024x128xbf16>
    %cst_8 = arith.constant dense<0.000000e+00> : vector<16x128xf32>
    %10 = tpu.matmul %8, %9, %cst_8 {dimension_numbers = #tpu.dot_dimension_numbers<[1], [0], [0], [1], [0, 0, 1, 1], [], []>} : vector<16x1024xbf16>, vector<1024x128xbf16>, vector<16x128xf32> -> vector<16x128xf32>
    %c0_9 = arith.constant 0 : index
    %c0_10 = arith.constant 0 : index
    %11 = vector.load %arg5[%c0_9, %c0_10] : memref<1x128xf32, #tpu.memory_space<vmem>>, vector<1x128xf32>
    %12 = vector.broadcast %11 : vector<1x128xf32> to vector<16x128xf32>
    %13 = arith.addf %10, %12 : vector<16x128xf32>
    %cst_11 = arith.constant 0.000000e+00 : f32
    %14 = vector.broadcast %cst_11 : f32 to vector<16x128xf32>
    %15 = arith.maximumf %13, %14 : vector<16x128xf32>
    %16 = arith.truncf %15 : vector<16x128xf32> to vector<16x128xbf16>
    %c0_12 = arith.constant 0 : index
    %c0_13 = arith.constant 0 : index
    %17 = vector.load %arg6[%c0_12, %c0_13] : memref<128x128xbf16, #tpu.memory_space<vmem>>, vector<128x128xbf16>
    %cst_14 = arith.constant dense<0.000000e+00> : vector<16x128xf32>
    %18 = tpu.matmul %16, %17, %cst_14 {dimension_numbers = #tpu.dot_dimension_numbers<[1], [0], [0], [1], [0, 0, 1, 1], [], []>} : vector<16x128xbf16>, vector<128x128xbf16>, vector<16x128xf32> -> vector<16x128xf32>
    %c0_15 = arith.constant 0 : index
    %c0_16 = arith.constant 0 : index
    %19 = vector.load %arg7[%c0_15, %c0_16] : memref<1x128xf32, #tpu.memory_space<vmem>>, vector<1x128xf32>
    %20 = vector.broadcast %19 : vector<1x128xf32> to vector<16x128xf32>
    %21 = arith.addf %18, %20 : vector<16x128xf32>
    %c0_17 = arith.constant 0 : index
    %c0_18 = arith.constant 0 : index
    %22 = vector.load %arg8[%c0_17, %c0_18] : memref<16x128xf32, #tpu.memory_space<vmem>>, vector<16x128xf32>
    tpu.vector_store %arg8[%c0_17, %c0_18], %21 {strides = array<i32>} : memref<16x128xf32, #tpu.memory_space<vmem>>, vector<16x128xf32>,
    return
  }
  func.func @transform_0(%arg0: i32) -> (i32, i32) {
    %c0_i32 = arith.constant 0 : i32
    %c0_i32_0 = arith.constant 0 : i32
    return %arg0, %c0_i32 : i32, i32
  }
  func.func @transform_1(%arg0: i32) -> (i32, i32) {
    %c0_i32 = arith.constant 0 : i32
    %c0_i32_0 = arith.constant 0 : i32
    %c0_i32_1 = arith.constant 0 : i32
    return %c0_i32, %c0_i32_0 : i32, i32
  }
  func.func @transform_2(%arg0: i32) -> (i32, i32) {
    %c0_i32 = arith.constant 0 : i32
    %c0_i32_0 = arith.constant 0 : i32
    %c0_i32_1 = arith.constant 0 : i32
    return %c0_i32, %c0_i32_0 : i32, i32
  }
  func.func @transform_3(%arg0: i32) -> (i32, i32) {
    %c0_i32 = arith.constant 0 : i32
    %c0_i32_0 = arith.constant 0 : i32
    %c0_i32_1 = arith.constant 0 : i32
    return %c0_i32, %c0_i32_0 : i32, i32
  }
  func.func @transform_4(%arg0: i32) -> (i32, i32) {
    %c0_i32 = arith.constant 0 : i32
    %c0_i32_0 = arith.constant 0 : i32
    %c0_i32_1 = arith.constant 0 : i32
    return %c0_i32, %c0_i32_0 : i32, i32
  }
  func.func @transform_5(%arg0: i32) -> (i32, i32) {
    %c0_i32 = arith.constant 0 : i32
    %c0_i32_0 = arith.constant 0 : i32
    %c0_i32_1 = arith.constant 0 : i32
    return %c0_i32, %c0_i32_0 : i32, i32
  }
  func.func @transform_6(%arg0: i32) -> (i32, i32) {
    %c0_i32 = arith.constant 0 : i32
    %c0_i32_0 = arith.constant 0 : i32
    %c0_i32_1 = arith.constant 0 : i32
    return %c0_i32, %c0_i32_0 : i32, i32
  }
  func.func @transform_7(%arg0: i32) -> (i32, i32) {
    %c0_i32 = arith.constant 0 : i32
    %c0_i32_0 = arith.constant 0 : i32
    return %arg0, %c0_i32 : i32, i32
  }
}

module attributes {stable_mosaic.version = 11 : i64} {
  func.func @mlp_kernel(%arg0: i32, %arg1: memref<16x784xbf16, #tpu.memory_space<vmem>>, %arg2: memref<784x1024xbf16, #tpu.memory_space<vmem>>, %arg3: memref<1x1024xf32, #tpu.memory_space<vmem>>, %arg4: memref<1024x128xbf16, #tpu.memory_space<vmem>>, %arg5: memref<1x128xf32, #tpu.memory_space<vmem>>, %arg6: memref<128x128xbf16, #tpu.memory_space<vmem>>, %arg7: memref<1x128xf32, #tpu.memory_space<vmem>>, %arg8: memref<16x128xf32, #tpu.memory_space<vmem>>) attributes {dimension_semantics = [#tpu.dimension_semantics<parallel>], iteration_bounds = array<i64: 2>, scalar_prefetch = 0 : i64, scratch_operands = 0 : i64, tpu.core_type = #tpu.core_type<tc>, window_params = [{transform_indices = @transform_0, window_bounds = array<i64: 16, 784>}, {pipeline_mode = #tpu.pipeline_mode<synchronous>, transform_indices = @transform_1, window_bounds = array<i64: 784, 1024>}, {pipeline_mode = #tpu.pipeline_mode<synchronous>, transform_indices = @transform_2, window_bounds = array<i64: 1, 1024>}, {pipeline_mode = #tpu.pipeline_mode<synchronous>, transform_indices = @transform_3, window_bounds = array<i64: 1024, 128>}, {pipeline_mode = #tpu.pipeline_mode<synchronous>, transform_indices = @transform_4, window_bounds = array<i64: 1, 128>}, {pipeline_mode = #tpu.pipeline_mode<synchronous>, transform_indices = @transform_5, window_bounds = array<i64: 128, 128>}, {pipeline_mode = #tpu.pipeline_mode<synchronous>, transform_indices = @transform_6, window_bounds = array<i64: 1, 128>}, {transform_indices = @transform_7, window_bounds = array<i64: 16, 128>}]} {
    %c0 = arith.constant 0 : index
    %c0_0 = arith.constant 0 : index
    %0 = vector.load %arg1[%c0, %c0_0] : memref<16x784xbf16, #tpu.memory_space<vmem>>, vector<16x784xbf16>
    %c0_1 = arith.constant 0 : index
    %c0_2 = arith.constant 0 : index
    %1 = vector.load %arg2[%c0_1, %c0_2] : memref<784x1024xbf16, #tpu.memory_space<vmem>>, vector<784x1024xbf16>
    %cst = arith.constant dense<0.000000e+00> : vector<16x1024xf32>
    %2 = tpu.matmul %0, %1, %cst {dimension_numbers = #tpu.dot_dimension_numbers<[1], [0], [0], [1], [0, 0, 1, 1], [], []>} : vector<16x784xbf16>, vector<784x1024xbf16>, vector<16x1024xf32> -> vector<16x1024xf32>
    %c0_3 = arith.constant 0 : index
    %c0_4 = arith.constant 0 : index
    %3 = vector.load %arg3[%c0_3, %c0_4] : memref<1x1024xf32, #tpu.memory_space<vmem>>, vector<1x1024xf32>
    %4 = vector.broadcast %3 : vector<1x1024xf32> to vector<16x1024xf32>
    %5 = arith.addf %2, %4 : vector<16x1024xf32>
    %cst_5 = arith.constant 0.000000e+00 : f32
    %6 = vector.broadcast %cst_5 : f32 to vector<16x1024xf32>
    %7 = arith.maximumf %5, %6 : vector<16x1024xf32>
    %8 = arith.truncf %7 : vector<16x1024xf32> to vector<16x1024xbf16>
    %c0_6 = arith.constant 0 : index
    %c0_7 = arith.constant 0 : index
    %9 = vector.load %arg4[%c0_6, %c0_7] : memref<1024x128xbf16, #tpu.memory_space<vmem>>, vector<1024x128xbf16>
    %cst_8 = arith.constant dense<0.000000e+00> : vector<16x128xf32>
    %10 = tpu.matmul %8, %9, %cst_8 {dimension_numbers = #tpu.dot_dimension_numbers<[1], [0], [0], [1], [0, 0, 1, 1], [], []>} : vector<16x1024xbf16>, vector<1024x128xbf16>, vector<16x128xf32> -> vector<16x128xf32>
    %c0_9 = arith.constant 0 : index
    %c0_10 = arith.constant 0 : index
    %11 = vector.load %arg5[%c0_9, %c0_10] : memref<1x128xf32, #tpu.memory_space<vmem>>, vector<1x128xf32>
    %12 = vector.broadcast %11 : vector<1x128xf32> to vector<16x128xf32>
    %13 = arith.addf %10, %12 : vector<16x128xf32>
    %cst_11 = arith.constant 0.000000e+00 : f32
    %14 = vector.broadcast %cst_11 : f32 to vector<16x128xf32>
    %15 = arith.maximumf %13, %14 : vector<16x128xf32>
    %16 = arith.truncf %15 : vector<16x128xf32> to vector<16x128xbf16>
    %c0_12 = arith.constant 0 : index
    %c0_13 = arith.constant 0 : index
    %17 = vector.load %arg6[%c0_12, %c0_13] : memref<128x128xbf16, #tpu.memory_space<vmem>>, vector<128x128xbf16>
    %cst_14 = arith.constant dense<0.000000e+00> : vector<16x128xf32>
    %18 = tpu.matmul %16, %17, %cst_14 {dimension_numbers = #tpu.dot_dimension_numbers<[1], [0], [0], [1], [0, 0, 1, 1], [], []>} : vector<16x128xbf16>, vector<128x128xbf16>, vector<16x128xf32> -> vector<16x128xf32>
    %c0_15 = arith.constant 0 : index
    %c0_16 = arith.constant 0 : index
    %19 = vector.load %arg7[%c0_15, %c0_16] : memref<1x128xf32, #tpu.memory_space<vmem>>, vector<1x128xf32>
    %20 = vector.broadcast %19 : vector<1x128xf32> to vector<16x128xf32>
    %21 = arith.addf %18, %20 : vector<16x128xf32>
    %c0_17 = arith.constant 0 : index
    %c0_18 = arith.constant 0 : index
    %22 = vector.load %arg8[%c0_17, %c0_18] : memref<16x128xf32, #tpu.memory_space<vmem>>, vector<16x128xf32>
    tpu.vector_store %arg8[%c0_17, %c0_18], %21 {strides = array<i32>} : memref<16x128xf32, #tpu.memory_space<vmem>>, vector<16x128xf32>,
    return
  }
  func.func @transform_0(%arg0: i32) -> (i32, i32) {
    %c0_i32 = arith.constant 0 : i32
    %c0_i32_0 = arith.constant 0 : i32
    return %arg0, %c0_i32 : i32, i32
  }
  func.func @transform_1(%arg0: i32) -> (i32, i32) {
    %c0_i32 = arith.constant 0 : i32
    %c0_i32_0 = arith.constant 0 : i32
    %c0_i32_1 = arith.constant 0 : i32
    return %c0_i32, %c0_i32_0 : i32, i32
  }
  func.func @transform_2(%arg0: i32) -> (i32, i32) {
    %c0_i32 = arith.constant 0 : i32
    %c0_i32_0 = arith.constant 0 : i32
    %c0_i32_1 = arith.constant 0 : i32
    return %c0_i32, %c0_i32_0 : i32, i32
  }
  func.func @transform_3(%arg0: i32) -> (i32, i32) {
    %c0_i32 = arith.constant 0 : i32
    %c0_i32_0 = arith.constant 0 : i32
    %c0_i32_1 = arith.constant 0 : i32
    return %c0_i32, %c0_i32_0 : i32, i32
  }
  func.func @transform_4(%arg0: i32) -> (i32, i32) {
    %c0_i32 = arith.constant 0 : i32
    %c0_i32_0 = arith.constant 0 : i32
    %c0_i32_1 = arith.constant 0 : i32
    return %c0_i32, %c0_i32_0 : i32, i32
  }
  func.func @transform_5(%arg0: i32) -> (i32, i32) {
    %c0_i32 = arith.constant 0 : i32
    %c0_i32_0 = arith.constant 0 : i32
    %c0_i32_1 = arith.constant 0 : i32
    return %c0_i32, %c0_i32_0 : i32, i32
  }
  func.func @transform_6(%arg0: i32) -> (i32, i32) {
    %c0_i32 = arith.constant 0 : i32
    %c0_i32_0 = arith.constant 0 : i32
    %c0_i32_1 = arith.constant 0 : i32
    return %c0_i32, %c0_i32_0 : i32, i32
  }
  func.func @transform_7(%arg0: i32) -> (i32, i32) {
    %c0_i32 = arith.constant 0 : i32
    %c0_i32_0 = arith.constant 0 : i32
    return %arg0, %c0_i32 : i32, i32
  }
}

</mosaic_0001>

<bundles_post_ra>
// kernel: tpu_custom_call.1
= control target key start
LH: loop header
LB: loop body
LE: loop exit
PB: predicated region body
PF: predicated region fallthrough
CT: control target
= control target key end

     0   :  { %s6120_s0 = inlined_call_operand.hbm [shape: bf16[30,784], index: 0, kind: input, shape index: {}]   ;;  %s6121_s1 = inlined_call_operand.hbm [shape: bf16[784,1024], index: 1, kind: input, shape index: {}]   ;;  %s6122_s2 = inlined_call_operand.hbm [shape: f32[1,1024], index: 2, kind: input, shape index: {}]   ;;  %s6123_s3 = inlined_call_operand.hbm [shape: bf16[1024,128], index: 3, kind: input, shape index: {}]   ;;  %s6124_s4 = inlined_call_operand.hbm [shape: f32[1,128], index: 4, kind: input, shape index: {}]   ;;  %s6125_s5 = inlined_call_operand.hbm [shape: bf16[128,128], index: 5, kind: input, shape index: {}]   ;;  %s6126_s6 = inlined_call_operand.hbm [shape: f32[1,128], index: 6, kind: input, shape index: {}]   ;;  %s6127_s7 = inlined_call_operand.hbm [shape: f32[30,128], index: 7, kind: output, shape index: {}]  }
   0x1   :  { %6131 = sst [smem:[#allocation20_spill]] %s6121_s1 }
   0x2   :  { %12 = vsyncpa [#allocation3], 0 }
   0x3   :  { %14 = vsyncpa [#allocation3 + $0x1], 0 }
   0x4   :  { %15 = vsyncpa [#allocation6], 0 }
   0x5   :  { %16 = vsyncpa [#allocation9], 0 }
   0x6   :  { %17 = vsyncpa [#allocation12], 0 }
   0x7   :  { %18 = vsyncpa [#allocation4], 0 }
   0x8   :  { %20 = vsyncpa [#allocation4 + $0x1], 0  ;;  %s5711_s24 = smov 0   ;;  %s5713_s25 = smov 0  }
   0x9   :  { %s5715_s26 = smov 0   ;;  %s5717_s27 = smov 0  }
   0xa LB: > { %s5652_s28 = smov [#allocation5]   ;;  %s5732_s30 = sadd.s32 4294967295, %s5650_s27   ;;  %s5650_s27 = sphi %s5717_s27, %s6154_s27   ;;  %s5646_s26 = sphi %s5715_s26, %s6153_s26   ;;  %s5642_s25 = sphi %s5713_s25, %s6152_s25   ;;  %s5638_s24 = sphi %s5711_s24, %s6151_s24  }
   0xb   : > { %s221_s29 = sshll.u32 %s5652_s28, 4  ;;  %p4480_p0 = scmp.ge.s32.totalorder %s5650_s27, 1  ;;  %s5737_s29 = int_to_ptr.vmem [resolvable:$true] %s221_s29 }
   0xc   : > { %p6128_p1 = scmp.eq.s32.totalorder %s5732_s30, 0  ;;  %p209_p2 = scmp.lt.s32.totalorder %s5650_s27, 3 }
   0xd   : > { %s5653_s9 = smov [#allocation8]   ;;  %s5654_s12 = smov [#allocation11]  }
   0xe   : > { %p5739_p3 = pnand %p4480_p0, %p209_p2  ;;  %s245_s10 = sshll.u32 %s5653_s9, 4  ;;  %s5752_s10 = int_to_ptr.vmem [resolvable:$true] %s245_s10 }
   0xf   : > { %s5754_s13 = sshll.u32 %s5654_s12, 4  ;;  %s6134_s1 = sld [smem:[#allocation20_spill]]  ;;  %s270_s13 = int_to_ptr.vmem [resolvable:$true] %s5754_s13 }
  0x10   : > { %s6132_s8 = scalar_select %p5739_p3, 1, 0 }
  0x11   : > { %p5194_p5 = pneg %p5739_p3 }
  0x13   : > { %p5748_p6 = pnand %p5194_p5, %p6128_p1 }
  0x15   : > { %s5374_s16 = scalar_lea.hbm %s6134_s1, 50176  ;;  %p5764_p8 = pneg %p5748_p6 }
  0x16   : > { %p5375_p7 = scmp.ne.s32.totalorder %s6134_s1, %s5374_s16  ;;  %p5381_p11 = scmp.lt.u32.totalorder %s5374_s16, %s6134_s1 }
  0x18   : > { %p5377_p9 = pnand %p5764_p8, %p5375_p7 }
  0x1a   : > { %p5378_p10 = pneg %p5377_p9 }
  0x1c   : > { %p5383_p12 = pnand %p5381_p11, %p5378_p10 }
  0x1e   : > { %5386 = shalt.err (!%p5383_p12)
}
  0x1f   : > { %s5387_s22 = scalar_lea.vmem %s5737_s29, 50176  ;;  %p5395_p5 = scmp.lt.s32.totalorder %s5737_s29, %s5737_s29 }
  0x20   : > { %p5388_p13 = scmp.ne.s32.totalorder %s5737_s29, %s5387_s22  ;;  %p5396_p4 = scmp.lt.s32.totalorder %s5387_s22, %s5387_s22 }
  0x22   : > { %p5390_p0 = pnand %p5388_p13, %p5764_p8  ;;  %p5397_p7 = por %p5396_p4, %p5395_p5 }
  0x24   : > { %p5391_p2 = pneg %p5390_p0 }
  0x26   : > { %p5398_p9 = pnand %p5397_p7, %p5391_p2 }
  0x28   : > { %5401 = shalt.err (!%p5398_p9)
}
  0x29   : > { %s5655_s23 = smov 512   ;;  %s5656_s28 = smov 32  }
  0x2a   : > { %5197 = dma.hbm_to_vmem [thread:$0]  (!%p5748_p6), %s6134_s1, 50176, %s5737_s29, [#allocation6], %s5655_s23, %s5655_s23, %s5656_s28  }
  0x2b   : > { %s5402_s16 = scalar_lea.hbm %s6123_s3, 8192 }
  0x2c   : > { %p5403_p4 = scmp.ne.s32.totalorder %s6123_s3, %s5402_s16  ;;  %p5409_p12 = scmp.lt.u32.totalorder %s5402_s16, %s6123_s3 }
  0x2e   : > { %p5405_p10 = pnand %p5403_p4, %p5764_p8 }
  0x30   : > { %p5406_p11 = pneg %p5405_p10 }
  0x32   : > { %p5411_p13 = pnand %p5409_p12, %p5406_p11 }
  0x34   : > { %5414 = shalt.err (!%p5411_p13)
}
  0x35   : > { %s5415_s29 = scalar_lea.vmem %s5752_s10, 8192  ;;  %p5423_p7 = scmp.lt.s32.totalorder %s5752_s10, %s5752_s10 }
  0x36   : > { %p5416_p0 = scmp.ne.s32.totalorder %s5752_s10, %s5415_s29  ;;  %p5424_p9 = scmp.lt.s32.totalorder %s5415_s29, %s5415_s29 }
  0x38   : > { %p5418_p2 = pnand %p5416_p0, %p5764_p8  ;;  %p5425_p4 = por %p5424_p9, %p5423_p7 }
  0x3a   : > { %p5419_p5 = pneg %p5418_p2 }
  0x3c   : > { %p5426_p10 = pnand %p5425_p4, %p5419_p5 }
  0x3e   : > { %5429 = shalt.err (!%p5426_p10)
}
  0x3f   : > { %s5657_s22 = smov 64   ;;  %s5658_s23 = smov 4  }
  0x40   : > { %5203 = dma.hbm_to_vmem [thread:$0]  (!%p5748_p6), %s6123_s3, 8192, %s5752_s10, [#allocation9], %s5657_s22, %s5657_s22, %s5658_s23  }
  0x41   : > { %s5430_s15 = scalar_lea.hbm %s6125_s5, 1024 }
  0x42   : > { %p5431_p11 = scmp.ne.s32.totalorder %s6125_s5, %s5430_s15  ;;  %p5437_p0 = scmp.lt.u32.totalorder %s5430_s15, %s6125_s5 }
  0x44   : > { %p5433_p12 = pnand %p5431_p11, %p5764_p8 }
  0x46   : > { %p5434_p13 = pneg %p5433_p12 }
  0x48   : > { %p5439_p2 = pnand %p5437_p0, %p5434_p13 }
  0x4a   : > { %5442 = shalt.err (!%p5439_p2)
}
  0x4b   : > { %s5443_s21 = scalar_lea.vmem %s270_s13, 1024  ;;  %p5451_p4 = scmp.lt.s32.totalorder %s270_s13, %s270_s13 }
  0x4c   : > { %p5444_p5 = scmp.ne.s32.totalorder %s270_s13, %s5443_s21  ;;  %p5452_p10 = scmp.lt.s32.totalorder %s5443_s21, %s5443_s21 }
  0x4e   : > { %p5446_p7 = pnand %p5444_p5, %p5764_p8  ;;  %p5453_p1 = por %p5452_p10, %p5451_p4 }
  0x50   : > { %p5447_p9 = pneg %p5446_p7 }
  0x52   : > { %p5454_p3 = pnand %p5453_p1, %p5447_p9 }
  0x54   : > { %5457 = shalt.err (!%p5454_p3)
}
  0x55   : > { %5209 = dma.hbm_to_vmem [thread:$0]  (!%p5748_p6), %s6125_s5, 1024, %s270_s13, [#allocation12], %s5657_s22, %s5657_s22, %s5658_s23  }
  0x56   : > { %s5659_s28 = smov [#allocation7]   ;;  %s5660_s12 = smov [#allocation10]  }
  0x57   : > { %s235_s9 = sshll.u32 %s5659_s28, 4  ;;  %s259_s14 = sshll.u32 %s5660_s12, 4  ;;  %s236_s9 = int_to_ptr.vmem [resolvable:$true] %s235_s9  ;;  %s260_s14 = int_to_ptr.vmem [resolvable:$true] %s259_s14 }
  0x58   : > { %s5458_s17 = scalar_lea.hbm %s6122_s2, 128 }
  0x59   : > { %p5459_p1 = scmp.ne.s32.totalorder %s6122_s2, %s5458_s17  ;;  %p5465_p12 = scmp.lt.u32.totalorder %s5458_s17, %s6122_s2 }
  0x5b   : > { %p5461_p3 = pnand %p5459_p1, %p5764_p8 }
  0x5d   : > { %p5462_p11 = pneg %p5461_p3 }
  0x5f   : > { %p5467_p13 = pnand %p5465_p12, %p5462_p11 }
  0x61   : > { %5470 = shalt.err (!%p5467_p13)
}
  0x62   : > { %s5471_s13 = scalar_lea.vmem %s236_s9, 128  ;;  %p5479_p7 = scmp.lt.s32.totalorder %s236_s9, %s236_s9 }
  0x63   : > { %p5472_p0 = scmp.ne.s32.totalorder %s236_s9, %s5471_s13  ;;  %p5480_p9 = scmp.lt.s32.totalorder %s5471_s13, %s5471_s13 }
  0x65   : > { %p5474_p2 = pnand %p5472_p0, %p5764_p8  ;;  %p5481_p4 = por %p5480_p9, %p5479_p7 }
  0x67   : > { %p5475_p5 = pneg %p5474_p2 }
  0x69   : > { %p5482_p10 = pnand %p5481_p4, %p5475_p5 }
  0x6b   : > { %5485 = shalt.err (!%p5482_p10)
}
  0x6c   : > { %5200 = dma.hbm_to_vmem [thread:$0]  (!%p5748_p6), %s6122_s2, 128, %s236_s9, [#allocation6]  }
  0x6d   : > { %s5486_s12 = scalar_lea.hbm %s6124_s4, 16 }
  0x6e   : > { %p5487_p1 = scmp.ne.s32.totalorder %s6124_s4, %s5486_s12  ;;  %p5493_p12 = scmp.lt.u32.totalorder %s5486_s12, %s6124_s4 }
  0x70   : > { %p5489_p3 = pnand %p5487_p1, %p5764_p8 }
  0x72   : > { %p5490_p11 = pneg %p5489_p3 }
  0x74   : > { %p5495_p13 = pnand %p5493_p12, %p5490_p11 }
  0x76   : > { %5498 = shalt.err (!%p5495_p13)
}
  0x77   : > { %s5499_s20 = scalar_lea.vmem %s260_s14, 16  ;;  %s5506_s9 = scalar_lea.vmem %s260_s14, 32 }
  0x78   : > { %p5500_p0 = scmp.ne.s32.totalorder %s260_s14, %s5499_s20  ;;  %p5507_p7 = scmp.lt.s32.totalorder %s260_s14, %s260_s14 }
  0x79   : > { %p5508_p9 = scmp.lt.s32.totalorder %s5506_s9, %s5499_s20 }
  0x7a   : > { %p5502_p2 = pnand %p5500_p0, %p5764_p8 }
  0x7b   : > { %p5509_p4 = por %p5508_p9, %p5507_p7 }
  0x7c   : > { %p5503_p5 = pneg %p5502_p2 }
  0x7e   : > { %p5510_p10 = pnand %p5509_p4, %p5503_p5 }
  0x80   : > { %5513 = shalt.err (!%p5510_p10)
}
  0x81   : > { %5206 = dma.hbm_to_vmem [thread:$0]  (!%p5748_p6), %s6124_s4, 16, %s260_s14, [#allocation9]  }
  0x82   : > { %s5661_s13 = smov [#allocation13]   ;;  %s5514_s28 = scalar_lea.hbm %s6126_s6, 16 }
  0x83   : > { %s283_s22 = sshll.u32 %s5661_s13, 4  ;;  %p5515_p1 = scmp.ne.s32.totalorder %s6126_s6, %s5514_s28  ;;  %s284_s22 = int_to_ptr.vmem [resolvable:$true] %s283_s22 }
  0x84   : > { %p5521_p12 = scmp.lt.u32.totalorder %s5514_s28, %s6126_s6 }
  0x85   : > { %p5517_p3 = pnand %p5515_p1, %p5764_p8 }
  0x87   : > { %p5518_p11 = pneg %p5517_p3 }
  0x89   : > { %p5523_p13 = pnand %p5521_p12, %p5518_p11 }
  0x8b   : > { %5526 = shalt.err (!%p5523_p13)
}
  0x8c   : > { %s5527_s14 = scalar_lea.vmem %s284_s22, 16  ;;  %s5534_s18 = scalar_lea.vmem %s284_s22, 32 }
  0x8d   : > { %p5528_p0 = scmp.ne.s32.totalorder %s284_s22, %s5527_s14  ;;  %p5535_p7 = scmp.lt.s32.totalorder %s284_s22, %s284_s22 }
  0x8e   : > { %p5536_p9 = scmp.lt.s32.totalorder %s5534_s18, %s5527_s14 }
  0x8f   : > { %p5530_p2 = pnand %p5528_p0, %p5764_p8 }
  0x90   : > { %p5537_p4 = por %p5536_p9, %p5535_p7 }
  0x91   : > { %p5531_p5 = pneg %p5530_p2 }
  0x93   : > { %p5538_p10 = pnand %p5537_p4, %p5531_p5 }
  0x95   : > { %5541 = shalt.err (!%p5538_p10)
}
  0x96   : > { %5212 = dma.hbm_to_vmem [thread:$0]  (!%p5748_p6), %s6126_s6, 16, %s284_s22, [#allocation12]  }
  0x97   : > { %s4479_s19 = sadd.s32 4294967294, %s5650_s27   ;;  %s5883_s11 = sadd.s32 1, %s5650_s27  }
  0x98   : > { %s30_s21 = ssub.s32 %s5650_s27, %s5883_s11  ;;  %s33_s10 = sadd.s32 1, %s5646_s26 }
  0x99   : > { %p31_p8 = scmp.eq.s32.totalorder %s30_s21, 0  ;;  %p40_p1 = scmp.ne.s32.totalorder %s5646_s26, %s5642_s25 }
  0x9a   : > { %p41_p3 = scmp.eq.s32.totalorder %s5650_s27, 0  ;;  %p46_p11 = scmp.ne.s32.totalorder %s5642_s25, %s5638_s24 }
  0x9b   : > { %s5894_s13 = scalar_select %p31_p8, %s5646_s26, %s33_s10  }
  0x9c   : > { %p42_p12 = por %p41_p3, %p40_p1  ;;  %p6136_p13 = scmp.eq.s32.totalorder %s5732_s30, 0 }
  0x9d   : > { %p196_p6 = scmp.eq.s32.totalorder %s5732_s30, 1  ;;  %p202_p2 = scmp.eq.s32.totalorder %s4479_s19, 1 }
  0x9e   : > { %p5898_p0 = por %p6136_p13, %p46_p11  ;;  %p5227_p5 = scmp.lt.s32.totalorder %s5650_s27, 2 }
  0x9f   : > { %s294_s22 = sand.u32 1, %s5646_s26   ;;  %p5905_p7 = por %p196_p6, %p40_p1 }
  0xa0   : > { %p5909_p9 = por %p202_p2, %p46_p11  ;;  %s5163_s12 = smul.u32 56, %s294_s22 }
  0xa1   : > { %s6138_s29 = scalar_select %p5905_p7, 1, 0 }
  0xa2   : > { %s6139_s28 = scalar_select %p5909_p9, 1, 0 }
  0xa3   : > { %s5164_s15 = smul.u32 896, %s5650_s27  ;;  %p5914_p4 = pnand %p5227_p5, %p42_p12 }
  0xa4   : > { %s298_s20 = scalar_lea.vmem [#allocation2], %s5163_s12  ;;  %s5925_s19 = scalar_lea.sflag [#allocation3], %s294_s22 }
  0xa5   : > { %s5921_s18 = scalar_lea.hbm %s6120_s0, %s5164_s15  ;;  %s306_s9 = sshll.u32 %s298_s20, 4  ;;  %s5923_s9 = int_to_ptr.vmem [resolvable:$true] %s306_s9 }
  0xa6   : > { %s5542_s21 = scalar_lea.hbm %s5921_s18, 896  ;;  %p5544_p8 = pneg %p5914_p4 }
  0xa7   : > { %p5543_p10 = scmp.ne.s32.totalorder %s5921_s18, %s5542_s21  ;;  %s5547_s17 = scalar_lea.hbm %s6120_s0, 1792 }
  0xa8   : > { %p5548_p11 = scmp.lt.u32.totalorder %s5921_s18, %s6120_s0  ;;  %p5549_p12 = scmp.lt.u32.totalorder %s5547_s17, %s5542_s21 }
  0xa9   : > { %p5545_p1 = pnand %p5544_p8, %p5543_p10  ;;  %p5551_p6 = scmp.lt.u32.totalorder %s5542_s21, %s5921_s18 }
  0xaa   : > { %p5550_p13 = por %p5549_p12, %p5548_p11 }
  0xab   : > { %p5546_p3 = pneg %p5545_p1 }
  0xac   : > { %p5552_p2 = por %p5551_p6, %p5550_p13 }
  0xae   : > { %p5553_p5 = pnand %p5552_p2, %p5546_p3 }
  0xb0   : > { %5556 = shalt.err (!%p5553_p5)
}
  0xb1   : > { %s5557_s22 = scalar_lea.vmem %s5923_s9, 896  ;;  %s5662_s12 = smov [#allocation2]  }
  0xb2   : > { %p5558_p10 = scmp.ne.s32.totalorder %s5923_s9, %s5557_s22  ;;  %s5562_s20 = sshll.u32 %s5662_s12, 4  ;;  %s5563_s20 = int_to_ptr.vmem [resolvable:$false] %s5562_s20 }
  0xb3   : > { %s5564_s1 = scalar_lea.vmem %s5563_s20, 1792  ;;  %p5565_p7 = scmp.lt.s32.totalorder %s5923_s9, %s5563_s20 }
  0xb4   : > { %p5560_p1 = pnand %p5558_p10, %p5544_p8  ;;  %p5566_p11 = scmp.lt.s32.totalorder %s5564_s1, %s5557_s22 }
  0xb6   : > { %p5561_p9 = pneg %p5560_p1  ;;  %p5567_p12 = por %p5566_p11, %p5565_p7 }
  0xb8   : > { %p5568_p13 = pnand %p5567_p12, %p5561_p9 }
  0xba   : > { %5571 = shalt.err (!%p5568_p13)
}
  0xbb   : > { %s5663_s21 = smov 448   ;;  %s5664_s10 = smov 28  }
  0xbc   : > { %5216 = dma.hbm_to_vmem [thread:$0]  (!%p5914_p4), %s5921_s18, 896, %s5923_s9, %s5925_s19, %s5663_s21, %s5663_s21, %s5664_s10  }
  0xbd   : > { %p6141_p8 = scmp.ne.s32.totalorder %s6132_s8, 0 }
  0xbe   : > { %s5956_s15 = sand.u32 (!%p6141_p8), 1, %s5642_s25  }
  0xbf   : > { %318 = sbr.rel (%p6141_p8) target bundleno = 1311 (0x51f), region = 48  ;;  %s321_s14 = scalar_lea.sflag (!%p6141_p8), [#allocation3], %s5956_s15 }
  0xc0   : > { %s5165_s17 = smul.u32 (!%p6141_p8), 56, %s5956_s15 }
  0xc2   : > { %s5960_s22 = scalar_lea.vmem (!%p6141_p8), [#allocation2], %s5165_s17 }
  0xc6   : > { %5617 = dma.done.wait (%p5898_p0), %s321_s14, 896  }
  0xc7   : > { %5619 = vsyncadd (%p5898_p0), %s321_s14, 4294966400  ;;  %p6142_p7 = scmp.eq.s32.totalorder %s5732_s30, 0 }
  0xc9   : > { %5621 = dma.done.wait (%p6142_p7), [#allocation6], 50304   ;;  %p6143_p9 = pmov %p6142_p7 }
  0xca   : > { %p6144_p4 = pmov %p6142_p7 }
  0xcb   : > { %5623 = vsyncadd (%p6143_p9), [#allocation6], 4294916992 }
  0xcc   : > { %5625 = dma.done.wait (%p6144_p4), [#allocation9], 8208   ;;  %p6145_p3 = pmov %p6144_p4 }
  0xce   : > { %5627 = vsyncadd (%p6145_p3), [#allocation9], 4294959088  ;;  %p6146_p6 = pmov %p6145_p3 }
  0xcf   : > { %p6147_p2 = pmov %p6145_p3 }
  0xd0   : > { %5629 = dma.done.wait (%p6146_p6), [#allocation12], 1040  }
  0xd1   : > { %5631 = vsyncadd (%p6147_p2), [#allocation12], 4294966256  ;;  %v5665_v0 = vmov 0   ;;  %v390_v1 = vld [vmem:[#allocation5] sm:$0xff]  ;;  %v391_v13 = vld [vmem:[#allocation5 + $0x8] sm:$0xff]  ;;  %vm2819_vm0 = vcmask 130048  }
  0xd2   : > { %2984 = vmatprep.mubr.bf16.mxu1 %v5665_v0  ;;  %v394_v2 = vld [vmem:[#allocation5 + $0x20] sm:$0xff]  ;;  %v395_v14 = vld [vmem:[#allocation5 + $0x28] sm:$0xff]  ;;  %vm5667_vm1 = vmmov 0   ;;  %s4498_s8 = sshll.u32 %s5956_s15, 4  ;;  %s4981_s18 = sshll.u32 %s5732_s30, 8 }
  0xd3   : > { %v774_v3 = vld [vmem:[#allocation5 + $0xc00] sm:$0xff]  ;;  %v4507_v4 = vcombine.high %v390_v1, %v394_v2  ;;  %v4506_v6 = vcombine.low %v390_v1, %v394_v2  ;;  %v4509_v16 = vcombine.high %v391_v13, %v395_v14  ;;  %v399_v19 = vld [vmem:[#allocation5 + $0x48] sm:$0xff]  ;;  %v4508_v21 = vcombine.low %v391_v13, %v395_v14  ;;  %s378_s23 = scalar_lea.vmem [#allocation14], %s4498_s8  ;;  %s6076_s12 = scalar_lea.hbm %s6127_s7, %s4981_s18 }
  0xd4   : > { %v778_v5 = vld [vmem:[#allocation5 + $0xc20] sm:$0xff]  ;;  %v403_v20 = vld [vmem:[#allocation5 + $0x68] sm:$0xff]  ;;  %s4349_s16 = sshll.u32 %s378_s23, 4  ;;  %s4336_s20 = scalar_lea.sflag [#allocation4], %s5956_s15  ;;  %s6071_s16 = int_to_ptr.vmem [resolvable:$true] %s4349_s16 }
  0xd5   : > { %v398_v7 = vld [vmem:[#allocation5 + $0x40] sm:$0xff]  ;;  %v4891_v9 = vcombine.high %v774_v3, %v778_v5  ;;  %v4890_v10 = vcombine.low %v774_v3, %v778_v5  ;;  %2823 = vmatprep.subr.bf16.mxu0 %v4507_v4  ;;  %v4517_v23 = vcombine.high %v399_v19, %v403_v20  ;;  %v407_v26 = vld [vmem:[#allocation5 + $0x88] sm:$0xff]  ;;  %v4516_v29 = vcombine.low %v399_v19, %v403_v20  ;;  %s5572_s30 = scalar_lea.vmem %s6071_s16, 256  ;;  %p6148_p5 = scmp.ne.s32.totalorder %s6138_s29, 0 }
  0xd6   : > { %v402_v8 = vld [vmem:[#allocation5 + $0x60] sm:$0xff]  ;;  %2824 = vmatpush1.bf16.msra.mxu0 %v4506_v6  ;;  %v411_v27 = vld [vmem:[#allocation5 + $0xa8] sm:$0xff]  ;;  %p5573_p0 = scmp.ne.s32.totalorder %s6071_s16, %s5572_s30  ;;  %s5668_s1 = smov [#allocation14]  }
  0xd7   : > { %v4515_v11 = vcombine.high %v398_v7, %v402_v8  ;;  %v5284_v12 = vld [vmem:[%s5960_s22 + $0x18] ss:$28 sps:$4 sm:$0xff]   ;;  %2952 = vmatprep.subr.bf16.mxu1 %v4891_v9  ;;  %v4514_v17 = vcombine.low %v398_v7, %v402_v8  ;;  %v4525_v31 = vcombine.high %v407_v26, %v411_v27  ;;  %v4524_v37 = vcombine.low %v407_v26, %v411_v27  ;;  %v5285_v60 = vld [vmem:[%s5960_s22 + $0x4] ss:$28 sps:$4 sm:$0xff]   ;;  %s5576_s21 = sshll.u32 %s5668_s1, 4  ;;  %s5577_s21 = int_to_ptr.vmem [resolvable:$false] %s5576_s21 }
  0xd8   : > { %v406_v15 = vld [vmem:[#allocation5 + $0x80] sm:$0xff]  ;;  %2953 = vmatpush1.bf16.msra.mxu1 %v4890_v10  ;;  %v415_v34 = vld [vmem:[#allocation5 + $0xc8] sm:$0xff]  ;;  %2855 = vmatprep.mubr.bf16.mxu0 %v5285_v60  ;;  %p5574_p10 = pnand %p5573_p0, %p6148_p5  ;;  %s5578_s10 = scalar_lea.vmem %s5577_s21, 512 }
  0xd9   : > { %v410_v18 = vld [vmem:[#allocation5 + $0xa0] sm:$0xff]  ;;  %2825 = vmatprep.subr.bf16.mxu0 %v4515_v11  ;;  %2995 = vmatprep.subr.bf16.mxu1 %v4509_v16  ;;  %v419_v35 = vld [vmem:[#allocation5 + $0xe8] sm:$0xff]  ;;  %p5579_p11 = scmp.lt.s32.totalorder %s6071_s16, %s5577_s21  ;;  %p5580_p12 = scmp.lt.s32.totalorder %s5578_s10, %s5572_s30 }
  0xda   : > { %v4523_v22 = vcombine.high %v406_v15, %v410_v18  ;;  %v414_v24 = vld [vmem:[#allocation5 + $0xc0] sm:$0xff]  ;;  %2826 = vmatpush1.bf16.msra.mxu0 %v4514_v17  ;;  %v4522_v28 = vcombine.low %v406_v15, %v410_v18  ;;  %v4533_v39 = vcombine.high %v415_v34, %v419_v35  ;;  %v423_v42 = vld [vmem:[#allocation5 + $0x108] sm:$0xff]  ;;  %v4532_v45 = vcombine.low %v415_v34, %v419_v35  ;;  %p5575_p1 = pneg %p5574_p10 }
  0xdb   : > { %v418_v25 = vld [vmem:[#allocation5 + $0xe0] sm:$0xff]  ;;  %4898 = vmatmul.mubr.msk.bf16.vlgmr.msra.gmra.mrb[0].mxu1 %vm2819_vm0, %v5284_v12  ;;  %v427_v43 = vld [vmem:[#allocation5 + $0x128] sm:$0xff]  ;;  %p5581_p13 = por %p5580_p12, %p5579_p11 }
  0xdc   : > { %2996 = vmatpush1.bf16.msra.mxu1 %v4508_v21  ;;  %2827 = vmatprep.subr.bf16.mxu0 %v4523_v22  ;;  %v4531_v30 = vcombine.high %v414_v24, %v418_v25  ;;  %v422_v32 = vld [vmem:[#allocation5 + $0x100] sm:$0xff]  ;;  %v4530_v36 = vcombine.low %v414_v24, %v418_v25  ;;  %v4541_v47 = vcombine.high %v423_v42, %v427_v43  ;;  %v431_v50 = vld [vmem:[#allocation5 + $0x148] sm:$0xff] }
  0xdd   : > { %2997 = vmatprep.subr.bf16.mxu1 %v4517_v23  ;;  %v426_v33 = vld [vmem:[#allocation5 + $0x120] sm:$0xff]  ;;  %v435_v51 = vld [vmem:[#allocation5 + $0x168] sm:$0xff]  ;;  %v4540_v53 = vcombine.low %v423_v42, %v427_v43  ;;  %3027 = vmatprep.mubr.bf16.mxu1 %v5285_v60  ;;  %p5582_p8 = pnand %p5581_p13, %p5575_p1 }
  0xde   : > { %2828 = vmatpush1.bf16.msra.mxu0 %v4522_v28  ;;  %v4539_v38 = vcombine.high %v422_v32, %v426_v33  ;;  %v430_v40 = vld [vmem:[#allocation5 + $0x140] sm:$0xff]  ;;  %v4538_v44 = vcombine.low %v422_v32, %v426_v33  ;;  %v4549_v56 = vcombine.high %v431_v50, %v435_v51  ;;  %v439_v58 = vld [vmem:[#allocation5 + $0x188] sm:$0xff]  ;;  %v4548_v62 = vcombine.low %v431_v50, %v435_v51 }
  0xdf   : > { %2829 = vmatprep.subr.bf16.mxu0 %v4531_v30  ;;  %v434_v41 = vld [vmem:[#allocation5 + $0x160] sm:$0xff]  ;;  %v443_v59 = vld [vmem:[#allocation5 + $0x1a8] sm:$0xff] }
  0xe0   : > { %2998 = vmatpush1.bf16.msra.mxu1 %v4516_v29  ;;  %v4547_v46 = vcombine.high %v430_v40, %v434_v41  ;;  %v438_v48 = vld [vmem:[#allocation5 + $0x180] sm:$0xff]  ;;  %v4546_v52 = vcombine.low %v430_v40, %v434_v41  ;;  %v4557_v1 = vcombine.high %v439_v58, %v443_v59  ;;  %v447_v4 = vld [vmem:[#allocation5 + $0x1c8] sm:$0xff]  ;;  %v4556_v7 = vcombine.low %v439_v58, %v443_v59 }
  0xe1   : > { %2999 = vmatprep.subr.bf16.mxu1 %v4525_v31  ;;  %v442_v49 = vld [vmem:[#allocation5 + $0x1a0] sm:$0xff]  ;;  %v451_v5 = vld [vmem:[#allocation5 + $0x1e8] sm:$0xff] }
  0xe2   : > { %2830 = vmatpush1.bf16.msra.mxu0 %v4530_v36  ;;  %v4555_v54 = vcombine.high %v438_v48, %v442_v49  ;;  %v446_v55 = vld [vmem:[#allocation5 + $0x1c0] sm:$0xff]  ;;  %v4554_v61 = vcombine.low %v438_v48, %v442_v49  ;;  %v4565_v9 = vcombine.high %v447_v4, %v451_v5  ;;  %v455_v12 = vld [vmem:[#allocation5 + $0x208] sm:$0xff]  ;;  %v4564_v15 = vcombine.low %v447_v4, %v451_v5 }
  0xe3   : > { %2831 = vmatprep.subr.bf16.mxu0 %v4539_v38  ;;  %v450_v57 = vld [vmem:[#allocation5 + $0x1e0] sm:$0xff]  ;;  %v459_v13 = vld [vmem:[#allocation5 + $0x228] sm:$0xff] }
  0xe4   : > { %3000 = vmatpush1.bf16.msra.mxu1 %v4524_v37  ;;  %v4563_v63 = vcombine.high %v446_v55, %v450_v57  ;;  %v454_v2 = vld [vmem:[#allocation5 + $0x200] sm:$0xff]  ;;  %v4562_v6 = vcombine.low %v446_v55, %v450_v57  ;;  %v4573_v17 = vcombine.high %v455_v12, %v459_v13  ;;  %v463_v20 = vld [vmem:[#allocation5 + $0x248] sm:$0xff]  ;;  %v4572_v23 = vcombine.low %v455_v12, %v459_v13 }
  0xe5   : > { %3001 = vmatprep.subr.bf16.mxu1 %v4533_v39  ;;  %v458_v3 = vld [vmem:[#allocation5 + $0x220] sm:$0xff]  ;;  %v467_v21 = vld [vmem:[#allocation5 + $0x268] sm:$0xff] }
  0xe6   : > { %2832 = vmatpush1.bf16.msra.mxu0 %v4538_v44  ;;  %v4571_v8 = vcombine.high %v454_v2, %v458_v3  ;;  %v462_v10 = vld [vmem:[#allocation5 + $0x240] sm:$0xff]  ;;  %v4570_v14 = vcombine.low %v454_v2, %v458_v3  ;;  %v4581_v25 = vcombine.high %v463_v20, %v467_v21  ;;  %v471_v28 = vld [vmem:[#allocation5 + $0x288] sm:$0xff]  ;;  %v4580_v31 = vcombine.low %v463_v20, %v467_v21 }
  0xe7   : > { %2833 = vmatprep.subr.bf16.mxu0 %v4547_v46  ;;  %v466_v11 = vld [vmem:[#allocation5 + $0x260] sm:$0xff]  ;;  %v475_v29 = vld [vmem:[#allocation5 + $0x2a8] sm:$0xff] }
  0xe8   : > { %3002 = vmatpush1.bf16.msra.mxu1 %v4532_v45  ;;  %v4579_v16 = vcombine.high %v462_v10, %v466_v11  ;;  %v470_v18 = vld [vmem:[#allocation5 + $0x280] sm:$0xff]  ;;  %v4578_v22 = vcombine.low %v462_v10, %v466_v11  ;;  %v4589_v33 = vcombine.high %v471_v28, %v475_v29  ;;  %v479_v36 = vld [vmem:[#allocation5 + $0x2c8] sm:$0xff]  ;;  %v4588_v39 = vcombine.low %v471_v28, %v475_v29 }
  0xe9   : > { %3003 = vmatprep.subr.bf16.mxu1 %v4541_v47  ;;  %v474_v19 = vld [vmem:[#allocation5 + $0x2a0] sm:$0xff]  ;;  %v483_v37 = vld [vmem:[#allocation5 + $0x2e8] sm:$0xff] }
  0xea   : > { %2834 = vmatpush1.bf16.msra.mxu0 %v4546_v52  ;;  %v4587_v24 = vcombine.high %v470_v18, %v474_v19  ;;  %v478_v26 = vld [vmem:[#allocation5 + $0x2c0] sm:$0xff]  ;;  %v4586_v30 = vcombine.low %v470_v18, %v474_v19  ;;  %v4597_v41 = vcombine.high %v479_v36, %v483_v37  ;;  %v487_v44 = vld [vmem:[#allocation5 + $0x308] sm:$0xff]  ;;  %v4596_v47 = vcombine.low %v479_v36, %v483_v37 }
  0xeb   : > { %2835 = vmatprep.subr.bf16.mxu0 %v4555_v54  ;;  %v482_v27 = vld [vmem:[#allocation5 + $0x2e0] sm:$0xff]  ;;  %v491_v45 = vld [vmem:[#allocation5 + $0x328] sm:$0xff] }
  0xec   : > { %3004 = vmatpush1.bf16.msra.mxu1 %v4540_v53  ;;  %v4595_v32 = vcombine.high %v478_v26, %v482_v27  ;;  %v486_v34 = vld [vmem:[#allocation5 + $0x300] sm:$0xff]  ;;  %v4594_v38 = vcombine.low %v478_v26, %v482_v27  ;;  %v4605_v49 = vcombine.high %v487_v44, %v491_v45  ;;  %v495_v52 = vld [vmem:[#allocation5 + $0x348] sm:$0xff]  ;;  %v4604_v55 = vcombine.low %v487_v44, %v491_v45 }
  0xed   : > { %3005 = vmatprep.subr.bf16.mxu1 %v4549_v56  ;;  %v490_v35 = vld [vmem:[#allocation5 + $0x320] sm:$0xff]  ;;  %v499_v53 = vld [vmem:[#allocation5 + $0x368] sm:$0xff] }
  0xee   : > { %2836 = vmatpush1.bf16.msra.mxu0 %v4554_v61  ;;  %v4603_v40 = vcombine.high %v486_v34, %v490_v35  ;;  %v494_v42 = vld [vmem:[#allocation5 + $0x340] sm:$0xff]  ;;  %v4602_v46 = vcombine.low %v486_v34, %v490_v35  ;;  %v4613_v57 = vcombine.high %v495_v52, %v499_v53  ;;  %v503_v60 = vld [vmem:[#allocation5 + $0x388] sm:$0xff] }
  0xef   : > { %2837 = vmatprep.subr.bf16.mxu0 %v4563_v63  ;;  %v498_v43 = vld [vmem:[#allocation5 + $0x360] sm:$0xff]  ;;  %v507_v61 = vld [vmem:[#allocation5 + $0x3a8] sm:$0xff]  ;;  %v4612_v63 = vcombine.low %v495_v52, %v499_v53 }
  0xf0   : > { %3006 = vmatpush1.bf16.msra.mxu1 %v4548_v62  ;;  %v4611_v48 = vcombine.high %v494_v42, %v498_v43  ;;  %v502_v50 = vld [vmem:[#allocation5 + $0x380] sm:$0xff]  ;;  %v4610_v54 = vcombine.low %v494_v42, %v498_v43  ;;  %v4621_v2 = vcombine.high %v503_v60, %v507_v61  ;;  %v511_v5 = vld [vmem:[#allocation5 + $0x3c8] sm:$0xff] }
  0xf1   : > { %3007 = vmatprep.subr.bf16.mxu1 %v4557_v1  ;;  %v506_v51 = vld [vmem:[#allocation5 + $0x3a0] sm:$0xff] }
  0xf2   : > { %2838 = vmatpush1.bf16.msra.mxu0 %v4562_v6  ;;  %v4619_v56 = vcombine.high %v502_v50, %v506_v51  ;;  %v510_v58 = vld [vmem:[#allocation5 + $0x3c0] sm:$0xff]  ;;  %v4618_v62 = vcombine.low %v502_v50, %v506_v51  ;;  %v515_v6 = vld [vmem:[#allocation5 + $0x3e8] sm:$0xff] }
  0xf3   : > { %2839 = vmatprep.subr.bf16.mxu0 %v4571_v8  ;;  %v514_v59 = vld [vmem:[#allocation5 + $0x3e0] sm:$0xff]  ;;  %v4620_v8 = vcombine.low %v503_v60, %v507_v61  ;;  %v4629_v10 = vcombine.high %v511_v5, %v515_v6  ;;  %v4628_v18 = vcombine.low %v511_v5, %v515_v6 }
  0xf4   : > { %3008 = vmatpush1.bf16.msra.mxu1 %v4556_v7  ;;  %v4627_v1 = vcombine.high %v510_v58, %v514_v59  ;;  %v518_v3 = vld [vmem:[#allocation5 + $0x400] sm:$0xff]  ;;  %v4626_v7 = vcombine.low %v510_v58, %v514_v59 }
  0xf5   : > { %3009 = vmatprep.subr.bf16.mxu1 %v4565_v9  ;;  %v522_v4 = vld [vmem:[#allocation5 + $0x420] sm:$0xff] }
  0xf6   : > { %2840 = vmatpush1.bf16.msra.mxu0 %v4570_v14  ;;  %v4635_v9 = vcombine.high %v518_v3, %v522_v4  ;;  %v526_v11 = vld [vmem:[#allocation5 + $0x440] sm:$0xff]  ;;  %v519_v14 = vld [vmem:[#allocation5 + $0x408] sm:$0xff] }
  0xf7   : > { %2841 = vmatprep.subr.bf16.mxu0 %v4579_v16  ;;  %v530_v12 = vld [vmem:[#allocation5 + $0x460] sm:$0xff]  ;;  %v4634_v16 = vcombine.low %v518_v3, %v522_v4 }
  0xf8   : > { %3010 = vmatpush1.bf16.msra.mxu1 %v4564_v15  ;;  %v5287_v13 = vld [vmem:[%s5960_s22] ss:$28 sps:$4 sm:$0xff]   ;;  %v4643_v19 = vcombine.high %v526_v11, %v530_v12 }
  0xf9   : > { %3011 = vmatprep.subr.bf16.mxu1 %v4573_v17  ;;  %v523_v15 = vld [vmem:[#allocation5 + $0x428] sm:$0xff]  ;;  %v5288_v17 = vld [vmem:[%s5960_s22 + $0xc] ss:$28 sps:$4 sm:$0xff]   ;;  %v534_v21 = vld [vmem:[#allocation5 + $0x480] sm:$0xff] }
  0xfa   : > { %2842 = vmatpush1.bf16.msra.mxu0 %v4578_v22  ;;  %v4637_v20 = vcombine.high %v519_v14, %v523_v15  ;;  %v538_v22 = vld [vmem:[#allocation5 + $0x4a0] sm:$0xff]  ;;  %v4636_v26 = vcombine.low %v519_v14, %v523_v15 }
  0xfb   : > { %2843 = vmatprep.subr.bf16.mxu0 %v4587_v24  ;;  %v531_v24 = vld [vmem:[#allocation5 + $0x468] sm:$0xff]  ;;  %v4651_v27 = vcombine.high %v534_v21, %v538_v22  ;;  %v542_v28 = vld [vmem:[#allocation5 + $0x4c0] sm:$0xff] }
  0xfc   : > { %3012 = vmatpush1.bf16.msra.mxu1 %v4572_v23  ;;  %v527_v23 = vld [vmem:[#allocation5 + $0x448] sm:$0xff]  ;;  %v550_v34 = vld [vmem:[#allocation5 + $0x500] sm:$0xff] }
  0xfd   : > { %3013 = vmatprep.subr.bf16.mxu1 %v4581_v25  ;;  %v4642_v25 = vcombine.low %v526_v11, %v530_v12  ;;  %v4645_v29 = vcombine.high %v527_v23, %v531_v24  ;;  %v554_v35 = vld [vmem:[#allocation5 + $0x520] sm:$0xff]  ;;  %v4644_v36 = vcombine.low %v527_v23, %v531_v24  ;;  %v591_v24 = vld [vmem:[#allocation5 + $0x648] sm:$0xff] }
  0xfe   : > { %2844 = vmatpush1.bf16.msra.mxu0 %v4586_v30  ;;  %v546_v30 = vld [vmem:[#allocation5 + $0x4e0] sm:$0xff]  ;;  %v4667_v45 = vcombine.high %v550_v34, %v554_v35 }
  0xff   : > { %2845 = vmatprep.subr.bf16.mxu0 %v4595_v32  ;;  %v539_v32 = vld [vmem:[#allocation5 + $0x4a8] sm:$0xff]  ;;  %v4659_v37 = vcombine.high %v542_v28, %v546_v30  ;;  %v558_v42 = vld [vmem:[#allocation5 + $0x540] sm:$0xff] }
 0x100   : > { %3014 = vmatpush1.bf16.msra.mxu1 %v4580_v31  ;;  %v535_v31 = vld [vmem:[#allocation5 + $0x488] sm:$0xff]  ;;  %v562_v43 = vld [vmem:[#allocation5 + $0x560] sm:$0xff] }
 0x101   : > { %3015 = vmatprep.subr.bf16.mxu1 %v4589_v33  ;;  %v4650_v33 = vcombine.low %v534_v21, %v538_v22  ;;  %v4652_v44 = vcombine.low %v535_v31, %v539_v32  ;;  %v566_v50 = vld [vmem:[#allocation5 + $0x580] sm:$0xff]  ;;  %v4675_v53 = vcombine.high %v558_v42, %v562_v43 }
 0x102   : > { %2846 = vmatpush1.bf16.msra.mxu0 %v4594_v38  ;;  %v543_v38 = vld [vmem:[#allocation5 + $0x4c8] sm:$0xff]  ;;  %v570_v51 = vld [vmem:[#allocation5 + $0x5a0] sm:$0xff] }
 0x103   : > { %2847 = vmatprep.subr.bf16.mxu0 %v4603_v40  ;;  %v4653_v40 = vcombine.high %v535_v31, %v539_v32  ;;  %v574_v58 = vld [vmem:[#allocation5 + $0x5c0] sm:$0xff]  ;;  %v4683_v61 = vcombine.high %v566_v50, %v570_v51  ;;  %v599_v32 = vld [vmem:[#allocation5 + $0x688] sm:$0xff] }
 0x104   : > { %3016 = vmatpush1.bf16.msra.mxu1 %v4588_v39  ;;  %v547_v39 = vld [vmem:[#allocation5 + $0x4e8] sm:$0xff]  ;;  %v578_v59 = vld [vmem:[#allocation5 + $0x5e0] sm:$0xff] }
 0x105   : > { %3017 = vmatprep.subr.bf16.mxu1 %v4597_v41  ;;  %v4658_v41 = vcombine.low %v542_v28, %v546_v30  ;;  %v4660_v52 = vcombine.low %v543_v38, %v547_v39  ;;  %v582_v3 = vld [vmem:[#allocation5 + $0x600] sm:$0xff]  ;;  %v4691_v6 = vcombine.high %v574_v58, %v578_v59 }
 0x106   : > { %2848 = vmatpush1.bf16.msra.mxu0 %v4602_v46  ;;  %v551_v46 = vld [vmem:[#allocation5 + $0x508] sm:$0xff]  ;;  %v586_v4 = vld [vmem:[#allocation5 + $0x620] sm:$0xff] }
 0x107   : > { %2849 = vmatprep.subr.bf16.mxu0 %v4611_v48  ;;  %v4661_v48 = vcombine.high %v543_v38, %v547_v39  ;;  %v4699_v12 = vcombine.high %v582_v3, %v586_v4  ;;  %v594_v14 = vld [vmem:[#allocation5 + $0x660] sm:$0xff] }
 0x108   : > { %3018 = vmatpush1.bf16.msra.mxu1 %v4596_v47  ;;  %v555_v47 = vld [vmem:[#allocation5 + $0x528] sm:$0xff]  ;;  %v598_v21 = vld [vmem:[#allocation5 + $0x680] sm:$0xff] }
 0x109   : > { %3019 = vmatprep.subr.bf16.mxu1 %v4605_v49  ;;  %v4666_v49 = vcombine.low %v550_v34, %v554_v35  ;;  %v4668_v60 = vcombine.low %v551_v46, %v555_v47  ;;  %v602_v22 = vld [vmem:[#allocation5 + $0x6a0] sm:$0xff] }
 0x10a   : > { %2850 = vmatpush1.bf16.msra.mxu0 %v4610_v54  ;;  %v559_v54 = vld [vmem:[#allocation5 + $0x548] sm:$0xff]  ;;  %v4715_v28 = vcombine.high %v598_v21, %v602_v22  ;;  %v610_v30 = vld [vmem:[#allocation5 + $0x6e0] sm:$0xff]  ;;  %v4714_v34 = vcombine.low %v598_v21, %v602_v22 }
 0x10b   : > { %2851 = vmatprep.subr.bf16.mxu0 %v4619_v56  ;;  %v4669_v56 = vcombine.high %v551_v46, %v555_v47  ;;  %v618_v38 = vld [vmem:[#allocation5 + $0x720] sm:$0xff] }
 0x10c   : > { %3020 = vmatpush1.bf16.msra.mxu1 %v4604_v55  ;;  %v563_v55 = vld [vmem:[#allocation5 + $0x568] sm:$0xff]  ;;  %v626_v46 = vld [vmem:[#allocation5 + $0x760] sm:$0xff] }
 0x10d   : > { %3021 = vmatprep.subr.bf16.mxu1 %v4613_v57  ;;  %v4674_v57 = vcombine.low %v558_v42, %v562_v43  ;;  %v4676_v5 = vcombine.low %v559_v54, %v563_v55 }
 0x10e   : > { %2852 = vmatpush1.bf16.msra.mxu0 %v4618_v62  ;;  %v567_v62 = vld [vmem:[#allocation5 + $0x588] sm:$0xff] }
 0x10f   : > { %2853 = vmatprep.subr.bf16.mxu0 %v4627_v1  ;;  %v4677_v1 = vcombine.high %v559_v54, %v563_v55  ;;  %v634_v54 = vld [vmem:[#allocation5 + $0x7a0] sm:$0xff] }
 0x110   : > { %3022 = vmatpush1.bf16.msra.mxu1 %v4612_v63  ;;  %v571_v63 = vld [vmem:[#allocation5 + $0x5a8] sm:$0xff] }
 0x111   : > { %3023 = vmatprep.subr.bf16.mxu1 %v4621_v2  ;;  %v4682_v2 = vcombine.low %v566_v50, %v570_v51  ;;  %v4684_v11 = vcombine.low %v567_v62, %v571_v63 }
 0x112   : > { %2854 = vmatpush1.bf16.msra.mxu0 %v4626_v7  ;;  %v575_v7 = vld [vmem:[#allocation5 + $0x5c8] sm:$0xff] }
 0x113   : > { %2866 = vmatprep.subr.bf16.mxu0 %v4635_v9  ;;  %v4685_v9 = vcombine.high %v567_v62, %v571_v63  ;;  %v642_v62 = vld [vmem:[#allocation5 + $0x7e0] sm:$0xff] }
 0x114   : > { %3024 = vmatpush1.bf16.msra.mxu1 %v4620_v8  ;;  %v579_v8 = vld [vmem:[#allocation5 + $0x5e8] sm:$0xff] }
 0x115   : > { %3025 = vmatprep.subr.bf16.mxu1 %v4629_v10  ;;  %2856 = vmatmul.mubr.bf16.vlgmr.msra.gmra.mrb[0].mxu0 %v5287_v13  ;;  %v4690_v10 = vcombine.low %v574_v58, %v578_v59  ;;  %v4693_v15 = vcombine.high %v575_v7, %v579_v8 }
 0x116   : > { %2867 = vmatpush1.bf16.msra.mxu0 %v4634_v16  ;;  %2898 = vmatprep.mubr.bf16.mxu0 %v5288_v17  ;;  %v583_v16 = vld [vmem:[#allocation5 + $0x608] sm:$0xff] }
 0x117   : > { %2868 = vmatprep.subr.bf16.mxu0 %v4643_v19  ;;  %v4692_v19 = vcombine.low %v575_v7, %v579_v8  ;;  %v650_v7 = vld [vmem:[#allocation5 + $0x820] sm:$0xff] }
 0x118   : > { %3026 = vmatpush1.bf16.msra.mxu1 %v4628_v18  ;;  %v4698_v18 = vcombine.low %v582_v3, %v586_v4 }
 0x119   : > { %3038 = vmatprep.subr.bf16.mxu1 %v4637_v20 }
 0x11a   : > { %2869 = vmatpush1.bf16.msra.mxu0 %v4642_v25  ;;  %v595_v25 = vld [vmem:[#allocation5 + $0x668] sm:$0xff] }
 0x11b   : > { %3028 = vmatmul.mubr.bf16.vlgmr.msra.gmra.mrb[4].mxu1 %v5287_v13  ;;  %2870 = vmatprep.subr.bf16.mxu0 %v4651_v27  ;;  %v590_v13 = vld [vmem:[#allocation5 + $0x640] sm:$0xff]  ;;  %v4709_v31 = vcombine.high %v591_v24, %v595_v25  ;;  %v4708_v35 = vcombine.low %v591_v24, %v595_v25 }
 0x11c   : > { %3039 = vmatpush1.bf16.msra.mxu1 %v4636_v26  ;;  %3070 = vmatprep.mubr.bf16.mxu1 %v5288_v17  ;;  %v587_v17 = vld [vmem:[#allocation5 + $0x628] sm:$0xff]  ;;  %v4707_v20 = vcombine.high %v590_v13, %v594_v14  ;;  %v4706_v26 = vcombine.low %v590_v13, %v594_v14  ;;  %v662_v24 = vld [vmem:[#allocation5 + $0x880] sm:$0xff] }
 0x11d   : > { %3040 = vmatprep.subr.bf16.mxu1 %v4645_v29  ;;  %v4701_v23 = vcombine.high %v583_v16, %v587_v17  ;;  %v4700_v27 = vcombine.low %v583_v16, %v587_v17  ;;  %v606_v29 = vld [vmem:[#allocation5 + $0x6c0] sm:$0xff]  ;;  %v647_v17 = vld [vmem:[#allocation5 + $0x808] sm:$0xff] }
 0x11e   : > { %2871 = vmatpush1.bf16.msra.mxu0 %v4650_v33  ;;  %v603_v33 = vld [vmem:[#allocation5 + $0x6a8] sm:$0xff]  ;;  %v4722_v42 = vcombine.low %v606_v29, %v610_v30  ;;  %v658_v16 = vld [vmem:[#allocation5 + $0x860] sm:$0xff] }
 0x11f   : > { %2872 = vmatprep.subr.bf16.mxu0 %v4659_v37  ;;  %v614_v37 = vld [vmem:[#allocation5 + $0x700] sm:$0xff]  ;;  %v4717_v39 = vcombine.high %v599_v32, %v603_v33  ;;  %v4716_v43 = vcombine.low %v599_v32, %v603_v33 }
 0x120   : > { %3041 = vmatpush1.bf16.msra.mxu1 %v4644_v36  ;;  %v4723_v36 = vcombine.high %v606_v29, %v610_v30  ;;  %v4730_v50 = vcombine.low %v614_v37, %v618_v38  ;;  %v666_v25 = vld [vmem:[#allocation5 + $0x8a0] sm:$0xff] }
 0x121   : > { %3042 = vmatprep.subr.bf16.mxu1 %v4653_v40  ;;  %v607_v40 = vld [vmem:[#allocation5 + $0x6c8] sm:$0xff]  ;;  %v670_v32 = vld [vmem:[#allocation5 + $0x8c0] sm:$0xff] }
 0x122   : > { %2873 = vmatpush1.bf16.msra.mxu0 %v4658_v41  ;;  %v611_v41 = vld [vmem:[#allocation5 + $0x6e8] sm:$0xff]  ;;  %v674_v33 = vld [vmem:[#allocation5 + $0x8e0] sm:$0xff] }
 0x123   : > { %2874 = vmatprep.subr.bf16.mxu0 %v4667_v45  ;;  %v622_v45 = vld [vmem:[#allocation5 + $0x740] sm:$0xff]  ;;  %v4725_v47 = vcombine.high %v607_v40, %v611_v41  ;;  %v4724_v51 = vcombine.low %v607_v40, %v611_v41 }
 0x124   : > { %3043 = vmatpush1.bf16.msra.mxu1 %v4652_v44  ;;  %v4731_v44 = vcombine.high %v614_v37, %v618_v38  ;;  %v4738_v58 = vcombine.low %v622_v45, %v626_v46  ;;  %v4778_v37 = vcombine.low %v662_v24, %v666_v25  ;;  %v678_v40 = vld [vmem:[#allocation5 + $0x900] sm:$0xff] }
 0x125   : > { %3044 = vmatprep.subr.bf16.mxu1 %v4661_v48  ;;  %v615_v48 = vld [vmem:[#allocation5 + $0x708] sm:$0xff]  ;;  %v682_v41 = vld [vmem:[#allocation5 + $0x920] sm:$0xff] }
 0x126   : > { %2875 = vmatpush1.bf16.msra.mxu0 %v4666_v49  ;;  %v619_v49 = vld [vmem:[#allocation5 + $0x728] sm:$0xff] }
 0x127   : > { %2876 = vmatprep.subr.bf16.mxu0 %v4675_v53  ;;  %v630_v53 = vld [vmem:[#allocation5 + $0x780] sm:$0xff]  ;;  %v4733_v55 = vcombine.high %v615_v48, %v619_v49  ;;  %v4732_v59 = vcombine.low %v615_v48, %v619_v49 }
 0x128   : > { %3045 = vmatpush1.bf16.msra.mxu1 %v4660_v52  ;;  %v4739_v52 = vcombine.high %v622_v45, %v626_v46  ;;  %v4746_v3 = vcombine.low %v630_v53, %v634_v54  ;;  %v4786_v45 = vcombine.low %v670_v32, %v674_v33  ;;  %v686_v49 = vld [vmem:[#allocation5 + $0x940] sm:$0xff] }
 0x129   : > { %3046 = vmatprep.subr.bf16.mxu1 %v4669_v56  ;;  %v623_v56 = vld [vmem:[#allocation5 + $0x748] sm:$0xff] }
 0x12a   : > { %2877 = vmatpush1.bf16.msra.mxu0 %v4674_v57  ;;  %v627_v57 = vld [vmem:[#allocation5 + $0x768] sm:$0xff] }
 0x12b   : > { %2878 = vmatprep.subr.bf16.mxu0 %v4683_v61  ;;  %v638_v61 = vld [vmem:[#allocation5 + $0x7c0] sm:$0xff]  ;;  %v4741_v63 = vcombine.high %v623_v56, %v627_v57  ;;  %v4740_v4 = vcombine.low %v623_v56, %v627_v57 }
 0x12c   : > { %3047 = vmatpush1.bf16.msra.mxu1 %v4668_v60  ;;  %v4747_v60 = vcombine.high %v630_v53, %v634_v54  ;;  %v4794_v53 = vcombine.low %v678_v40, %v682_v41  ;;  %v694_v57 = vld [vmem:[#allocation5 + $0x980] sm:$0xff] }
 0x12d   : > { %3048 = vmatprep.subr.bf16.mxu1 %v4677_v1  ;;  %v631_v1 = vld [vmem:[#allocation5 + $0x788] sm:$0xff] }
 0x12e   : > { %2879 = vmatpush1.bf16.msra.mxu0 %v4682_v2  ;;  %v635_v2 = vld [vmem:[#allocation5 + $0x7a8] sm:$0xff] }
 0x12f   : > { %2880 = vmatprep.subr.bf16.mxu0 %v4691_v6  ;;  %v646_v6 = vld [vmem:[#allocation5 + $0x800] sm:$0xff]  ;;  %v4749_v8 = vcombine.high %v631_v1, %v635_v2  ;;  %v4748_v13 = vcombine.low %v631_v1, %v635_v2 }
 0x130   : > { %3049 = vmatpush1.bf16.msra.mxu1 %v4676_v5  ;;  %v4755_v5 = vcombine.high %v638_v61, %v642_v62  ;;  %v4763_v14 = vcombine.high %v646_v6, %v650_v7  ;;  %v4762_v21 = vcombine.low %v646_v6, %v650_v7  ;;  %v702_v2 = vld [vmem:[#allocation5 + $0x9c0] sm:$0xff] }
 0x131   : > { %3050 = vmatprep.subr.bf16.mxu1 %v4685_v9  ;;  %v639_v9 = vld [vmem:[#allocation5 + $0x7c8] sm:$0xff] }
 0x132   : > { %2881 = vmatpush1.bf16.msra.mxu0 %v4690_v10  ;;  %v643_v10 = vld [vmem:[#allocation5 + $0x7e8] sm:$0xff] }
 0x133   : > { %2882 = vmatprep.subr.bf16.mxu0 %v4699_v12  ;;  %v654_v12 = vld [vmem:[#allocation5 + $0x840] sm:$0xff]  ;;  %v4756_v22 = vcombine.low %v639_v9, %v643_v10 }
 0x134   : > { %3051 = vmatpush1.bf16.msra.mxu1 %v4684_v11  ;;  %v4754_v11 = vcombine.low %v638_v61, %v642_v62  ;;  %v4770_v29 = vcombine.low %v654_v12, %v658_v16 }
 0x135   : > { %3052 = vmatprep.subr.bf16.mxu1 %v4693_v15  ;;  %v5290_v15 = vld [vmem:[%s5960_s22 + $0x8] ss:$28 sps:$4 sm:$0xff]  }
 0x136   : > { %2883 = vmatpush1.bf16.msra.mxu0 %v4698_v18  ;;  %v4757_v18 = vcombine.high %v639_v9, %v643_v10  ;;  %v710_v10 = vld [vmem:[#allocation5 + $0xa00] sm:$0xff] }
 0x137   : > { %2884 = vmatprep.subr.bf16.mxu0 %v4707_v20  ;;  %v5291_v20 = vld [vmem:[%s5960_s22 + $0x14] ss:$28 sps:$4 sm:$0xff]  }
 0x138   : > { %3053 = vmatpush1.bf16.msra.mxu1 %v4692_v19  ;;  %v651_v19 = vld [vmem:[#allocation5 + $0x828] sm:$0xff] }
 0x139   : > { %3054 = vmatprep.subr.bf16.mxu1 %v4701_v23  ;;  %v4771_v23 = vcombine.high %v654_v12, %v658_v16  ;;  %v4764_v30 = vcombine.low %v647_v17, %v651_v19  ;;  %v703_v12 = vld [vmem:[#allocation5 + $0x9c8] sm:$0xff] }
 0x13a   : > { %2885 = vmatpush1.bf16.msra.mxu0 %v4706_v26  ;;  %v4765_v26 = vcombine.high %v647_v17, %v651_v19  ;;  %v722_v19 = vld [vmem:[#allocation5 + $0xa60] sm:$0xff] }
 0x13b   : > { %2886 = vmatprep.subr.bf16.mxu0 %v4715_v28  ;;  %v659_v28 = vld [vmem:[#allocation5 + $0x868] sm:$0xff] }
 0x13c   : > { %3055 = vmatpush1.bf16.msra.mxu1 %v4700_v27  ;;  %v655_v27 = vld [vmem:[#allocation5 + $0x848] sm:$0xff] }
 0x13d   : > { %3056 = vmatprep.subr.bf16.mxu1 %v4709_v31  ;;  %v4779_v31 = vcombine.high %v662_v24, %v666_v25  ;;  %v4772_v38 = vcombine.low %v655_v27, %v659_v28 }
 0x13e   : > { %2887 = vmatpush1.bf16.msra.mxu0 %v4714_v34  ;;  %v4773_v34 = vcombine.high %v655_v27, %v659_v28  ;;  %v730_v27 = vld [vmem:[#allocation5 + $0xaa0] sm:$0xff]  ;;  %v719_v28 = vld [vmem:[#allocation5 + $0xa48] sm:$0xff] }
 0x13f   : > { %2888 = vmatprep.subr.bf16.mxu0 %v4723_v36  ;;  %v667_v36 = vld [vmem:[#allocation5 + $0x8a8] sm:$0xff] }
 0x140   : > { %3057 = vmatpush1.bf16.msra.mxu1 %v4708_v35  ;;  %v663_v35 = vld [vmem:[#allocation5 + $0x888] sm:$0xff] }
 0x141   : > { %3058 = vmatprep.subr.bf16.mxu1 %v4717_v39  ;;  %v4787_v39 = vcombine.high %v670_v32, %v674_v33  ;;  %v4780_v46 = vcombine.low %v663_v35, %v667_v36 }
 0x142   : > { %2889 = vmatpush1.bf16.msra.mxu0 %v4722_v42  ;;  %v4781_v42 = vcombine.high %v663_v35, %v667_v36  ;;  %v738_v35 = vld [vmem:[#allocation5 + $0xae0] sm:$0xff]  ;;  %v727_v36 = vld [vmem:[#allocation5 + $0xa88] sm:$0xff] }
 0x143   : > { %2890 = vmatprep.subr.bf16.mxu0 %v4731_v44  ;;  %v675_v44 = vld [vmem:[#allocation5 + $0x8e8] sm:$0xff] }
 0x144   : > { %3059 = vmatpush1.bf16.msra.mxu1 %v4716_v43  ;;  %v671_v43 = vld [vmem:[#allocation5 + $0x8c8] sm:$0xff] }
 0x145   : > { %3060 = vmatprep.subr.bf16.mxu1 %v4725_v47  ;;  %v4795_v47 = vcombine.high %v678_v40, %v682_v41  ;;  %v4789_v48 = vcombine.high %v671_v43, %v675_v44  ;;  %v4788_v54 = vcombine.low %v671_v43, %v675_v44  ;;  %v746_v43 = vld [vmem:[#allocation5 + $0xb20] sm:$0xff]  ;;  %v735_v44 = vld [vmem:[#allocation5 + $0xac8] sm:$0xff] }
 0x146   : > { %2891 = vmatpush1.bf16.msra.mxu0 %v4730_v50  ;;  %v690_v50 = vld [vmem:[#allocation5 + $0x960] sm:$0xff] }
 0x147   : > { %2892 = vmatprep.subr.bf16.mxu0 %v4739_v52  ;;  %v683_v52 = vld [vmem:[#allocation5 + $0x928] sm:$0xff]  ;;  %v4802_v61 = vcombine.low %v686_v49, %v690_v50 }
 0x148   : > { %3061 = vmatpush1.bf16.msra.mxu1 %v4724_v51  ;;  %v679_v51 = vld [vmem:[#allocation5 + $0x908] sm:$0xff] }
 0x149   : > { %3062 = vmatprep.subr.bf16.mxu1 %v4733_v55  ;;  %v4803_v55 = vcombine.high %v686_v49, %v690_v50  ;;  %v4797_v56 = vcombine.high %v679_v51, %v683_v52  ;;  %v4796_v62 = vcombine.low %v679_v51, %v683_v52  ;;  %v750_v50 = vld [vmem:[#allocation5 + $0xb40] sm:$0xff]  ;;  %v743_v52 = vld [vmem:[#allocation5 + $0xb08] sm:$0xff] }
 0x14a   : > { %2893 = vmatpush1.bf16.msra.mxu0 %v4738_v58  ;;  %v698_v58 = vld [vmem:[#allocation5 + $0x9a0] sm:$0xff] }
 0x14b   : > { %2894 = vmatprep.subr.bf16.mxu0 %v4747_v60  ;;  %v691_v60 = vld [vmem:[#allocation5 + $0x968] sm:$0xff]  ;;  %v4810_v6 = vcombine.low %v694_v57, %v698_v58  ;;  %v754_v51 = vld [vmem:[#allocation5 + $0xb60] sm:$0xff] }
 0x14c   : > { %3063 = vmatpush1.bf16.msra.mxu1 %v4732_v59  ;;  %v687_v59 = vld [vmem:[#allocation5 + $0x948] sm:$0xff] }
 0x14d   : > { %3064 = vmatprep.subr.bf16.mxu1 %v4741_v63  ;;  %v4811_v63 = vcombine.high %v694_v57, %v698_v58  ;;  %v4805_v1 = vcombine.high %v687_v59, %v691_v60  ;;  %v4804_v7 = vcombine.low %v687_v59, %v691_v60  ;;  %v758_v58 = vld [vmem:[#allocation5 + $0xb80] sm:$0xff]  ;;  %v751_v60 = vld [vmem:[#allocation5 + $0xb48] sm:$0xff] }
 0x14e   : > { %2895 = vmatpush1.bf16.msra.mxu0 %v4746_v3  ;;  %v706_v3 = vld [vmem:[#allocation5 + $0x9e0] sm:$0xff] }
 0x14f   : > { %2896 = vmatprep.subr.bf16.mxu0 %v4755_v5  ;;  %v699_v5 = vld [vmem:[#allocation5 + $0x9a8] sm:$0xff]  ;;  %v762_v59 = vld [vmem:[#allocation5 + $0xba0] sm:$0xff] }
 0x150   : > { %3065 = vmatpush1.bf16.msra.mxu1 %v4740_v4  ;;  %v695_v4 = vld [vmem:[#allocation5 + $0x988] sm:$0xff] }
 0x151   : > { %3066 = vmatprep.subr.bf16.mxu1 %v4749_v8  ;;  %v4819_v8 = vcombine.high %v702_v2, %v706_v3  ;;  %v4813_v9 = vcombine.high %v695_v4, %v699_v5 }
 0x152   : > { %2897 = vmatpush1.bf16.msra.mxu0 %v4754_v11  ;;  %v714_v11 = vld [vmem:[#allocation5 + $0xa20] sm:$0xff] }
 0x153   : > { %2909 = vmatprep.subr.bf16.mxu0 %v4763_v14  ;;  %v4818_v14 = vcombine.low %v702_v2, %v706_v3  ;;  %v4827_v16 = vcombine.high %v710_v10, %v714_v11  ;;  %v766_v3 = vld [vmem:[#allocation5 + $0xbc0] sm:$0xff] }
 0x154   : > { %3067 = vmatpush1.bf16.msra.mxu1 %v4748_v13  ;;  %v707_v13 = vld [vmem:[#allocation5 + $0x9e8] sm:$0xff] }
 0x155   : > { %3068 = vmatprep.subr.bf16.mxu1 %v4757_v18  ;;  %2899 = vmatmul.mubr.bf16.vlgmr.msra.gmra.mrb[0].mxu0 %v5290_v15  ;;  %v4821_v17 = vcombine.high %v703_v12, %v707_v13  ;;  %v718_v18 = vld [vmem:[#allocation5 + $0xa40] sm:$0xff] }
 0x156   : > { %2910 = vmatpush1.bf16.msra.mxu0 %v4762_v21  ;;  %2941 = vmatprep.mubr.bf16.mxu0 %v5291_v20  ;;  %v715_v21 = vld [vmem:[#allocation5 + $0xa28] sm:$0xff]  ;;  %v4835_v24 = vcombine.high %v718_v18, %v722_v19 }
 0x157   : > { %2911 = vmatprep.subr.bf16.mxu0 %v4771_v23  ;;  %v4820_v23 = vcombine.low %v703_v12, %v707_v13  ;;  %v396_v12 = vld [vmem:[#allocation5 + $0x30] sm:$0xff]  ;;  %v767_v13 = vld [vmem:[#allocation5 + $0xbc8] sm:$0xff] }
 0x158   : > { %3069 = vmatpush1.bf16.msra.mxu1 %v4756_v22  ;;  %v4826_v22 = vcombine.low %v710_v10, %v714_v11  ;;  %v392_v11 = vld [vmem:[#allocation5 + $0x10] sm:$0xff] }
 0x159   : > { %3081 = vmatprep.subr.bf16.mxu1 %v4765_v26  ;;  %v726_v26 = vld [vmem:[#allocation5 + $0xa80] sm:$0xff] }
 0x15a   : > { %2912 = vmatpush1.bf16.msra.mxu0 %v4770_v29  ;;  %v723_v29 = vld [vmem:[#allocation5 + $0xa68] sm:$0xff]  ;;  %v4843_v32 = vcombine.high %v726_v26, %v730_v27 }
 0x15b   : > { %3071 = vmatmul.mubr.bf16.vlgmr.msra.gmra.mrb[4].mxu1 %v5290_v15  ;;  %2913 = vmatprep.subr.bf16.mxu0 %v4779_v31  ;;  %v4812_v15 = vcombine.low %v695_v4, %v699_v5  ;;  %v4837_v33 = vcombine.high %v719_v28, %v723_v29  ;;  %v770_v4 = vld [vmem:[#allocation5 + $0xbe0] sm:$0xff]  ;;  %v759_v5 = vld [vmem:[#allocation5 + $0xb88] sm:$0xff] }
 0x15c   : > { %3082 = vmatpush1.bf16.msra.mxu1 %v4764_v30  ;;  %3113 = vmatprep.mubr.bf16.mxu1 %v5291_v20  ;;  %v711_v20 = vld [vmem:[#allocation5 + $0xa08] sm:$0xff]  ;;  %v4834_v30 = vcombine.low %v718_v18, %v722_v19  ;;  %v400_v19 = vld [vmem:[#allocation5 + $0x50] sm:$0xff] }
 0x15d   : > { %3083 = vmatprep.subr.bf16.mxu1 %v4773_v34  ;;  %v4829_v25 = vcombine.high %v711_v20, %v715_v21  ;;  %v4828_v31 = vcombine.low %v711_v20, %v715_v21  ;;  %v734_v34 = vld [vmem:[#allocation5 + $0xac0] sm:$0xff]  ;;  %v404_v20 = vld [vmem:[#allocation5 + $0x70] sm:$0xff] }
 0x15e   : > { %2914 = vmatpush1.bf16.msra.mxu0 %v4778_v37  ;;  %v731_v37 = vld [vmem:[#allocation5 + $0xaa8] sm:$0xff]  ;;  %v4851_v40 = vcombine.high %v734_v34, %v738_v35  ;;  %v5293_v21 = vld [vmem:[%s5960_s22 + $0x10] ss:$28 sps:$4 sm:$0xff]  }
 0x15f   : > { %2915 = vmatprep.subr.bf16.mxu0 %v4787_v39  ;;  %v4836_v39 = vcombine.low %v719_v28, %v723_v29  ;;  %v4845_v41 = vcombine.high %v727_v36, %v731_v37  ;;  %v408_v28 = vld [vmem:[#allocation5 + $0x90] sm:$0xff] }
 0x160   : > { %3084 = vmatpush1.bf16.msra.mxu1 %v4772_v38  ;;  %v4842_v38 = vcombine.low %v726_v26, %v730_v27  ;;  %v4519_v26 = vcombine.high %v400_v19, %v404_v20  ;;  %v412_v29 = vld [vmem:[#allocation5 + $0xb0] sm:$0xff] }
 0x161   : > { %3085 = vmatprep.subr.bf16.mxu1 %v4781_v42  ;;  %v742_v42 = vld [vmem:[#allocation5 + $0xb00] sm:$0xff] }
 0x162   : > { %2916 = vmatpush1.bf16.msra.mxu0 %v4786_v45  ;;  %v739_v45 = vld [vmem:[#allocation5 + $0xae8] sm:$0xff] }
 0x163   : > { %2917 = vmatprep.subr.bf16.mxu0 %v4795_v47  ;;  %v4844_v47 = vcombine.low %v727_v36, %v731_v37  ;;  %v4853_v49 = vcombine.high %v735_v44, %v739_v45  ;;  %v416_v36 = vld [vmem:[#allocation5 + $0xd0] sm:$0xff] }
 0x164   : > { %3086 = vmatpush1.bf16.msra.mxu1 %v4780_v46  ;;  %v4850_v46 = vcombine.low %v734_v34, %v738_v35  ;;  %v4527_v35 = vcombine.high %v408_v28, %v412_v29  ;;  %v420_v37 = vld [vmem:[#allocation5 + $0xf0] sm:$0xff] }
 0x165   : > { %3087 = vmatprep.subr.bf16.mxu1 %v4789_v48  ;;  %v4859_v48 = vcombine.high %v742_v42, %v746_v43 }
 0x166   : > { %2918 = vmatpush1.bf16.msra.mxu0 %v4794_v53  ;;  %v747_v53 = vld [vmem:[#allocation5 + $0xb28] sm:$0xff] }
 0x167   : > { %2919 = vmatprep.subr.bf16.mxu0 %v4803_v55  ;;  %v4852_v55 = vcombine.low %v735_v44, %v739_v45  ;;  %v4861_v57 = vcombine.high %v743_v52, %v747_v53  ;;  %v432_v45 = vld [vmem:[#allocation5 + $0x150] sm:$0xff] }
 0x168   : > { %3088 = vmatpush1.bf16.msra.mxu1 %v4788_v54  ;;  %v4858_v54 = vcombine.low %v742_v42, %v746_v43  ;;  %v428_v42 = vld [vmem:[#allocation5 + $0x130] sm:$0xff]  ;;  %v4534_v43 = vcombine.low %v416_v36, %v420_v37 }
 0x169   : > { %3089 = vmatprep.subr.bf16.mxu1 %v4797_v56  ;;  %v4867_v56 = vcombine.high %v750_v50, %v754_v51 }
 0x16a   : > { %2920 = vmatpush1.bf16.msra.mxu0 %v4802_v61  ;;  %v755_v61 = vld [vmem:[#allocation5 + $0xb68] sm:$0xff] }
 0x16b   : > { %2921 = vmatprep.subr.bf16.mxu0 %v4811_v63  ;;  %v4860_v63 = vcombine.low %v743_v52, %v747_v53  ;;  %v4869_v2 = vcombine.high %v751_v60, %v755_v61  ;;  %v440_v53 = vld [vmem:[#allocation5 + $0x190] sm:$0xff] }
 0x16c   : > { %3090 = vmatpush1.bf16.msra.mxu1 %v4796_v62  ;;  %v4866_v62 = vcombine.low %v750_v50, %v754_v51 }
 0x16d   : > { %3091 = vmatprep.subr.bf16.mxu1 %v4805_v1  ;;  %v4875_v1 = vcombine.high %v758_v58, %v762_v59 }
 0x16e   : > { %2922 = vmatpush1.bf16.msra.mxu0 %v4810_v6  ;;  %v763_v6 = vld [vmem:[#allocation5 + $0xba8] sm:$0xff] }
 0x16f   : > { %2923 = vmatprep.subr.bf16.mxu0 %v4819_v8  ;;  %v4868_v8 = vcombine.low %v751_v60, %v755_v61  ;;  %v4877_v10 = vcombine.high %v759_v5, %v763_v6  ;;  %v401_v60 = vld [vmem:[#allocation5 + $0x58] sm:$0xff] }
 0x170   : > { %3092 = vmatpush1.bf16.msra.mxu1 %v4804_v7  ;;  %v4874_v7 = vcombine.low %v758_v58, %v762_v59  ;;  %v448_v58 = vld [vmem:[#allocation5 + $0x1d0] sm:$0xff]  ;;  %v405_v61 = vld [vmem:[#allocation5 + $0x78] sm:$0xff] }
 0x171   : > { %3093 = vmatprep.subr.bf16.mxu1 %v4813_v9  ;;  %v4883_v9 = vcombine.high %v766_v3, %v770_v4  ;;  %v452_v59 = vld [vmem:[#allocation5 + $0x1f0] sm:$0xff] }
 0x172   : > { %2924 = vmatpush1.bf16.msra.mxu0 %v4818_v14  ;;  %v771_v14 = vld [vmem:[#allocation5 + $0xbe8] sm:$0xff] }
 0x173   : > { %2925 = vmatprep.subr.bf16.mxu0 %v4827_v16  ;;  %v4876_v16 = vcombine.low %v759_v5, %v763_v6  ;;  %v4885_v18 = vcombine.high %v767_v13, %v771_v14  ;;  %v409_v6 = vld [vmem:[#allocation5 + $0x98] sm:$0xff] }
 0x174   : > { %3094 = vmatpush1.bf16.msra.mxu1 %v4812_v15  ;;  %v4882_v15 = vcombine.low %v766_v3, %v770_v4  ;;  %v456_v3 = vld [vmem:[#allocation5 + $0x210] sm:$0xff] }
 0x175   : > { %3095 = vmatprep.subr.bf16.mxu1 %v4821_v17  ;;  %v4511_v17 = vcombine.high %v392_v11, %v396_v12  ;;  %v460_v4 = vld [vmem:[#allocation5 + $0x230] sm:$0xff] }
 0x176   : > { %2926 = vmatpush1.bf16.msra.mxu0 %v4826_v22  ;;  %v775_v22 = vld [vmem:[#allocation5 + $0xc08] sm:$0xff] }
 0x177   : > { %2927 = vmatprep.subr.bf16.mxu0 %v4835_v24  ;;  %v4510_v24 = vcombine.low %v392_v11, %v396_v12  ;;  %v4520_v11 = vcombine.low %v401_v60, %v405_v61  ;;  %v4575_v12 = vcombine.high %v456_v3, %v460_v4 }
 0x178   : > { %3096 = vmatpush1.bf16.msra.mxu1 %v4820_v23  ;;  %v779_v23 = vld [vmem:[#allocation5 + $0xc28] sm:$0xff] }
 0x179   : > { %3097 = vmatprep.subr.bf16.mxu1 %v4829_v25  ;;  %v4884_v25 = vcombine.low %v767_v13, %v771_v14  ;;  %v4893_v27 = vcombine.high %v775_v22, %v779_v23  ;;  %v4892_v34 = vcombine.low %v775_v22, %v779_v23  ;;  %v472_v23 = vld [vmem:[#allocation5 + $0x290] sm:$0xff] }
 0x17a   : > { %2928 = vmatpush1.bf16.msra.mxu0 %v4834_v30  ;;  %v776_v30 = vld [vmem:[#allocation5 + $0xc10] sm:$0xff] }
 0x17b   : > { %2929 = vmatprep.subr.bf16.mxu0 %v4843_v32  ;;  %v4518_v32 = vcombine.low %v400_v19, %v404_v20  ;;  %v4574_v19 = vcombine.low %v456_v3, %v460_v4  ;;  %v469_v3 = vld [vmem:[#allocation5 + $0x278] sm:$0xff] }
 0x17c   : > { %3098 = vmatpush1.bf16.msra.mxu1 %v4828_v31  ;;  %v780_v31 = vld [vmem:[#allocation5 + $0xc30] sm:$0xff] }
 0x17d   : > { %3099 = vmatprep.subr.bf16.mxu1 %v4837_v33  ;;  %v5988_v33 = vld [vmem:[%s5960_s22 + $0x4] ss:$28 sps:$4 sm:$0xff]   ;;  %v4894_v50 = vcombine.low %v776_v30, %v780_v31 }
 0x17e   : > { %2930 = vmatpush1.bf16.msra.mxu0 %v4842_v38  ;;  %v4895_v38 = vcombine.high %v776_v30, %v780_v31  ;;  %v480_v31 = vld [vmem:[#allocation5 + $0x2d0] sm:$0xff] }
 0x17f   : > { %2931 = vmatprep.subr.bf16.mxu0 %v4851_v40  ;;  %v4535_v40 = vcombine.high %v416_v36, %v420_v37 }
 0x180   : > { %3100 = vmatpush1.bf16.msra.mxu1 %v4836_v39  ;;  %v4526_v39 = vcombine.low %v408_v28, %v412_v29 }
 0x181   : > { %3101 = vmatprep.subr.bf16.mxu1 %v4845_v41  ;;  %v424_v41 = vld [vmem:[#allocation5 + $0x110] sm:$0xff] }
 0x182   : > { %2932 = vmatpush1.bf16.msra.mxu0 %v4850_v46  ;;  %v4543_v44 = vcombine.high %v424_v41, %v428_v42  ;;  %v436_v46 = vld [vmem:[#allocation5 + $0x170] sm:$0xff] }
 0x183   : > { %2933 = vmatprep.subr.bf16.mxu0 %v4859_v48  ;;  %v397_v48 = vld [vmem:[#allocation5 + $0x38] sm:$0xff]  ;;  %v4551_v51 = vcombine.high %v432_v45, %v436_v46 }
 0x184   : > { %3102 = vmatpush1.bf16.msra.mxu1 %v4844_v47  ;;  %v393_v47 = vld [vmem:[#allocation5 + $0x18] sm:$0xff] }
 0x185   : > { %3103 = vmatprep.subr.bf16.mxu1 %v4853_v49  ;;  %v4542_v49 = vcombine.low %v424_v41, %v428_v42  ;;  %v4513_v52 = vcombine.high %v393_v47, %v397_v48  ;;  %v441_v41 = vld [vmem:[#allocation5 + $0x198] sm:$0xff] }
 0x186   : > { %2934 = vmatpush1.bf16.msra.mxu0 %v4858_v54  ;;  %v444_v54 = vld [vmem:[#allocation5 + $0x1b0] sm:$0xff]  ;;  %v445_v42 = vld [vmem:[#allocation5 + $0x1b8] sm:$0xff] }
 0x187   : > { %2935 = vmatprep.subr.bf16.mxu0 %v4867_v56  ;;  %v4550_v56 = vcombine.low %v432_v45, %v436_v46  ;;  %v4561_v46 = vcombine.high %v441_v41, %v445_v42 }
 0x188   : > { %3104 = vmatpush1.bf16.msra.mxu1 %v4852_v55  ;;  %v5367_v55 = vld [vmem:[%s5960_s22 + $0x18] ss:$28 sps:$4 sm:$0xff]  }
 0x189   : > { %3105 = vmatprep.subr.bf16.mxu1 %v4861_v57  ;;  %v4559_v57 = vcombine.high %v440_v53, %v444_v54 }
 0x18a   : > { %2936 = vmatpush1.bf16.msra.mxu0 %v4866_v62  ;;  %v4558_v62 = vcombine.low %v440_v53, %v444_v54 }
 0x18b   : > { %2937 = vmatprep.subr.bf16.mxu0 %v4875_v1  ;;  %v4567_v1 = vcombine.high %v448_v58, %v452_v59 }
 0x18c   : > { %3106 = vmatpush1.bf16.msra.mxu1 %v4860_v63  ;;  %v4512_v63 = vcombine.low %v393_v47, %v397_v48  ;;  %v496_v47 = vld [vmem:[#allocation5 + $0x350] sm:$0xff] }
 0x18d   : > { %3107 = vmatprep.subr.bf16.mxu1 %v4869_v2  ;;  %v4521_v2 = vcombine.high %v401_v60, %v405_v61  ;;  %v500_v48 = vld [vmem:[#allocation5 + $0x370] sm:$0xff] }
 0x18e   : > { %2938 = vmatpush1.bf16.msra.mxu0 %v4874_v7  ;;  %v413_v7 = vld [vmem:[#allocation5 + $0xb8] sm:$0xff]  ;;  %v4615_v53 = vcombine.high %v496_v47, %v500_v48 }
 0x18f   : > { %2939 = vmatprep.subr.bf16.mxu0 %v4883_v9  ;;  %v4566_v9 = vcombine.low %v448_v58, %v452_v59  ;;  %v4529_v14 = vcombine.high %v409_v6, %v413_v7  ;;  %v4528_v20 = vcombine.low %v409_v6, %v413_v7  ;;  %v461_v58 = vld [vmem:[#allocation5 + $0x238] sm:$0xff]  ;;  %v4614_v59 = vcombine.low %v496_v47, %v500_v48  ;;  %v556_v47 = vld [vmem:[#allocation5 + $0x530] sm:$0xff] }
 0x190   : > { %3108 = vmatpush1.bf16.msra.mxu1 %v4868_v8  ;;  %v505_v48 = vld [vmem:[#allocation5 + $0x398] sm:$0xff] }
 0x191   : > { %3109 = vmatprep.subr.bf16.mxu1 %v4877_v10 }
 0x192   : > { %2940 = vmatpush1.bf16.msra.mxu0 %v4882_v15  ;;  %v464_v15 = vld [vmem:[#allocation5 + $0x250] sm:$0xff] }
 0x193   : > { %3167 = vmatprep.subr.bf16.mxu0 %v4511_v17  ;;  %v417_v17 = vld [vmem:[#allocation5 + $0xd8] sm:$0xff] }
 0x194   : > { %3110 = vmatpush1.bf16.msra.mxu1 %v4876_v16  ;;  %v468_v16 = vld [vmem:[#allocation5 + $0x270] sm:$0xff] }
 0x195   : > { %3111 = vmatprep.subr.bf16.mxu1 %v4885_v18  ;;  %2942 = vmatmul.mubr.bf16.vlgmr.msra.gmra.mrb[0].mxu0 %v5293_v21  ;;  %v421_v18 = vld [vmem:[#allocation5 + $0xf8] sm:$0xff] }
 0x196   : > { %3168 = vmatpush1.bf16.msra.mxu0 %v4510_v24  ;;  %3199 = vmatprep.mubr.bf16.mxu0 %v5988_v33  ;;  %v4537_v22 = vcombine.high %v417_v17, %v421_v18  ;;  %v476_v24 = vld [vmem:[#allocation5 + $0x2b0] sm:$0xff]  ;;  %v4536_v28 = vcombine.low %v417_v17, %v421_v18 }
 0x197   : > { %3169 = vmatprep.subr.bf16.mxu0 %v4519_v26  ;;  %v429_v26 = vld [vmem:[#allocation5 + $0x138] sm:$0xff]  ;;  %v4591_v29 = vcombine.high %v472_v23, %v476_v24 }
 0x198   : > { %3112 = vmatpush1.bf16.msra.mxu1 %v4884_v25  ;;  %v425_v25 = vld [vmem:[#allocation5 + $0x118] sm:$0xff] }
 0x199   : > { %3124 = vmatprep.subr.bf16.mxu1 %v4893_v27  ;;  %v4582_v27 = vcombine.low %v464_v15, %v468_v16  ;;  %v4545_v30 = vcombine.high %v425_v25, %v429_v26  ;;  %v4544_v36 = vcombine.low %v425_v25, %v429_v26 }
 0x19a   : > { %3170 = vmatpush1.bf16.msra.mxu0 %v4518_v32  ;;  %v484_v32 = vld [vmem:[#allocation5 + $0x2f0] sm:$0xff] }
 0x19b   : > { %3114 = vmatmul.mubr.bf16.vlgmr.msra.gmra.mrb[4].mxu1 %v5293_v21  ;;  %3171 = vmatprep.subr.bf16.mxu0 %v4527_v35  ;;  %v4583_v21 = vcombine.high %v464_v15, %v468_v16  ;;  %v4590_v35 = vcombine.low %v472_v23, %v476_v24  ;;  %v4599_v37 = vcombine.high %v480_v31, %v484_v32  ;;  %v477_v15 = vld [vmem:[#allocation5 + $0x2b8] sm:$0xff] }
 0x19c   : > { %3125 = vmatpush1.bf16.msra.mxu1 %v4892_v34  ;;  %3156 = vmatprep.mubr.bf16.mxu1 %v5665_v0  ;;  %v437_v34 = vld [vmem:[#allocation5 + $0x178] sm:$0xff] }
 0x19d   : > { %3296 = vmatprep.subr.bf16.mxu1 %v4895_v38  ;;  %v485_v23 = vld [vmem:[#allocation5 + $0x2f8] sm:$0xff] }
 0x19e   : > { %3172 = vmatpush1.bf16.msra.mxu0 %v4526_v39  ;;  %v488_v39 = vld [vmem:[#allocation5 + $0x310] sm:$0xff] }
 0x19f   : > { %3173 = vmatprep.subr.bf16.mxu0 %v4535_v40  ;;  %v492_v40 = vld [vmem:[#allocation5 + $0x330] sm:$0xff] }
 0x1a0   : > { %v4607_v45 = vcombine.high %v488_v39, %v492_v40 }
 0x1a2   : > { %3174 = vmatpush1.bf16.msra.mxu0 %v4534_v43  ;;  %v4598_v43 = vcombine.low %v480_v31, %v484_v32  ;;  %v489_v31 = vld [vmem:[#allocation5 + $0x318] sm:$0xff] }
 0x1a3   : > { %3175 = vmatprep.subr.bf16.mxu0 %v4543_v44  ;;  %v493_v32 = vld [vmem:[#allocation5 + $0x338] sm:$0xff] }
 0x1a6   : > { %3176 = vmatpush1.bf16.msra.mxu0 %v4542_v49  ;;  %v449_v49 = vld [vmem:[#allocation5 + $0x1d8] sm:$0xff] }
 0x1a7   : > { %4899 = vmatmul.mubr.msk.bf16.vlgmr.msra.gmra.mrb[4].mxu1 %vm2819_vm0, %v5367_v55  ;;  %3177 = vmatprep.subr.bf16.mxu0 %v4551_v51  ;;  %v4606_v51 = vcombine.low %v488_v39, %v492_v40  ;;  %v548_v39 = vld [vmem:[#allocation5 + $0x4f0] sm:$0xff]  ;;  %v497_v40 = vld [vmem:[#allocation5 + $0x358] sm:$0xff] }
 0x1a8   : > { %3297 = vmatpush1.bf16.msra.mxu1 %v4894_v50  ;;  %3328 = vmatprep.mubr.bf16.mxu1 %v5665_v0  ;;  %v453_v50 = vld [vmem:[#allocation5 + $0x1f8] sm:$0xff] }
 0x1a9   : > { %3339 = vmatprep.subr.bf16.mxu1 %v4513_v52  ;;  %v4560_v52 = vcombine.low %v441_v41, %v445_v42  ;;  %v4569_v54 = vcombine.high %v449_v49, %v453_v50  ;;  %v4568_v60 = vcombine.low %v449_v49, %v453_v50  ;;  %v501_v41 = vld [vmem:[#allocation5 + $0x378] sm:$0xff] }
 0x1aa   : > { %3178 = vmatpush1.bf16.msra.mxu0 %v4550_v56  ;;  %v508_v56 = vld [vmem:[#allocation5 + $0x3b0] sm:$0xff]  ;;  %v509_v49 = vld [vmem:[#allocation5 + $0x3b8] sm:$0xff] }
 0x1ab   : > { %3179 = vmatprep.subr.bf16.mxu0 %v4559_v57  ;;  %v457_v57 = vld [vmem:[#allocation5 + $0x218] sm:$0xff] }
 0x1ac   : > { %v4576_v6 = vcombine.low %v457_v57, %v461_v58 }
 0x1ae   : > { %v5995_v5 = vpop.f32.mrb[0].mxu1  ;;  %3180 = vmatpush1.bf16.msra.mxu0 %v4558_v62  ;;  %v4577_v62 = vcombine.high %v457_v57, %v461_v58  ;;  %v517_v57 = vld [vmem:[#allocation5 + $0x3f8] sm:$0xff] }
 0x1af   : > { %v5997_v8 = vpop.f32.mrb[1].mxu1  ;;  %4900 = vmatmul.mubr.msk.bf16.vlgmr.msra.gmra.mrb[8].mxu1 %vm2819_vm0, %v5367_v55  ;;  %3181 = vmatprep.subr.bf16.mxu0 %v4567_v1  ;;  %v504_v55 = vld [vmem:[#allocation5 + $0x390] sm:$0xff] }
 0x1b0   : > { %3340 = vmatpush1.bf16.msra.mxu1 %v4512_v63  ;;  %v6000_v10 = vpop.f32.mrb[2].mxu1  ;;  %3371 = vmatprep.mubr.bf16.mxu1 %v5988_v33  ;;  %v433_v33 = vld [vmem:[#allocation5 + $0x158] sm:$0xff]  ;;  %v4623_v61 = vcombine.high %v504_v55, %v508_v56  ;;  %v512_v63 = vld [vmem:[#allocation5 + $0x3d0] sm:$0xff]  ;;  %v4622_v4 = vcombine.low %v504_v55, %v508_v56 }
 0x1b1   : > { %v6002_v13 = vpop.f32.mrb[3].mxu1  ;;  %3341 = vmatprep.subr.bf16.mxu1 %v4521_v2  ;;  %v4553_v38 = vcombine.high %v433_v33, %v437_v34  ;;  %v4552_v44 = vcombine.low %v433_v33, %v437_v34  ;;  %v516_v1 = vld [vmem:[#allocation5 + $0x3f0] sm:$0xff]  ;;  %v465_v2 = vld [vmem:[#allocation5 + $0x258] sm:$0xff] }
 0x1b2   : > { %3182 = vmatpush1.bf16.msra.mxu0 %v4566_v9  ;;  %v4631_v7 = vcombine.high %v512_v63, %v516_v1  ;;  %v4585_v9 = vcombine.high %v465_v2, %v469_v3  ;;  %v4630_v16 = vcombine.low %v512_v63, %v516_v1  ;;  %v4584_v17 = vcombine.low %v465_v2, %v469_v3  ;;  %v6010_v34 = vld [vmem:[%s5960_s22 + $0xc] ss:$28 sps:$4 sm:$0xff]  }
 0x1b3   : > { %3183 = vmatprep.subr.bf16.mxu0 %v4575_v12  ;;  %v524_v12 = vld [vmem:[#allocation5 + $0x430] sm:$0xff]  ;;  %v513_v56 = vld [vmem:[#allocation5 + $0x3d8] sm:$0xff] }
 0x1b4   : > { %3342 = vmatpush1.bf16.msra.mxu1 %v4520_v11  ;;  %v520_v11 = vld [vmem:[#allocation5 + $0x410] sm:$0xff]  ;;  %v521_v1 = vld [vmem:[#allocation5 + $0x418] sm:$0xff] }
 0x1b5   : > { %3343 = vmatprep.subr.bf16.mxu1 %v4529_v14  ;;  %v473_v14 = vld [vmem:[#allocation5 + $0x298] sm:$0xff]  ;;  %v4639_v18 = vcombine.high %v520_v11, %v524_v12  ;;  %v4638_v24 = vcombine.low %v520_v11, %v524_v12  ;;  %v564_v55 = vld [vmem:[#allocation5 + $0x570] sm:$0xff] }
 0x1b6   : > { %3184 = vmatpush1.bf16.msra.mxu0 %v4574_v19  ;;  %v4593_v19 = vcombine.high %v473_v14, %v477_v15  ;;  %v4592_v25 = vcombine.low %v473_v14, %v477_v15  ;;  %v572_v63 = vld [vmem:[#allocation5 + $0x5b0] sm:$0xff]  ;;  %v525_v2 = vld [vmem:[#allocation5 + $0x438] sm:$0xff] }
 0x1b7   : > { %3185 = vmatprep.subr.bf16.mxu0 %v4583_v21  ;;  %v532_v21 = vld [vmem:[#allocation5 + $0x470] sm:$0xff]  ;;  %v529_v12 = vld [vmem:[#allocation5 + $0x458] sm:$0xff] }
 0x1b8   : > { %3344 = vmatpush1.bf16.msra.mxu1 %v4528_v20  ;;  %v528_v20 = vld [vmem:[#allocation5 + $0x450] sm:$0xff]  ;;  %v533_v14 = vld [vmem:[#allocation5 + $0x478] sm:$0xff] }
 0x1b9   : > { %3345 = vmatprep.subr.bf16.mxu1 %v4537_v22  ;;  %v481_v22 = vld [vmem:[#allocation5 + $0x2d8] sm:$0xff]  ;;  %v4647_v26 = vcombine.high %v528_v20, %v532_v21  ;;  %v4646_v33 = vcombine.low %v528_v20, %v532_v21  ;;  %v580_v11 = vld [vmem:[#allocation5 + $0x5f0] sm:$0xff] }
 0x1ba   : > { %3186 = vmatpush1.bf16.msra.mxu0 %v4582_v27  ;;  %v4601_v27 = vcombine.high %v481_v22, %v485_v23  ;;  %v588_v20 = vld [vmem:[#allocation5 + $0x630] sm:$0xff]  ;;  %v537_v21 = vld [vmem:[#allocation5 + $0x498] sm:$0xff] }
 0x1bb   : > { %3187 = vmatprep.subr.bf16.mxu0 %v4591_v29  ;;  %v540_v29 = vld [vmem:[#allocation5 + $0x4b0] sm:$0xff] }
 0x1bc   : > { %3346 = vmatpush1.bf16.msra.mxu1 %v4536_v28  ;;  %v536_v28 = vld [vmem:[#allocation5 + $0x490] sm:$0xff] }
 0x1bd   : > { %3347 = vmatprep.subr.bf16.mxu1 %v4545_v30  ;;  %v6006_v30 = vld [vmem:[%s5960_s22] ss:$28 sps:$4 sm:$0xff]   ;;  %v4654_v42 = vcombine.low %v536_v28, %v540_v29 }
 0x1be   : > { %3188 = vmatpush1.bf16.msra.mxu0 %v4590_v35  ;;  %v4600_v35 = vcombine.low %v481_v22, %v485_v23  ;;  %v541_v22 = vld [vmem:[#allocation5 + $0x4b8] sm:$0xff] }
 0x1bf   : > { %3189 = vmatprep.subr.bf16.mxu0 %v4599_v37  ;;  %v4609_v37 = vcombine.high %v489_v31, %v493_v32 }
 0x1c0   : > { %3348 = vmatpush1.bf16.msra.mxu1 %v4544_v36  ;;  %v4655_v36 = vcombine.high %v536_v28, %v540_v29  ;;  %v596_v28 = vld [vmem:[#allocation5 + $0x670] sm:$0xff]  ;;  %v545_v29 = vld [vmem:[#allocation5 + $0x4d8] sm:$0xff] }
 0x1c1   : > { %3349 = vmatprep.subr.bf16.mxu1 %v4553_v38  ;;  %v544_v38 = vld [vmem:[#allocation5 + $0x4d0] sm:$0xff] }
 0x1c2   : > { %3190 = vmatpush1.bf16.msra.mxu0 %v4598_v43  ;;  %v4608_v43 = vcombine.low %v489_v31, %v493_v32  ;;  %v4662_v50 = vcombine.low %v544_v38, %v548_v39  ;;  %v549_v31 = vld [vmem:[#allocation5 + $0x4f8] sm:$0xff] }
 0x1c3   : > { %3191 = vmatprep.subr.bf16.mxu0 %v4607_v45  ;;  %v4617_v45 = vcombine.high %v497_v40, %v501_v41 }
 0x1c4   : > { %3350 = vmatpush1.bf16.msra.mxu1 %v4552_v44  ;;  %v4663_v44 = vcombine.high %v544_v38, %v548_v39  ;;  %v553_v38 = vld [vmem:[#allocation5 + $0x518] sm:$0xff] }
 0x1c5   : > { %3351 = vmatprep.subr.bf16.mxu1 %v4561_v46  ;;  %v552_v46 = vld [vmem:[#allocation5 + $0x510] sm:$0xff]  ;;  %v557_v39 = vld [vmem:[#allocation5 + $0x538] sm:$0xff] }
 0x1c6   : > { %3192 = vmatpush1.bf16.msra.mxu0 %v4606_v51  ;;  %v4616_v51 = vcombine.low %v497_v40, %v501_v41  ;;  %v4670_v58 = vcombine.low %v552_v46, %v556_v47  ;;  %v4664_v41 = vcombine.low %v545_v29, %v549_v31 }
 0x1c7   : > { %3193 = vmatprep.subr.bf16.mxu0 %v4615_v53  ;;  %v4625_v53 = vcombine.high %v505_v48, %v509_v49 }
 0x1c8   : > { %3352 = vmatpush1.bf16.msra.mxu1 %v4560_v52  ;;  %v4671_v52 = vcombine.high %v552_v46, %v556_v47  ;;  %v565_v46 = vld [vmem:[#allocation5 + $0x578] sm:$0xff] }
 0x1c9   : > { %3353 = vmatprep.subr.bf16.mxu1 %v4569_v54  ;;  %v560_v54 = vld [vmem:[#allocation5 + $0x550] sm:$0xff] }
 0x1ca   : > { %3194 = vmatpush1.bf16.msra.mxu0 %v4614_v59  ;;  %v4624_v59 = vcombine.low %v505_v48, %v509_v49  ;;  %v4678_v3 = vcombine.low %v560_v54, %v564_v55  ;;  %v4672_v48 = vcombine.low %v553_v38, %v557_v39 }
 0x1cb   : > { %3195 = vmatprep.subr.bf16.mxu0 %v4623_v61  ;;  %v4633_v61 = vcombine.high %v513_v56, %v517_v57 }
 0x1cc   : > { %3354 = vmatpush1.bf16.msra.mxu1 %v4568_v60  ;;  %v4679_v60 = vcombine.high %v560_v54, %v564_v55  ;;  %v573_v54 = vld [vmem:[#allocation5 + $0x5b8] sm:$0xff] }
 0x1cd   : > { %3355 = vmatprep.subr.bf16.mxu1 %v4577_v62  ;;  %v568_v62 = vld [vmem:[#allocation5 + $0x590] sm:$0xff] }
 0x1ce   : > { %3196 = vmatpush1.bf16.msra.mxu0 %v4622_v4  ;;  %v4632_v4 = vcombine.low %v513_v56, %v517_v57  ;;  %v4686_v15 = vcombine.low %v568_v62, %v572_v63 }
 0x1cf   : > { %3197 = vmatprep.subr.bf16.mxu0 %v4631_v7  ;;  %v4641_v7 = vcombine.high %v521_v1, %v525_v2 }
 0x1d0   : > { %3356 = vmatpush1.bf16.msra.mxu1 %v4576_v6  ;;  %v4687_v6 = vcombine.high %v568_v62, %v572_v63  ;;  %v581_v62 = vld [vmem:[#allocation5 + $0x5f8] sm:$0xff] }
 0x1d1   : > { %3357 = vmatprep.subr.bf16.mxu1 %v4585_v9  ;;  %v576_v9 = vld [vmem:[#allocation5 + $0x5d0] sm:$0xff] }
 0x1d2   : > { %3198 = vmatpush1.bf16.msra.mxu0 %v4630_v16  ;;  %v4640_v16 = vcombine.low %v521_v1, %v525_v2  ;;  %v4694_v23 = vcombine.low %v576_v9, %v580_v11 }
 0x1d3   : > { %3210 = vmatprep.subr.bf16.mxu0 %v4639_v18  ;;  %v4649_v18 = vcombine.high %v529_v12, %v533_v14 }
 0x1d4   : > { %3358 = vmatpush1.bf16.msra.mxu1 %v4584_v17  ;;  %v4695_v17 = vcombine.high %v576_v9, %v580_v11  ;;  %v589_v9 = vld [vmem:[#allocation5 + $0x638] sm:$0xff] }
 0x1d5   : > { %3359 = vmatprep.subr.bf16.mxu1 %v4593_v19  ;;  %3200 = vmatmul.mubr.bf16.vlgmr.msra.gmra.mrb[4].mxu0 %v6006_v30  ;;  %v584_v19 = vld [vmem:[#allocation5 + $0x610] sm:$0xff] }
 0x1d6   : > { %3211 = vmatpush1.bf16.msra.mxu0 %v4638_v24  ;;  %3242 = vmatprep.mubr.bf16.mxu0 %v6010_v34  ;;  %v4648_v24 = vcombine.low %v529_v12, %v533_v14  ;;  %v4702_v32 = vcombine.low %v584_v19, %v588_v20 }
 0x1d7   : > { %3212 = vmatprep.subr.bf16.mxu0 %v4647_v26  ;;  %v4657_v26 = vcombine.high %v537_v21, %v541_v22 }
 0x1d8   : > { %3360 = vmatpush1.bf16.msra.mxu1 %v4592_v25  ;;  %v4703_v25 = vcombine.high %v584_v19, %v588_v20  ;;  %v597_v19 = vld [vmem:[#allocation5 + $0x678] sm:$0xff] }
 0x1d9   : > { %3361 = vmatprep.subr.bf16.mxu1 %v4601_v27  ;;  %v592_v27 = vld [vmem:[#allocation5 + $0x650] sm:$0xff] }
 0x1da   : > { %3213 = vmatpush1.bf16.msra.mxu0 %v4646_v33  ;;  %v4656_v33 = vcombine.low %v537_v21, %v541_v22  ;;  %v4710_v40 = vcombine.low %v592_v27, %v596_v28 }
 0x1db   : > { %3214 = vmatprep.subr.bf16.mxu0 %v4655_v36  ;;  %v600_v36 = vld [vmem:[#allocation5 + $0x690] sm:$0xff] }
 0x1dc   : > { %3362 = vmatpush1.bf16.msra.mxu1 %v4600_v35  ;;  %v4665_v35 = vcombine.high %v545_v29, %v549_v31 }
 0x1dd   : > { %3363 = vmatprep.subr.bf16.mxu1 %v4609_v37  ;;  %v604_v37 = vld [vmem:[#allocation5 + $0x6b0] sm:$0xff] }
 0x1de   : > { %3215 = vmatpush1.bf16.msra.mxu0 %v4654_v42  ;;  %v4673_v42 = vcombine.high %v553_v38, %v557_v39  ;;  %v4718_v47 = vcombine.low %v600_v36, %v604_v37 }
 0x1df   : > { %3216 = vmatprep.subr.bf16.mxu0 %v4663_v44  ;;  %v612_v44 = vld [vmem:[#allocation5 + $0x6f0] sm:$0xff] }
 0x1e0   : > { %3364 = vmatpush1.bf16.msra.mxu1 %v4608_v43  ;;  %v608_v43 = vld [vmem:[#allocation5 + $0x6d0] sm:$0xff] }
 0x1e1   : > { %3365 = vmatprep.subr.bf16.mxu1 %v4617_v45  ;;  %v561_v45 = vld [vmem:[#allocation5 + $0x558] sm:$0xff]  ;;  %v4727_v49 = vcombine.high %v608_v43, %v612_v44  ;;  %v4726_v55 = vcombine.low %v608_v43, %v612_v44 }
 0x1e2   : > { %3217 = vmatpush1.bf16.msra.mxu0 %v4662_v50  ;;  %v4681_v50 = vcombine.high %v561_v45, %v565_v46  ;;  %v4680_v56 = vcombine.low %v561_v45, %v565_v46  ;;  %v617_v43 = vld [vmem:[#allocation5 + $0x718] sm:$0xff] }
 0x1e3   : > { %3218 = vmatprep.subr.bf16.mxu0 %v4671_v52  ;;  %v620_v52 = vld [vmem:[#allocation5 + $0x730] sm:$0xff]  ;;  %v621_v44 = vld [vmem:[#allocation5 + $0x738] sm:$0xff] }
 0x1e4   : > { %3366 = vmatpush1.bf16.msra.mxu1 %v4616_v51  ;;  %v616_v51 = vld [vmem:[#allocation5 + $0x710] sm:$0xff]  ;;  %v6020_v46 = vld [vmem:[%s5960_s22 + $0x14] ss:$28 sps:$4 sm:$0xff]  }
 0x1e5   : > { %3367 = vmatprep.subr.bf16.mxu1 %v4625_v53  ;;  %v569_v53 = vld [vmem:[#allocation5 + $0x598] sm:$0xff]  ;;  %v4735_v57 = vcombine.high %v616_v51, %v620_v52  ;;  %v4734_v63 = vcombine.low %v616_v51, %v620_v52  ;;  %v676_v51 = vld [vmem:[#allocation5 + $0x8f0] sm:$0xff] }
 0x1e6   : > { %3219 = vmatpush1.bf16.msra.mxu0 %v4670_v58  ;;  %v4689_v58 = vcombine.high %v569_v53, %v573_v54  ;;  %v4688_v1 = vcombine.low %v569_v53, %v573_v54  ;;  %v625_v52 = vld [vmem:[#allocation5 + $0x758] sm:$0xff] }
 0x1e7   : > { %3220 = vmatprep.subr.bf16.mxu0 %v4679_v60  ;;  %v628_v60 = vld [vmem:[#allocation5 + $0x770] sm:$0xff]  ;;  %v629_v53 = vld [vmem:[#allocation5 + $0x778] sm:$0xff] }
 0x1e8   : > { %3368 = vmatpush1.bf16.msra.mxu1 %v4624_v59  ;;  %v624_v59 = vld [vmem:[#allocation5 + $0x750] sm:$0xff] }
 0x1e9   : > { %3369 = vmatprep.subr.bf16.mxu1 %v4633_v61  ;;  %v577_v61 = vld [vmem:[#allocation5 + $0x5d8] sm:$0xff]  ;;  %v4743_v2 = vcombine.high %v624_v59, %v628_v60  ;;  %v4742_v11 = vcombine.low %v624_v59, %v628_v60  ;;  %v684_v59 = vld [vmem:[#allocation5 + $0x930] sm:$0xff] }
 0x1ea   : > { %3221 = vmatpush1.bf16.msra.mxu0 %v4678_v3  ;;  %v4697_v3 = vcombine.high %v577_v61, %v581_v62  ;;  %v4696_v12 = vcombine.low %v577_v61, %v581_v62  ;;  %v633_v60 = vld [vmem:[#allocation5 + $0x798] sm:$0xff] }
 0x1eb   : > { %3222 = vmatprep.subr.bf16.mxu0 %v4687_v6  ;;  %v636_v6 = vld [vmem:[#allocation5 + $0x7b0] sm:$0xff]  ;;  %v637_v61 = vld [vmem:[#allocation5 + $0x7b8] sm:$0xff] }
 0x1ec   : > { %3370 = vmatpush1.bf16.msra.mxu1 %v4632_v4  ;;  %v632_v4 = vld [vmem:[#allocation5 + $0x790] sm:$0xff] }
 0x1ed   : > { %3382 = vmatprep.subr.bf16.mxu1 %v4641_v7  ;;  %v585_v7 = vld [vmem:[#allocation5 + $0x618] sm:$0xff]  ;;  %v4751_v14 = vcombine.high %v632_v4, %v636_v6  ;;  %v4750_v20 = vcombine.low %v632_v4, %v636_v6  ;;  %v692_v4 = vld [vmem:[#allocation5 + $0x970] sm:$0xff] }
 0x1ee   : > { %3223 = vmatpush1.bf16.msra.mxu0 %v4686_v15  ;;  %v4705_v15 = vcombine.high %v585_v7, %v589_v9  ;;  %v4704_v21 = vcombine.low %v585_v7, %v589_v9  ;;  %v641_v6 = vld [vmem:[#allocation5 + $0x7d8] sm:$0xff] }
 0x1ef   : > { %3372 = vmatmul.mubr.bf16.vlgmr.msra.gmra.mrb[12].mxu1 %v6006_v30  ;;  %3224 = vmatprep.subr.bf16.mxu0 %v4695_v17  ;;  %v4711_v30 = vcombine.high %v592_v27, %v596_v28  ;;  %v644_v17 = vld [vmem:[#allocation5 + $0x7f0] sm:$0xff]  ;;  %v605_v27 = vld [vmem:[#allocation5 + $0x6b8] sm:$0xff] }
 0x1f0   : > { %3383 = vmatpush1.bf16.msra.mxu1 %v4640_v16  ;;  %3414 = vmatprep.mubr.bf16.mxu1 %v6010_v34  ;;  %v4719_v34 = vcombine.high %v600_v36, %v604_v37  ;;  %v640_v16 = vld [vmem:[#allocation5 + $0x7d0] sm:$0xff]  ;;  %v613_v36 = vld [vmem:[#allocation5 + $0x6f8] sm:$0xff] }
 0x1f1   : > { %3384 = vmatprep.subr.bf16.mxu1 %v4649_v18  ;;  %v593_v18 = vld [vmem:[#allocation5 + $0x658] sm:$0xff]  ;;  %v4759_v22 = vcombine.high %v640_v16, %v644_v17  ;;  %v4758_v28 = vcombine.low %v640_v16, %v644_v17  ;;  %v700_v16 = vld [vmem:[#allocation5 + $0x9b0] sm:$0xff] }
 0x1f2   : > { %3225 = vmatpush1.bf16.msra.mxu0 %v4694_v23  ;;  %v4713_v23 = vcombine.high %v593_v18, %v597_v19  ;;  %v4712_v29 = vcombine.low %v593_v18, %v597_v19  ;;  %v645_v7 = vld [vmem:[#allocation5 + $0x7f8] sm:$0xff] }
 0x1f3   : > { %3226 = vmatprep.subr.bf16.mxu0 %v4703_v25  ;;  %v652_v25 = vld [vmem:[#allocation5 + $0x830] sm:$0xff]  ;;  %v649_v17 = vld [vmem:[#allocation5 + $0x818] sm:$0xff] }
 0x1f4   : > { %3385 = vmatpush1.bf16.msra.mxu1 %v4648_v24  ;;  %v648_v24 = vld [vmem:[#allocation5 + $0x810] sm:$0xff]  ;;  %v653_v18 = vld [vmem:[#allocation5 + $0x838] sm:$0xff] }
 0x1f5   : > { %3386 = vmatprep.subr.bf16.mxu1 %v4657_v26  ;;  %v601_v26 = vld [vmem:[#allocation5 + $0x698] sm:$0xff]  ;;  %v4767_v31 = vcombine.high %v648_v24, %v652_v25  ;;  %v4766_v37 = vcombine.low %v648_v24, %v652_v25  ;;  %v708_v24 = vld [vmem:[#allocation5 + $0x9f0] sm:$0xff] }
 0x1f6   : > { %3227 = vmatpush1.bf16.msra.mxu0 %v4702_v32  ;;  %v4721_v32 = vcombine.high %v601_v26, %v605_v27  ;;  %v4720_v38 = vcombine.low %v601_v26, %v605_v27  ;;  %v657_v25 = vld [vmem:[#allocation5 + $0x858] sm:$0xff] }
 0x1f7   : > { %3228 = vmatprep.subr.bf16.mxu0 %v4711_v30  ;;  %v660_v30 = vld [vmem:[#allocation5 + $0x870] sm:$0xff]  ;;  %v661_v26 = vld [vmem:[#allocation5 + $0x878] sm:$0xff] }
 0x1f8   : > { %3387 = vmatpush1.bf16.msra.mxu1 %v4656_v33  ;;  %v656_v33 = vld [vmem:[#allocation5 + $0x850] sm:$0xff] }
 0x1f9   : > { %3388 = vmatprep.subr.bf16.mxu1 %v4665_v35  ;;  %v609_v35 = vld [vmem:[#allocation5 + $0x6d8] sm:$0xff]  ;;  %v4775_v39 = vcombine.high %v656_v33, %v660_v30  ;;  %v4774_v45 = vcombine.low %v656_v33, %v660_v30  ;;  %v716_v33 = vld [vmem:[#allocation5 + $0xa30] sm:$0xff] }
 0x1fa   : > { %3229 = vmatpush1.bf16.msra.mxu0 %v4710_v40  ;;  %v4729_v40 = vcombine.high %v609_v35, %v613_v36  ;;  %v665_v30 = vld [vmem:[#allocation5 + $0x898] sm:$0xff] }
 0x1fb   : > { %3230 = vmatprep.subr.bf16.mxu0 %v4719_v34  ;;  %v668_v34 = vld [vmem:[#allocation5 + $0x8b0] sm:$0xff] }
 0x1fc   : > { %3389 = vmatpush1.bf16.msra.mxu1 %v4664_v41  ;;  %v664_v41 = vld [vmem:[#allocation5 + $0x890] sm:$0xff] }
 0x1fd   : > { %3390 = vmatprep.subr.bf16.mxu1 %v4673_v42  ;;  %v6016_v42 = vld [vmem:[%s5960_s22 + $0x8] ss:$28 sps:$4 sm:$0xff]   ;;  %v4782_v54 = vcombine.low %v664_v41, %v668_v34 }
 0x1fe   : > { %3231 = vmatpush1.bf16.msra.mxu0 %v4718_v47  ;;  %v4728_v47 = vcombine.low %v609_v35, %v613_v36  ;;  %v669_v35 = vld [vmem:[#allocation5 + $0x8b8] sm:$0xff] }
 0x1ff   : > { %3232 = vmatprep.subr.bf16.mxu0 %v4727_v49  ;;  %v4737_v49 = vcombine.high %v617_v43, %v621_v44 }
 0x200   : > { %3391 = vmatpush1.bf16.msra.mxu1 %v4672_v48  ;;  %v4783_v48 = vcombine.high %v664_v41, %v668_v34  ;;  %v724_v41 = vld [vmem:[#allocation5 + $0xa70] sm:$0xff]  ;;  %v673_v34 = vld [vmem:[#allocation5 + $0x8d8] sm:$0xff] }
 0x201   : > { %3392 = vmatprep.subr.bf16.mxu1 %v4681_v50  ;;  %v672_v50 = vld [vmem:[#allocation5 + $0x8d0] sm:$0xff] }
 0x202   : > { %3233 = vmatpush1.bf16.msra.mxu0 %v4726_v55  ;;  %v4736_v55 = vcombine.low %v617_v43, %v621_v44  ;;  %v4790_v62 = vcombine.low %v672_v50, %v676_v51  ;;  %v677_v43 = vld [vmem:[#allocation5 + $0x8f8] sm:$0xff] }
 0x203   : > { %3234 = vmatprep.subr.bf16.mxu0 %v4735_v57  ;;  %v4745_v57 = vcombine.high %v625_v52, %v629_v53 }
 0x204   : > { %3393 = vmatpush1.bf16.msra.mxu1 %v4680_v56  ;;  %v4791_v56 = vcombine.high %v672_v50, %v676_v51  ;;  %v681_v50 = vld [vmem:[#allocation5 + $0x918] sm:$0xff] }
 0x205   : > { %3394 = vmatprep.subr.bf16.mxu1 %v4689_v58  ;;  %v680_v58 = vld [vmem:[#allocation5 + $0x910] sm:$0xff]  ;;  %v685_v51 = vld [vmem:[#allocation5 + $0x938] sm:$0xff] }
 0x206   : > { %3235 = vmatpush1.bf16.msra.mxu0 %v4734_v63  ;;  %v4744_v63 = vcombine.low %v625_v52, %v629_v53  ;;  %v4798_v9 = vcombine.low %v680_v58, %v684_v59  ;;  %v4792_v53 = vcombine.low %v673_v34, %v677_v43 }
 0x207   : > { %3236 = vmatprep.subr.bf16.mxu0 %v4743_v2  ;;  %v4753_v2 = vcombine.high %v633_v60, %v637_v61 }
 0x208   : > { %3395 = vmatpush1.bf16.msra.mxu1 %v4688_v1  ;;  %v4799_v1 = vcombine.high %v680_v58, %v684_v59  ;;  %v693_v58 = vld [vmem:[#allocation5 + $0x978] sm:$0xff] }
 0x209   : > { %3396 = vmatprep.subr.bf16.mxu1 %v4697_v3  ;;  %v688_v3 = vld [vmem:[#allocation5 + $0x950] sm:$0xff] }
 0x20a   : > { %3237 = vmatpush1.bf16.msra.mxu0 %v4742_v11  ;;  %v4752_v11 = vcombine.low %v633_v60, %v637_v61  ;;  %v4806_v19 = vcombine.low %v688_v3, %v692_v4  ;;  %v4800_v60 = vcombine.low %v681_v50, %v685_v51 }
 0x20b   : > { %3238 = vmatprep.subr.bf16.mxu0 %v4751_v14  ;;  %v4761_v14 = vcombine.high %v641_v6, %v645_v7 }
 0x20c   : > { %3397 = vmatpush1.bf16.msra.mxu1 %v4696_v12  ;;  %v4807_v12 = vcombine.high %v688_v3, %v692_v4  ;;  %v701_v3 = vld [vmem:[#allocation5 + $0x9b8] sm:$0xff] }
 0x20d   : > { %3398 = vmatprep.subr.bf16.mxu1 %v4705_v15  ;;  %v696_v15 = vld [vmem:[#allocation5 + $0x990] sm:$0xff] }
 0x20e   : > { %3239 = vmatpush1.bf16.msra.mxu0 %v4750_v20  ;;  %v4760_v20 = vcombine.low %v641_v6, %v645_v7  ;;  %v4814_v27 = vcombine.low %v696_v15, %v700_v16 }
 0x20f   : > { %3240 = vmatprep.subr.bf16.mxu0 %v4759_v22  ;;  %v4769_v22 = vcombine.high %v649_v17, %v653_v18 }
 0x210   : > { %3399 = vmatpush1.bf16.msra.mxu1 %v4704_v21  ;;  %v4815_v21 = vcombine.high %v696_v15, %v700_v16  ;;  %v709_v15 = vld [vmem:[#allocation5 + $0x9f8] sm:$0xff] }
 0x211   : > { %3400 = vmatprep.subr.bf16.mxu1 %v4713_v23  ;;  %v704_v23 = vld [vmem:[#allocation5 + $0x9d0] sm:$0xff] }
 0x212   : > { %3241 = vmatpush1.bf16.msra.mxu0 %v4758_v28  ;;  %v4768_v28 = vcombine.low %v649_v17, %v653_v18  ;;  %v4822_v36 = vcombine.low %v704_v23, %v708_v24 }
 0x213   : > { %3253 = vmatprep.subr.bf16.mxu0 %v4767_v31  ;;  %v4777_v31 = vcombine.high %v657_v25, %v661_v26 }
 0x214   : > { %3401 = vmatpush1.bf16.msra.mxu1 %v4712_v29  ;;  %v4823_v29 = vcombine.high %v704_v23, %v708_v24  ;;  %v717_v23 = vld [vmem:[#allocation5 + $0xa38] sm:$0xff] }
 0x215   : > { %3402 = vmatprep.subr.bf16.mxu1 %v4721_v32  ;;  %3243 = vmatmul.mubr.bf16.vlgmr.msra.gmra.mrb[4].mxu0 %v6016_v42  ;;  %v712_v32 = vld [vmem:[#allocation5 + $0xa10] sm:$0xff] }
 0x216   : > { %3254 = vmatpush1.bf16.msra.mxu0 %v4766_v37  ;;  %3285 = vmatprep.mubr.bf16.mxu0 %v6020_v46  ;;  %v4776_v37 = vcombine.low %v657_v25, %v661_v26  ;;  %v4830_v44 = vcombine.low %v712_v32, %v716_v33 }
 0x217   : > { %3255 = vmatprep.subr.bf16.mxu0 %v4775_v39  ;;  %v4785_v39 = vcombine.high %v665_v30, %v669_v35 }
 0x218   : > { %3403 = vmatpush1.bf16.msra.mxu1 %v4720_v38  ;;  %v4831_v38 = vcombine.high %v712_v32, %v716_v33  ;;  %v725_v32 = vld [vmem:[#allocation5 + $0xa78] sm:$0xff] }
 0x219   : > { %3404 = vmatprep.subr.bf16.mxu1 %v4729_v40  ;;  %v720_v40 = vld [vmem:[#allocation5 + $0xa50] sm:$0xff] }
 0x21a   : > { %3256 = vmatpush1.bf16.msra.mxu0 %v4774_v45  ;;  %v4784_v45 = vcombine.low %v665_v30, %v669_v35  ;;  %v4838_v52 = vcombine.low %v720_v40, %v724_v41 }
 0x21b   : > { %3257 = vmatprep.subr.bf16.mxu0 %v4783_v48  ;;  %v728_v48 = vld [vmem:[#allocation5 + $0xa90] sm:$0xff] }
 0x21c   : > { %3405 = vmatpush1.bf16.msra.mxu1 %v4728_v47  ;;  %v4793_v47 = vcombine.high %v673_v34, %v677_v43  ;;  %v737_v43 = vld [vmem:[#allocation5 + $0xad8] sm:$0xff] }
 0x21d   : > { %3406 = vmatprep.subr.bf16.mxu1 %v4737_v49  ;;  %v732_v49 = vld [vmem:[#allocation5 + $0xab0] sm:$0xff] }
 0x21e   : > { %3258 = vmatpush1.bf16.msra.mxu0 %v4782_v54  ;;  %v4801_v54 = vcombine.high %v681_v50, %v685_v51  ;;  %v4846_v59 = vcombine.low %v728_v48, %v732_v49  ;;  %v745_v50 = vld [vmem:[#allocation5 + $0xb18] sm:$0xff] }
 0x21f   : > { %3259 = vmatprep.subr.bf16.mxu0 %v4791_v56  ;;  %v740_v56 = vld [vmem:[#allocation5 + $0xaf0] sm:$0xff]  ;;  %v749_v51 = vld [vmem:[#allocation5 + $0xb38] sm:$0xff] }
 0x220   : > { %3407 = vmatpush1.bf16.msra.mxu1 %v4736_v55  ;;  %v736_v55 = vld [vmem:[#allocation5 + $0xad0] sm:$0xff] }
 0x221   : > { %3408 = vmatprep.subr.bf16.mxu1 %v4745_v57  ;;  %v689_v57 = vld [vmem:[#allocation5 + $0x958] sm:$0xff]  ;;  %v4855_v61 = vcombine.high %v736_v55, %v740_v56  ;;  %v4854_v4 = vcombine.low %v736_v55, %v740_v56 }
 0x222   : > { %3260 = vmatpush1.bf16.msra.mxu0 %v4790_v62  ;;  %v4809_v62 = vcombine.high %v689_v57, %v693_v58  ;;  %v4808_v6 = vcombine.low %v689_v57, %v693_v58  ;;  %v753_v55 = vld [vmem:[#allocation5 + $0xb58] sm:$0xff]  ;;  %v784_v57 = vlaneseq }
 0x223   : > { %3261 = vmatprep.subr.bf16.mxu0 %v4799_v1  ;;  %v748_v1 = vld [vmem:[#allocation5 + $0xb30] sm:$0xff]  ;;  %v757_v56 = vld [vmem:[#allocation5 + $0xb78] sm:$0xff] }
 0x224   : > { %3409 = vmatpush1.bf16.msra.mxu1 %v4744_v63  ;;  %v744_v63 = vld [vmem:[#allocation5 + $0xb10] sm:$0xff]  ;;  %v5299_v58 = vld [vmem:[#allocation8 + $0x10] sm:$0xff]  }
 0x225   : > { %3410 = vmatprep.subr.bf16.mxu1 %v4753_v2  ;;  %v697_v2 = vld [vmem:[#allocation5 + $0x998] sm:$0xff]  ;;  %v4863_v7 = vcombine.high %v744_v63, %v748_v1  ;;  %v4862_v16 = vcombine.low %v744_v63, %v748_v1  ;;  %v6029_v1 = vshrl.u32 %v784_v57, 7 }
 0x226   : > { %3262 = vmatpush1.bf16.msra.mxu0 %v4798_v9  ;;  %v4817_v9 = vcombine.high %v697_v2, %v701_v3  ;;  %v4816_v17 = vcombine.low %v697_v2, %v701_v3  ;;  %v765_v63 = vld [vmem:[#allocation5 + $0xbb8] sm:$0xff]  ;;  %v5301_v2 = vld [vmem:[#allocation8 + $0x18] sm:$0xff]   ;;  %v4872_v3 = vcombine.low %v753_v55, %v757_v56 }
 0x227   : > { %3263 = vmatprep.subr.bf16.mxu0 %v4807_v12  ;;  %v756_v12 = vld [vmem:[#allocation5 + $0xb70] sm:$0xff] }
 0x228   : > { %3411 = vmatpush1.bf16.msra.mxu1 %v4752_v11  ;;  %v752_v11 = vld [vmem:[#allocation5 + $0xb50] sm:$0xff] }
 0x229   : > { %3412 = vmatprep.subr.bf16.mxu1 %v4761_v14  ;;  %v705_v14 = vld [vmem:[#allocation5 + $0x9d8] sm:$0xff]  ;;  %v4871_v18 = vcombine.high %v752_v11, %v756_v12  ;;  %v4870_v24 = vcombine.low %v752_v11, %v756_v12  ;;  %v5303_v12 = vld [vmem:[#allocation8 + $0x20] sm:$0xff]  }
 0x22a   : > { %3264 = vmatpush1.bf16.msra.mxu0 %v4806_v19  ;;  %v4825_v19 = vcombine.high %v705_v14, %v709_v15  ;;  %v4824_v25 = vcombine.low %v705_v14, %v709_v15  ;;  %v773_v11 = vld [vmem:[#allocation5 + $0xbf8] sm:$0xff]  ;;  %v6032_v14 = vld [vmem:[#allocation7] sm:$0xff]  ;;  %v790_v15 = vsub.s32 1, %v6029_v1 }
 0x22b   : > { %3265 = vmatprep.subr.bf16.mxu0 %v4815_v21  ;;  %v764_v21 = vld [vmem:[#allocation5 + $0xbb0] sm:$0xff] }
 0x22c   : > { %3413 = vmatpush1.bf16.msra.mxu1 %v4760_v20  ;;  %v760_v20 = vld [vmem:[#allocation5 + $0xb90] sm:$0xff] }
 0x22d   : > { %3425 = vmatprep.subr.bf16.mxu1 %v4769_v22  ;;  %v713_v22 = vld [vmem:[#allocation5 + $0xa18] sm:$0xff]  ;;  %v4879_v26 = vcombine.high %v760_v20, %v764_v21  ;;  %v4878_v33 = vcombine.low %v760_v20, %v764_v21 }
 0x22e   : > { %3266 = vmatpush1.bf16.msra.mxu0 %v4814_v27  ;;  %v4833_v27 = vcombine.high %v713_v22, %v717_v23  ;;  %v4832_v30 = vcombine.low %v713_v22, %v717_v23  ;;  %v777_v20 = vld [vmem:[#allocation5 + $0xc18] sm:$0xff]  ;;  %v791_v22 = vrot.slane %v6032_v14, %v790_v15  ;;  %v5305_v23 = vld [vmem:[#allocation8 + $0x28] sm:$0xff]  }
 0x22f   : > { %3415 = vmatmul.mubr.bf16.vlgmr.msra.gmra.mrb[12].mxu1 %v6016_v42  ;;  %3267 = vmatprep.subr.bf16.mxu0 %v4823_v29  ;;  %v4839_v42 = vcombine.high %v720_v40, %v724_v41  ;;  %v772_v29 = vld [vmem:[#allocation5 + $0xbf0] sm:$0xff]  ;;  %v5294_v41 = vld [vmem:[#allocation8 + $0x40] sm:$0xff]   ;;  %v781_v21 = vld [vmem:[#allocation5 + $0xc38] sm:$0xff] }
 0x230   : > { %3426 = vmatpush1.bf16.msra.mxu1 %v4768_v28  ;;  %3457 = vmatprep.mubr.bf16.mxu1 %v6020_v46  ;;  %v4847_v46 = vcombine.high %v728_v48, %v732_v49  ;;  %v768_v28 = vld [vmem:[#allocation5 + $0xbd0] sm:$0xff] }
 0x231   : > { %3427 = vmatprep.subr.bf16.mxu1 %v4777_v31  ;;  %v721_v31 = vld [vmem:[#allocation5 + $0xa58] sm:$0xff]  ;;  %v4887_v35 = vcombine.high %v768_v28, %v772_v29 }
 0x232   : > { %3268 = vmatpush1.bf16.msra.mxu0 %v4822_v36  ;;  %v4841_v36 = vcombine.high %v721_v31, %v725_v32  ;;  %v4840_v40 = vcombine.low %v721_v31, %v725_v32  ;;  %v6026_v49 = vld [vmem:[%s5960_s22 + $0x10] ss:$28 sps:$4 sm:$0xff]  }
 0x233   : > { %3269 = vmatprep.subr.bf16.mxu0 %v4831_v38  ;;  %v733_v38 = vld [vmem:[#allocation5 + $0xab8] sm:$0xff] }
 0x234   : > { %3428 = vmatpush1.bf16.msra.mxu1 %v4776_v37  ;;  %v729_v37 = vld [vmem:[#allocation5 + $0xa98] sm:$0xff] }
 0x235   : > { %3429 = vmatprep.subr.bf16.mxu1 %v4785_v39  ;;  %v4886_v39 = vcombine.low %v768_v28, %v772_v29  ;;  %v4849_v34 = vcombine.high %v729_v37, %v733_v38 }
 0x236   : > { %3270 = vmatpush1.bf16.msra.mxu0 %v4830_v44  ;;  %v741_v44 = vld [vmem:[#allocation5 + $0xaf8] sm:$0xff] }
 0x237   : > { %3271 = vmatprep.subr.bf16.mxu0 %v4839_v42  ;;  %v4848_v42 = vcombine.low %v729_v37, %v733_v38  ;;  %v4857_v48 = vcombine.high %v737_v43, %v741_v44  ;;  %v4896_v37 = vcombine.low %v777_v20, %v781_v21  ;;  %v5308_v38 = vld [vmem:[#allocation8 + $0x78] sm:$0xff]  }
 0x238   : > { %3430 = vmatpush1.bf16.msra.mxu1 %v4784_v45  ;;  %v5295_v45 = vld [vmem:[#allocation8] sm:$0xff]  }
 0x239   : > { %3431 = vmatprep.subr.bf16.mxu1 %v4793_v47  ;;  %v5296_v47 = vld [vmem:[#allocation8 + $0x48] sm:$0xff]  }
 0x23a   : > { %3272 = vmatpush1.bf16.msra.mxu0 %v4838_v52  ;;  %v5297_v52 = vld [vmem:[#allocation8 + $0x8] sm:$0xff]  }
 0x23b   : > { %3273 = vmatprep.subr.bf16.mxu0 %v4847_v46  ;;  %v5298_v46 = vld [vmem:[#allocation8 + $0x50] sm:$0xff]  }
 0x23c   : > { %3432 = vmatpush1.bf16.msra.mxu1 %v4792_v53  ;;  %v4856_v53 = vcombine.low %v737_v43, %v741_v44  ;;  %v5309_v44 = vld [vmem:[#allocation8 + $0x38] sm:$0xff]  }
 0x23d   : > { %3433 = vmatprep.subr.bf16.mxu1 %v4801_v54  ;;  %v4865_v54 = vcombine.high %v745_v50, %v749_v51 }
 0x23e   : > { %3274 = vmatpush1.bf16.msra.mxu0 %v4846_v59  ;;  %v4864_v59 = vcombine.low %v745_v50, %v749_v51  ;;  %v5328_v51 = vld [vmem:[#allocation8 + $0x148] sm:$0xff]  }
 0x23f   : > { %3275 = vmatprep.subr.bf16.mxu0 %v4855_v61  ;;  %v4873_v61 = vcombine.high %v753_v55, %v757_v56  ;;  %v5312_v55 = vld [vmem:[#allocation8 + $0xc8] sm:$0xff]  }
 0x240   : > { %3434 = vmatpush1.bf16.msra.mxu1 %v4800_v60  ;;  %v5300_v60 = vld [vmem:[#allocation8 + $0x58] sm:$0xff]  }
 0x241   : > { %3435 = vmatprep.subr.bf16.mxu1 %v4809_v62  ;;  %v761_v62 = vld [vmem:[#allocation5 + $0xb98] sm:$0xff] }
 0x242   : > { %3276 = vmatpush1.bf16.msra.mxu0 %v4854_v4  ;;  %v5302_v4 = vld [vmem:[#allocation8 + $0x60] sm:$0xff]  }
 0x243   : > { %3277 = vmatprep.subr.bf16.mxu0 %v4863_v7  ;;  %v786_v7 = vsub.s32 0, %v6029_v1 }
 0x244   : > { %3436 = vmatpush1.bf16.msra.mxu1 %v4808_v6  ;;  %v4881_v6 = vcombine.high %v761_v62, %v765_v63 }
 0x245   : > { %3437 = vmatprep.subr.bf16.mxu1 %v4817_v9  ;;  %v769_v9 = vld [vmem:[#allocation5 + $0xbd8] sm:$0xff] }
 0x246   : > { %3278 = vmatpush1.bf16.msra.mxu0 %v4862_v16  ;;  %v4880_v16 = vcombine.low %v761_v62, %v765_v63  ;;  %v5313_v63 = vld [vmem:[#allocation8 + $0x88] sm:$0xff]  }
 0x247   : > { %3279 = vmatprep.subr.bf16.mxu0 %v4871_v18  ;;  %v4889_v18 = vcombine.high %v769_v9, %v773_v11 }
 0x248   : > { %3438 = vmatpush1.bf16.msra.mxu1 %v4816_v17  ;;  %v5304_v17 = vld [vmem:[#allocation8 + $0x68] sm:$0xff]  }
 0x249   : > { %3439 = vmatprep.subr.bf16.mxu1 %v4825_v19  ;;  %v787_v19 = vrot.slane %v6032_v14, %v786_v7 }
 0x24a   : > { %3280 = vmatpush1.bf16.msra.mxu0 %v4870_v24  ;;  %v4888_v24 = vcombine.low %v769_v9, %v773_v11 }
 0x24b   : > { %3281 = vmatprep.subr.bf16.mxu0 %v4879_v26 }
 0x24c   : > { %3440 = vmatpush1.bf16.msra.mxu1 %v4824_v25  ;;  %v5306_v25 = vld [vmem:[#allocation8 + $0x70] sm:$0xff]  }
 0x24d   : > { %3441 = vmatprep.subr.bf16.mxu1 %v4833_v27  ;;  %v4897_v27 = vcombine.high %v777_v20, %v781_v21  ;;  %v5334_v20 = vld [vmem:[#allocation8 + $0x160] sm:$0xff]  }
 0x24e   : > { %3282 = vmatpush1.bf16.msra.mxu0 %v4878_v33  ;;  %v5307_v33 = vld [vmem:[#allocation8 + $0x30] sm:$0xff]  }
 0x24f   : > { %3283 = vmatprep.subr.bf16.mxu0 %v4887_v35 }
 0x250   : > { %3442 = vmatpush1.bf16.msra.mxu1 %v4832_v30 }
 0x251   : > { %3443 = vmatprep.subr.bf16.mxu1 %v4841_v36 }
 0x252   : > { %3284 = vmatpush1.bf16.msra.mxu0 %v4886_v39 }
 0x253   : > { %4982 = vmatprep.subr.bf16.mxu0 %v5294_v41  ;;  %v5310_v41 = vld [vmem:[#allocation8 + $0xc0] sm:$0xff]  }
 0x254   : > { %3444 = vmatpush1.bf16.msra.mxu1 %v4840_v40 }
 0x255   : > { %3445 = vmatprep.subr.bf16.mxu1 %v4849_v34  ;;  %3286 = vmatmul.mubr.bf16.vlgmr.msra.gmra.mrb[4].mxu0 %v6026_v49 }
 0x256   : > { %4983 = vmatpush3.bf16.msra.mxu0 %v5295_v45 }
 0x257   : > { %4984 = vmatprep.subr.bf16.mxu0 %v5296_v47 }
 0x258   : > { %3446 = vmatpush1.bf16.msra.mxu1 %v4848_v42  ;;  %v5326_v42 = vld [vmem:[#allocation8 + $0x140] sm:$0xff]  }
 0x259   : > { %3447 = vmatprep.subr.bf16.mxu1 %v4857_v48 }
 0x25a   : > { %4985 = vmatpush3.bf16.msra.mxu0 %v5297_v52 }
 0x25b   : > { %4986 = vmatprep.subr.bf16.mxu0 %v5298_v46  ;;  %v5311_v46 = vld [vmem:[#allocation8 + $0x80] sm:$0xff]  }
 0x25c   : > { %3448 = vmatpush1.bf16.msra.mxu1 %v4856_v53  ;;  %v5329_v53 = vld [vmem:[#allocation8 + $0x108] sm:$0xff]  }
 0x25d   : > { %3449 = vmatprep.subr.bf16.mxu1 %v4865_v54  ;;  %v5330_v54 = vld [vmem:[#allocation8 + $0x150] sm:$0xff]  }
 0x25e   : > { %4987 = vmatpush3.bf16.msra.mxu0 %v5299_v58  ;;  %v5373_v58 = vld [vmem:[%s5960_s22 + $0x18] ss:$28 sps:$4 sm:$0xff]  }
 0x25f   : > { %4988 = vmatprep.subr.bf16.mxu0 %v5300_v60  ;;  %v5331_v60 = vld [vmem:[#allocation8 + $0x110] sm:$0xff]  }
 0x260   : > { %3450 = vmatpush1.bf16.msra.mxu1 %v4864_v59 }
 0x261   : > { %3451 = vmatprep.subr.bf16.mxu1 %v4873_v61 }
 0x262   : > { %4989 = vmatpush3.bf16.msra.mxu0 %v5301_v2  ;;  %v5332_v2 = vld [vmem:[#allocation8 + $0x158] sm:$0xff]  }
 0x263   : > { %4990 = vmatprep.subr.bf16.mxu0 %v5302_v4 }
 0x264   : > { %3452 = vmatpush1.bf16.msra.mxu1 %v4872_v3 }
 0x265   : > { %3453 = vmatprep.subr.bf16.mxu1 %v4881_v6  ;;  %v5314_v6 = vld [vmem:[#allocation8 + $0xd0] sm:$0xff]  }
 0x266   : > { %4991 = vmatpush3.bf16.msra.mxu0 %v5303_v12  ;;  %v5333_v12 = vld [vmem:[#allocation8 + $0x118] sm:$0xff]  }
 0x267   : > { %4992 = vmatprep.subr.bf16.mxu0 %v5304_v17  ;;  %v5315_v17 = vld [vmem:[#allocation8 + $0x90] sm:$0xff]  }
 0x268   : > { %3454 = vmatpush1.bf16.msra.mxu1 %v4880_v16  ;;  %v2943_v26 = vpop.f32.mrb[0].mxu0 }
 0x269   : > { %3455 = vmatprep.subr.bf16.mxu1 %v4889_v18  ;;  %v5099_v28 = vadd.f32 %v2943_v26, %v787_v19  ;;  %v2945_v29 = vpop.f32.mrb[1].mxu0  ;;  %v5317_v26 = vld [vmem:[#allocation8 + $0x98] sm:$0xff]  }
 0x26a   : > { %v5101_v31 = vadd.f32 %v2945_v29, %v791_v22  ;;  %v2947_v32 = vpop.f32.mrb[2].mxu0  ;;  %4993 = vmatpush3.bf16.msra.mxu0 %v5305_v23  ;;  %v5319_v29 = vld [vmem:[#allocation8 + $0xa0] sm:$0xff]  }
 0x26b   : > { %v5100_v30 = vadd.f32 %v5099_v28, %v5995_v5  ;;  %v5103_v35 = vadd.f32 %v2947_v32, %v787_v19  ;;  %v2949_v36 = vpop.f32.mrb[3].mxu0  ;;  %4994 = vmatprep.subr.bf16.mxu0 %v5306_v25  ;;  %v5316_v19 = vld [vmem:[#allocation8 + $0xd8] sm:$0xff]   ;;  %v5318_v28 = vld [vmem:[#allocation8 + $0xe0] sm:$0xff]   ;;  %v5321_v32 = vld [vmem:[#allocation8 + $0xa8] sm:$0xff]  }
 0x26c   : > { %3456 = vmatpush1.bf16.msra.mxu1 %v4888_v24  ;;  %v5102_v39 = vadd.f32 %v5101_v31, %v5997_v8  ;;  %v5105_v40 = vadd.f32 %v2949_v36, %v791_v22  ;;  %v5335_v24 = vld [vmem:[#allocation8 + $0x120] sm:$0xff]   ;;  %v5320_v31 = vld [vmem:[#allocation8 + $0xe8] sm:$0xff]   ;;  %v5325_v36 = vld [vmem:[#allocation8 + $0xb8] sm:$0xff]  }
 0x26d   : > { %3468 = vmatprep.subr.bf16.mxu1 %v4897_v27  ;;  %v5104_v34 = vadd.f32 %v5103_v35, %v6000_v10  ;;  %v3511_v5 = vmax.f32 %v5100_v30, 0.0  ;;  %v794_v10 = vsub.s32 2, %v6029_v1  ;;  %v5323_v30 = vld [vmem:[#allocation8 + $0xb0] sm:$0xff]   ;;  %v5324_v35 = vld [vmem:[#allocation8 + $0xf8] sm:$0xff]  }
 0x26e   : > { %v5106_v43 = vadd.f32 %v5105_v40, %v6002_v13  ;;  %4995 = vmatpush3.bf16.msra.mxu0 %v5307_v33  ;;  %v3512_v47 = vmax.f32 %v5102_v39, 0.0  ;;  %v5327_v13 = vld [vmem:[#allocation8 + $0x100] sm:$0xff]   ;;  %v5322_v33 = vld [vmem:[#allocation8 + $0xf0] sm:$0xff]  }
 0x26f   : > { %3458 = vmatmul.mubr.bf16.vlgmr.msra.gmra.mrb[12].mxu1 %v6026_v49  ;;  %v3519_v45 = vmax.f32 %v5104_v34, 0.0  ;;  %4996 = vmatprep.subr.bf16.mxu0 %v5308_v38  ;;  %v798_v49 = vsub.s32 3, %v6029_v1  ;;  %v795_v52 = vrot.slane %v6032_v14, %v794_v10  ;;  %v5337_v38 = vld [vmem:[#allocation8 + $0x128] sm:$0xff]   ;;  %v5338_v39 = vld [vmem:[#allocation8 + $0x170] sm:$0xff]   ;;  %v5341_v34 = vld [vmem:[#allocation8 + $0x138] sm:$0xff]  }
 0x270   : > { %3469 = vmatpush1.bf16.msra.mxu1 %v4896_v37  ;;  %v3520_v48 = vmax.f32 %v5106_v43, 0.0  ;;  %3500 = vmatprep.mubr.bf16.mxu1 %v5665_v0  ;;  %v5336_v37 = vld [vmem:[#allocation8 + $0x168] sm:$0xff]   ;;  %v5339_v40 = vld [vmem:[#allocation8 + $0x130] sm:$0xff]   ;;  %v5342_v43 = vld [vmem:[#allocation8 + $0x1c0] sm:$0xff]  }
 0x271   : > { %5004 = vmatprep.subr.bf16.mxu1 %v5310_v41  ;;  %v3527_v8 = vpack.c.bf16 %v3519_v45, %v3511_v5  ;;  %v799_v0 = vrot.slane %v6032_v14, %v798_v49  ;;  %v5340_v41 = vld [vmem:[#allocation8 + $0x178] sm:$0xff]   ;;  %v5344_v5 = vld [vmem:[#allocation8 + $0x1c8] sm:$0xff]   ;;  %v5351_v10 = vld [vmem:[#allocation8 + $0x1a0] sm:$0xff]  }
 0x272   : > { %4997 = vmatpush3.bf16.msra.mxu0 %v5309_v44  ;;  %v3528_v50 = vpack.c.bf16 %v3520_v48, %v3512_v47  ;;  %v5343_v44 = vld [vmem:[#allocation8 + $0x180] sm:$0xff]   ;;  %v5345_v45 = vld [vmem:[#allocation8 + $0x188] sm:$0xff]   ;;  %v5347_v47 = vld [vmem:[#allocation8 + $0x190] sm:$0xff]  }
 0x273   : > { %5026 = vmatprep.subr.bf16.mxu0 %v5326_v42  ;;  %v5346_v42 = vld [vmem:[#allocation8 + $0x1d0] sm:$0xff]   ;;  %v5348_v48 = vld [vmem:[#allocation8 + $0x1d8] sm:$0xff]   ;;  %v5353_v49 = vld [vmem:[#allocation8 + $0x1a8] sm:$0xff]  }
 0x274   : > { %4086 = vmatprep.mubr.bf16.mxu0 %v3528_v50  ;;  %v5350_v50 = vld [vmem:[#allocation8 + $0x1e0] sm:$0xff]  }
 0x275   : > { %4087 = vmatmul.mubr.bf16.vlgmr.msra.gmra.mrb[8].mxu0 %v3527_v8  ;;  %v5349_v8 = vld [vmem:[#allocation8 + $0x198] sm:$0xff]  }
 0x276   : > { %5027 = vmatpush3.bf16.msra.mxu0 %v5327_v13  ;;  %v5352_v13 = vld [vmem:[#allocation8 + $0x1e8] sm:$0xff]  }
 0x277   : > { %5028 = vmatprep.subr.bf16.mxu0 %v5328_v51  ;;  %v5354_v51 = vld [vmem:[#allocation8 + $0x1f0] sm:$0xff]  }
 0x27a   : > { %v3158_v56 = vpop.f32.mrb[4].mxu1  ;;  %5029 = vmatpush3.bf16.msra.mxu0 %v5329_v53  ;;  %v5356_v53 = vld [vmem:[#allocation8 + $0x1f8] sm:$0xff]  }
 0x27b   : > { %v5107_v57 = vadd.f32 %v3158_v56, %v795_v52  ;;  %4901 = vmatmul.mubr.msk.bf16.vlgmr.msra.gmra.mrb[12].mxu1 %vm2819_vm0, %v5373_v58  ;;  %v3160_v59 = vpop.f32.mrb[5].mxu1  ;;  %5030 = vmatprep.subr.bf16.mxu0 %v5330_v54  ;;  %v806_v54 = vsub.s32 5, %v6029_v1 }
 0x27c   : > { %5005 = vmatpush3.bf16.msra.mxu1 %v5311_v46  ;;  %v5108_v61 = vadd.f32 %v3160_v59, %v799_v0  ;;  %v3162_v62 = vpop.f32.mrb[6].mxu1  ;;  %v5357_v46 = vld [vmem:[#allocation8 + $0x1b8] sm:$0xff]  }
 0x27d   : > { %v5109_v3 = vadd.f32 %v3162_v62, %v795_v52  ;;  %v3164_v4 = vpop.f32.mrb[7].mxu1  ;;  %5006 = vmatprep.subr.bf16.mxu1 %v5312_v55  ;;  %v3513_v9 = vmax.f32 %v5107_v57, 0.0  ;;  %v5355_v52 = vld [vmem:[#allocation8 + $0x1b0] sm:$0xff]   ;;  %v807_v56 = vrot.slane %v6032_v14, %v806_v54  ;;  %v5365_v54 = vld [vmem:[#allocation11 + $0x38] sm:$0xff]  }
 0x27e   : > { %v5110_v7 = vadd.f32 %v3164_v4, %v799_v0  ;;  %5031 = vmatpush3.bf16.msra.mxu0 %v5331_v60  ;;  %v3514_v15 = vmax.f32 %v5108_v61, 0.0  ;;  %v802_v0 = vsub.s32 4, %v6029_v1 }
 0x27f   : > { %v3521_v11 = vmax.f32 %v5109_v3, 0.0  ;;  %5032 = vmatprep.subr.bf16.mxu0 %v5332_v2 }
 0x280   : > { %v3522_v16 = vmax.f32 %v5110_v7, 0.0  ;;  %5007 = vmatpush3.bf16.msra.mxu1 %v5313_v63  ;;  %v803_v55 = vrot.slane %v6032_v14, %v802_v0  ;;  %v5364_v0 = vld [vmem:[#allocation11 + $0x30] sm:$0xff]  }
 0x281   : > { %v3529_v18 = vpack.c.bf16 %v3521_v11, %v3513_v9  ;;  %5008 = vmatprep.subr.bf16.mxu1 %v5314_v6 }
 0x282   : > { %v3530_v21 = vpack.c.bf16 %v3522_v16, %v3514_v15  ;;  %v6049_v22 = vpop.f32.mrb[8].mxu1  ;;  %5033 = vmatpush3.bf16.msra.mxu0 %v5333_v12 }
 0x283   : > { %v6051_v23 = vpop.f32.mrb[9].mxu1  ;;  %5034 = vmatprep.subr.bf16.mxu0 %v5334_v20 }
 0x284   : > { %5009 = vmatpush3.bf16.msra.mxu1 %v5315_v17  ;;  %v6053_v25 = vpop.f32.mrb[10].mxu1  ;;  %4127 = vmatprep.mubr.bf16.mxu1 %v3530_v21 }
 0x285   : > { %v6055_v27 = vpop.f32.mrb[11].mxu1  ;;  %5010 = vmatprep.subr.bf16.mxu1 %v5316_v19  ;;  %v814_v19 = vsub.s32 7, %v6029_v1 }
 0x286   : > { %5035 = vmatpush3.bf16.msra.mxu0 %v5335_v24 }
 0x287   : > { %5036 = vmatprep.subr.bf16.mxu0 %v5336_v37 }
 0x288   : > { %5011 = vmatpush3.bf16.msra.mxu1 %v5317_v26  ;;  %v815_v26 = vrot.slane %v6032_v14, %v814_v19 }
 0x289   : > { %5012 = vmatprep.subr.bf16.mxu1 %v5318_v28 }
 0x28a   : > { %5037 = vmatpush3.bf16.msra.mxu0 %v5337_v38 }
 0x28b   : > { %5038 = vmatprep.subr.bf16.mxu0 %v5338_v39 }
 0x28c   : > { %5013 = vmatpush3.bf16.msra.mxu1 %v5319_v29 }
 0x28d   : > { %5014 = vmatprep.subr.bf16.mxu1 %v5320_v31 }
 0x28e   : > { %5039 = vmatpush3.bf16.msra.mxu0 %v5339_v40 }
 0x28f   : > { %5040 = vmatprep.subr.bf16.mxu0 %v5340_v41 }
 0x290   : > { %5015 = vmatpush3.bf16.msra.mxu1 %v5321_v32 }
 0x291   : > { %5016 = vmatprep.subr.bf16.mxu1 %v5322_v33 }
 0x292   : > { %5041 = vmatpush3.bf16.msra.mxu0 %v5341_v34  ;;  %v4902_v34 = vld [vmem:[#allocation10] ss:$0 sm:$0xff] }
 0x294   : > { %5017 = vmatpush3.bf16.msra.mxu1 %v5323_v30 }
 0x295   : > { %5018 = vmatprep.subr.bf16.mxu1 %v5324_v35 }
 0x298   : > { %5019 = vmatpush3.bf16.msra.mxu1 %v5325_v36 }
 0x299   : > { %5048 = vmatprep.subr.bf16.mxu1 %v5342_v43 }
 0x29b   : > { %4128 = vmatmul.mubr.bf16.vlgmr.msra.gmra.mrb[16].mxu1 %v3529_v18  ;;  %v810_v18 = vsub.s32 6, %v6029_v1 }
 0x29c   : > { %5049 = vmatpush3.bf16.msra.mxu1 %v5343_v44 }
 0x29d   : > { %5050 = vmatprep.subr.bf16.mxu1 %v5344_v5  ;;  %v811_v24 = vrot.slane %v6032_v14, %v810_v18 }
 0x2a0   : > { %5051 = vmatpush3.bf16.msra.mxu1 %v5345_v45 }
 0x2a1   : > { %5052 = vmatprep.subr.bf16.mxu1 %v5346_v42 }
 0x2a4   : > { %5053 = vmatpush3.bf16.msra.mxu1 %v5347_v47 }
 0x2a5   : > { %5054 = vmatprep.subr.bf16.mxu1 %v5348_v48 }
 0x2a8   : > { %5055 = vmatpush3.bf16.msra.mxu1 %v5349_v8 }
 0x2a9   : > { %5056 = vmatprep.subr.bf16.mxu1 %v5350_v50 }
 0x2ac   : > { %5057 = vmatpush3.bf16.msra.mxu1 %v5351_v10  ;;  %v5358_v10 = vld [vmem:[#allocation11] sm:$0xff]  }
 0x2ad   : > { %5058 = vmatprep.subr.bf16.mxu1 %v5352_v13  ;;  %v5666_v13 = vmov 0.0  }
 0x2ae   : > { %5079 = vmatprep.subr.bf16.mxu0 %v5666_v13 }
 0x2b0   : > { %5059 = vmatpush3.bf16.msra.mxu1 %v5353_v49  ;;  %v5359_v49 = vld [vmem:[#allocation11 + $0x8] sm:$0xff]  }
 0x2b1   : > { %5060 = vmatprep.subr.bf16.mxu1 %v5354_v51  ;;  %v5360_v51 = vld [vmem:[#allocation11 + $0x10] sm:$0xff]  }
 0x2b4   : > { %5061 = vmatpush3.bf16.msra.mxu1 %v5355_v52  ;;  %v5361_v52 = vld [vmem:[#allocation11 + $0x18] sm:$0xff]  }
 0x2b5   : > { %5062 = vmatprep.subr.bf16.mxu1 %v5356_v53  ;;  %v5362_v53 = vld [vmem:[#allocation11 + $0x20] sm:$0xff]  }
 0x2b8   : > { %5063 = vmatpush3.bf16.msra.mxu1 %v5357_v46  ;;  %v5363_v46 = vld [vmem:[#allocation11 + $0x28] sm:$0xff]  }
 0x328   : > { %v3287_v57 = vpop.f32.mrb[4].mxu0 }
 0x329   : > { %v5111_v58 = vadd.f32 %v3287_v57, %v803_v55  ;;  %v3289_v59 = vpop.f32.mrb[5].mxu0 }
 0x32a   : > { %v5113_v60 = vadd.f32 %v3289_v59, %v807_v56  ;;  %v3291_v61 = vpop.f32.mrb[6].mxu0 }
 0x32b   : > { %v5112_v62 = vadd.f32 %v5111_v58, %v6049_v22  ;;  %v5115_v63 = vadd.f32 %v3291_v61, %v803_v55  ;;  %v3293_v2 = vpop.f32.mrb[7].mxu0 }
 0x32c   : > { %v5114_v3 = vadd.f32 %v5113_v60, %v6051_v23  ;;  %v5117_v4 = vadd.f32 %v3293_v2, %v807_v56 }
 0x32d   : > { %v5116_v6 = vadd.f32 %v5115_v63, %v6053_v25  ;;  %v3515_v9 = vmax.f32 %v5112_v62, 0.0 }
 0x32e   : > { %v5118_v7 = vadd.f32 %v5117_v4, %v6055_v27  ;;  %v3516_v12 = vmax.f32 %v5114_v3, 0.0 }
 0x32f   : > { %v3523_v11 = vmax.f32 %v5116_v6, 0.0 }
 0x330   : > { %v3524_v15 = vmax.f32 %v5118_v7, 0.0 }
 0x331   : > { %v3531_v16 = vpack.c.bf16 %v3523_v11, %v3515_v9 }
 0x332   : > { %v3532_v17 = vpack.c.bf16 %v3524_v15, %v3516_v12 }
 0x334   : > { %4168 = vmatprep.mubr.bf16.mxu0 %v3532_v17  ;;  %v4967_v17 = vld [vmem:[#allocation13] ss:$0 sm:$0xff] }
 0x335   : > { %4169 = vmatmul.mubr.bf16.vlgmr.msra.gmra.mrb[12].mxu0 %v3531_v16 }
 0x336   : > { %5080 = vmatpush3.bf16.msra.mxu0 %v5358_v10  ;;  %5095 = vmatprep.mubr.msk.bf16.mxu0 %vm5667_vm1, %v5666_v13 }
 0x337   : > { %5081 = vmatprep.subr.bf16.mxu0 %v5666_v13 }
 0x33a   : > { %5082 = vmatpush3.bf16.msra.mxu0 %v5359_v49 }
 0x33b   : > { %5083 = vmatprep.subr.bf16.mxu0 %v5666_v13 }
 0x33e   : > { %5084 = vmatpush3.bf16.msra.mxu0 %v5360_v51 }
 0x33f   : > { %5085 = vmatprep.subr.bf16.mxu0 %v5666_v13 }
 0x342   : > { %5086 = vmatpush3.bf16.msra.mxu0 %v5361_v52 }
 0x343   : > { %5087 = vmatprep.subr.bf16.mxu0 %v5666_v13 }
 0x346   : > { %5088 = vmatpush3.bf16.msra.mxu0 %v5362_v53 }
 0x347   : > { %5089 = vmatprep.subr.bf16.mxu0 %v5666_v13 }
 0x348   : > { %v4998_v20 = vpop.f32.mrb[8].mxu0 }
 0x349   : > { %v4999_v21 = vpop.f32.mrb[9].mxu0 }
 0x34a   : > { %v5000_v22 = vadd.f32 %v4999_v21, %v4998_v20  ;;  %v5001_v23 = vpop.f32.mrb[10].mxu0  ;;  %5090 = vmatpush3.bf16.msra.mxu0 %v5363_v46 }
 0x34b   : > { %v5002_v25 = vpop.f32.mrb[11].mxu0  ;;  %5091 = vmatprep.subr.bf16.mxu0 %v5666_v13 }
 0x34c   : > { %v5003_v27 = vadd.f32 %v5002_v25, %v5001_v23  ;;  %v4089_v44 = vadd.f32 %v5000_v22, %v4902_v34 }
 0x34e   : > { %v3502_v28 = vpop.f32.mrb[12].mxu1  ;;  %v4092_v47 = vadd.f32 %v5003_v27, %v4902_v34  ;;  %5092 = vmatpush3.bf16.msra.mxu0 %v5364_v0 }
 0x34f   : > { %v5119_v29 = vadd.f32 %v3502_v28, %v811_v24  ;;  %v3504_v31 = vpop.f32.mrb[13].mxu1  ;;  %5093 = vmatprep.subr.bf16.mxu0 %v5666_v13 }
 0x350   : > { %v5120_v32 = vadd.f32 %v3504_v31, %v815_v26  ;;  %v3506_v33 = vpop.f32.mrb[14].mxu1 }
 0x351   : > { %v5121_v30 = vadd.f32 %v3506_v33, %v811_v24  ;;  %v3508_v35 = vpop.f32.mrb[15].mxu1  ;;  %v3517_v37 = vmax.f32 %v5119_v29, 0.0 }
 0x352   : > { %v5122_v36 = vadd.f32 %v3508_v35, %v815_v26  ;;  %v3518_v38 = vmax.f32 %v5120_v32, 0.0  ;;  %5094 = vmatpush3.bf16.msra.mxu0 %v5365_v54 }
 0x353   : > { %v3525_v1 = vmax.f32 %v5121_v30, 0.0 }
 0x354   : > { %v3526_v39 = vmax.f32 %v5122_v36, 0.0 }
 0x355   : > { %v3533_v40 = vpack.c.bf16 %v3525_v1, %v3517_v37 }
 0x356   : > { %v3534_v41 = vpack.c.bf16 %v3526_v39, %v3518_v38 }
 0x358   : > { %4209 = vmatprep.mubr.bf16.mxu1 %v3534_v41 }
 0x359   : > { %4210 = vmatmul.mubr.bf16.vlgmr.msra.gmra.mrb[20].mxu1 %v3533_v40 }
 0x36e   : > { %v5020_v43 = vpop.f32.mrb[16].mxu1 }
 0x36f   : > { %v5021_v14 = vpop.f32.mrb[17].mxu1 }
 0x370   : > { %v5022_v5 = vadd.f32 %v5021_v14, %v5020_v43  ;;  %v5023_v45 = vpop.f32.mrb[18].mxu1 }
 0x371   : > { %v5024_v42 = vpop.f32.mrb[19].mxu1 }
 0x372   : > { %v4130_v48 = vadd.f32 %v5022_v5, %v4089_v44  ;;  %v5025_v8 = vadd.f32 %v5024_v42, %v5023_v45 }
 0x374   : > { %v4133_v50 = vadd.f32 %v5025_v8, %v4092_v47 }
 0x408   : > { %v5042_v55 = vpop.f32.mrb[12].mxu0 }
 0x409   : > { %v5043_v56 = vpop.f32.mrb[13].mxu0 }
 0x40a   : > { %v5044_v57 = vadd.f32 %v5043_v56, %v5042_v55  ;;  %v5045_v58 = vpop.f32.mrb[14].mxu0 }
 0x40b   : > { %v5046_v59 = vpop.f32.mrb[15].mxu0 }
 0x40c   : > { %v4171_v60 = vadd.f32 %v5044_v57, %v4130_v48  ;;  %v5047_v61 = vadd.f32 %v5046_v59, %v5045_v58 }
 0x40e   : > { %v4174_v62 = vadd.f32 %v5047_v61, %v4133_v50 }
 0x42c   : > { %v5064_v63 = vpop.f32.mrb[20].mxu1 }
 0x42d   : > { %v5065_v2 = vpop.f32.mrb[21].mxu1 }
 0x42e   : > { %v5066_v3 = vadd.f32 %v5065_v2, %v5064_v63  ;;  %v5067_v4 = vpop.f32.mrb[22].mxu1 }
 0x42f   : > { %v5068_v6 = vpop.f32.mrb[23].mxu1 }
 0x430   : > { %v4212_v7 = vadd.f32 %v5066_v3, %v4171_v60  ;;  %v5069_v9 = vadd.f32 %v5068_v6, %v5067_v4 }
 0x432   : > { %v4215_v11 = vadd.f32 %v5069_v9, %v4174_v62  ;;  %v4218_v12 = vmax.f32 %v4212_v7, 0.0 }
 0x434   : > { %v4219_v15 = vmax.f32 %v4215_v11, 0.0 }
 0x436   : > { %v4220_v16 = vpack.c.bf16 %v4219_v15, %v4218_v12 }
 0x438   : > { %5096 = vmatmul.mubr.bf16.vlgmr.msra.gmra.mrb[16].mxu0 %v4220_v16 }
 0x50b   : > { %v4326_v18 = vpop.f32.mrb[16].mxu0 }
 0x50c   : > { %v4327_v19 = vadd.f32 %v4967_v17, %v4326_v18  ;;  %v5097_v20 = vpop.f32.mrb[17].mxu0 }
 0x50d   : > { %v4329_v21 = vpop.f32.mrb[18].mxu0 }
 0x50e   : > { %4333 = vst [vmem:[%s378_s23] sm:$0xff] %v4327_v19  ;;  %v4330_v22 = vadd.f32 %v4967_v17, %v4329_v21  ;;  %v5098_v23 = vpop.f32.mrb[19].mxu0 }
 0x510   : > { %4334 = vst [vmem:[%s378_s23 + $0x8] sm:$0xff] %v4330_v22 }
 0x511   : > { %5585 = shalt.err (!%p5582_p8)
}
 0x512   : > { %s5586_s17 = scalar_lea.hbm %s6076_s12, 256  ;;  %s5590_s8 = scalar_lea.hbm %s6127_s7, 512 }
 0x513   : > { %p5587_p7 = scmp.ne.s32.totalorder %s6076_s12, %s5586_s17  ;;  %p5591_p3 = scmp.lt.u32.totalorder %s6076_s12, %s6127_s7 }
 0x514   : > { %p5592_p6 = scmp.lt.u32.totalorder %s5590_s8, %s5586_s17  ;;  %p5594_p0 = scmp.lt.u32.totalorder %s5586_s17, %s6076_s12 }
 0x515   : > { %p5588_p9 = pnand %p5587_p7, %p6148_p5 }
 0x516   : > { %p5593_p2 = por %p5592_p6, %p5591_p3 }
 0x517   : > { %p5589_p4 = pneg %p5588_p9 }
 0x518   : > { %p5595_p10 = por %p5594_p0, %p5593_p2 }
 0x51a   : > { %p5596_p1 = pnand %p5595_p10, %p5589_p4 }
 0x51c   : > { %5599 = shalt.err (!%p5596_p1)
}
 0x51d   : > { %s5669_s9 = smov 128   ;;  %s5670_s19 = smov 8  }
 0x51e   : > { %5192 = dma.vmem_to_hbm [thread:$0]  (%p6148_p5), %s6071_s16, 256, %s6076_s12, %s4336_s20, %s5669_s9, %s5669_s9, %s5670_s19  }
 0x51f PF: > { %s4364_s30 = sand.u32 1, %s5638_s24   ;;  %p6149_p11 = scmp.ne.s32.totalorder %s6139_s28, 0 }
 0x520   : > { %p6150_p12 = scmp.ge.s32.totalorder %s5650_s27, 2  ;;  %s4365_s1 = scalar_lea.sflag [#allocation4], %s4364_s30 }
 0x522   : > { %p5218_p13 = pnand %p6150_p12, %p6149_p11 }
 0x524   : > { %5633 = dma.done.wait (!%p5218_p13), %s4365_s1, 256  }
 0x525   : > { %5635 = vsyncadd (!%p5218_p13), %s4365_s1, 4294967040  ;;  %p23_p8 = scmp.ge.s32.totalorder %s5883_s11, 4   ;;  %s6151_s24 = smov %s5642_s25 }
 0x526   : > { %s6152_s25 = smov %s5646_s26  ;;  %s6153_s26 = smov %s5894_s13 }
 0x527   : > { %s6154_s27 = smov %s5883_s11  ;;  %25 = sbr.rel (!%p23_p8) target bundleno = 10 (0xa), region = 117 }
 0x52e   :  { %4370 = vsyncpa [#allocation3], 1 }
 0x52f   :  { %4372 = vsyncpa [#allocation3 + $0x1], 1 }
 0x530   :  { %4373 = vsyncpa [#allocation6], 1 }
 0x531   :  { %4374 = vsyncpa [#allocation9], 1 }
 0x532   :  { %4375 = vsyncpa [#allocation12], 1 }
 0x533   :  { %4376 = vsyncpa [#allocation4], 1 }
 0x534   :  { %4378 = vsyncpa [#allocation4 + $0x1], 1 }

// kernel: tpu_custom_call.1
= control target key start
LH: loop header
LB: loop body
LE: loop exit
PB: predicated region body
PF: predicated region fallthrough
CT: control target
= control target key end

     0   :  { %s6120_s0 = inlined_call_operand.hbm [shape: bf16[30,784], index: 0, kind: input, shape index: {}]   ;;  %s6121_s1 = inlined_call_operand.hbm [shape: bf16[784,1024], index: 1, kind: input, shape index: {}]   ;;  %s6122_s2 = inlined_call_operand.hbm [shape: f32[1,1024], index: 2, kind: input, shape index: {}]   ;;  %s6123_s3 = inlined_call_operand.hbm [shape: bf16[1024,128], index: 3, kind: input, shape index: {}]   ;;  %s6124_s4 = inlined_call_operand.hbm [shape: f32[1,128], index: 4, kind: input, shape index: {}]   ;;  %s6125_s5 = inlined_call_operand.hbm [shape: bf16[128,128], index: 5, kind: input, shape index: {}]   ;;  %s6126_s6 = inlined_call_operand.hbm [shape: f32[1,128], index: 6, kind: input, shape index: {}]   ;;  %s6127_s7 = inlined_call_operand.hbm [shape: f32[30,128], index: 7, kind: output, shape index: {}]  }
   0x1   :  { %6131 = sst [smem:[#allocation20_spill]] %s6121_s1 }
   0x2   :  { %12 = vsyncpa [#allocation3], 0 }
   0x3   :  { %14 = vsyncpa [#allocation3 + $0x1], 0 }
   0x4   :  { %15 = vsyncpa [#allocation6], 0 }
   0x5   :  { %16 = vsyncpa [#allocation9], 0 }
   0x6   :  { %17 = vsyncpa [#allocation12], 0 }
   0x7   :  { %18 = vsyncpa [#allocation4], 0 }
   0x8   :  { %20 = vsyncpa [#allocation4 + $0x1], 0  ;;  %s5711_s24 = smov 0   ;;  %s5713_s25 = smov 0  }
   0x9   :  { %s5715_s26 = smov 0   ;;  %s5717_s27 = smov 0  }
   0xa LB: > { %s5652_s28 = smov [#allocation5]   ;;  %s5732_s30 = sadd.s32 4294967295, %s5650_s27   ;;  %s5650_s27 = sphi %s5717_s27, %s6154_s27   ;;  %s5646_s26 = sphi %s5715_s26, %s6153_s26   ;;  %s5642_s25 = sphi %s5713_s25, %s6152_s25   ;;  %s5638_s24 = sphi %s5711_s24, %s6151_s24  }
   0xb   : > { %s221_s29 = sshll.u32 %s5652_s28, 4  ;;  %p4480_p0 = scmp.ge.s32.totalorder %s5650_s27, 1  ;;  %s5737_s29 = int_to_ptr.vmem [resolvable:$true] %s221_s29 }
   0xc   : > { %p6128_p1 = scmp.eq.s32.totalorder %s5732_s30, 0  ;;  %p209_p2 = scmp.lt.s32.totalorder %s5650_s27, 3 }
   0xd   : > { %s5653_s9 = smov [#allocation8]   ;;  %s5654_s12 = smov [#allocation11]  }
   0xe   : > { %p5739_p3 = pnand %p4480_p0, %p209_p2  ;;  %s245_s10 = sshll.u32 %s5653_s9, 4  ;;  %s5752_s10 = int_to_ptr.vmem [resolvable:$true] %s245_s10 }
   0xf   : > { %s5754_s13 = sshll.u32 %s5654_s12, 4  ;;  %s6134_s1 = sld [smem:[#allocation20_spill]]  ;;  %s270_s13 = int_to_ptr.vmem [resolvable:$true] %s5754_s13 }
  0x10   : > { %s6132_s8 = scalar_select %p5739_p3, 1, 0 }
  0x11   : > { %p5194_p5 = pneg %p5739_p3 }
  0x13   : > { %p5748_p6 = pnand %p5194_p5, %p6128_p1 }
  0x15   : > { %s5374_s16 = scalar_lea.hbm %s6134_s1, 50176  ;;  %p5764_p8 = pneg %p5748_p6 }
  0x16   : > { %p5375_p7 = scmp.ne.s32.totalorder %s6134_s1, %s5374_s16  ;;  %p5381_p11 = scmp.lt.u32.totalorder %s5374_s16, %s6134_s1 }
  0x18   : > { %p5377_p9 = pnand %p5764_p8, %p5375_p7 }
  0x1a   : > { %p5378_p10 = pneg %p5377_p9 }
  0x1c   : > { %p5383_p12 = pnand %p5381_p11, %p5378_p10 }
  0x1e   : > { %5386 = shalt.err (!%p5383_p12)
}
  0x1f   : > { %s5387_s22 = scalar_lea.vmem %s5737_s29, 50176  ;;  %p5395_p5 = scmp.lt.s32.totalorder %s5737_s29, %s5737_s29 }
  0x20   : > { %p5388_p13 = scmp.ne.s32.totalorder %s5737_s29, %s5387_s22  ;;  %p5396_p4 = scmp.lt.s32.totalorder %s5387_s22, %s5387_s22 }
  0x22   : > { %p5390_p0 = pnand %p5388_p13, %p5764_p8  ;;  %p5397_p7 = por %p5396_p4, %p5395_p5 }
  0x24   : > { %p5391_p2 = pneg %p5390_p0 }
  0x26   : > { %p5398_p9 = pnand %p5397_p7, %p5391_p2 }
  0x28   : > { %5401 = shalt.err (!%p5398_p9)
}
  0x29   : > { %s5655_s23 = smov 512   ;;  %s5656_s28 = smov 32  }
  0x2a   : > { %5197 = dma.hbm_to_vmem [thread:$0]  (!%p5748_p6), %s6134_s1, 50176, %s5737_s29, [#allocation6], %s5655_s23, %s5655_s23, %s5656_s28  }
  0x2b   : > { %s5402_s16 = scalar_lea.hbm %s6123_s3, 8192 }
  0x2c   : > { %p5403_p4 = scmp.ne.s32.totalorder %s6123_s3, %s5402_s16  ;;  %p5409_p12 = scmp.lt.u32.totalorder %s5402_s16, %s6123_s3 }
  0x2e   : > { %p5405_p10 = pnand %p5403_p4, %p5764_p8 }
  0x30   : > { %p5406_p11 = pneg %p5405_p10 }
  0x32   : > { %p5411_p13 = pnand %p5409_p12, %p5406_p11 }
  0x34   : > { %5414 = shalt.err (!%p5411_p13)
}
  0x35   : > { %s5415_s29 = scalar_lea.vmem %s5752_s10, 8192  ;;  %p5423_p7 = scmp.lt.s32.totalorder %s5752_s10, %s5752_s10 }
  0x36   : > { %p5416_p0 = scmp.ne.s32.totalorder %s5752_s10, %s5415_s29  ;;  %p5424_p9 = scmp.lt.s32.totalorder %s5415_s29, %s5415_s29 }
  0x38   : > { %p5418_p2 = pnand %p5416_p0, %p5764_p8  ;;  %p5425_p4 = por %p5424_p9, %p5423_p7 }
  0x3a   : > { %p5419_p5 = pneg %p5418_p2 }
  0x3c   : > { %p5426_p10 = pnand %p5425_p4, %p5419_p5 }
  0x3e   : > { %5429 = shalt.err (!%p5426_p10)
}
  0x3f   : > { %s5657_s22 = smov 64   ;;  %s5658_s23 = smov 4  }
  0x40   : > { %5203 = dma.hbm_to_vmem [thread:$0]  (!%p5748_p6), %s6123_s3, 8192, %s5752_s10, [#allocation9], %s5657_s22, %s5657_s22, %s5658_s23  }
  0x41   : > { %s5430_s15 = scalar_lea.hbm %s6125_s5, 1024 }
  0x42   : > { %p5431_p11 = scmp.ne.s32.totalorder %s6125_s5, %s5430_s15  ;;  %p5437_p0 = scmp.lt.u32.totalorder %s5430_s15, %s6125_s5 }
  0x44   : > { %p5433_p12 = pnand %p5431_p11, %p5764_p8 }
  0x46   : > { %p5434_p13 = pneg %p5433_p12 }
  0x48   : > { %p5439_p2 = pnand %p5437_p0, %p5434_p13 }
  0x4a   : > { %5442 = shalt.err (!%p5439_p2)
}
  0x4b   : > { %s5443_s21 = scalar_lea.vmem %s270_s13, 1024  ;;  %p5451_p4 = scmp.lt.s32.totalorder %s270_s13, %s270_s13 }
  0x4c   : > { %p5444_p5 = scmp.ne.s32.totalorder %s270_s13, %s5443_s21  ;;  %p5452_p10 = scmp.lt.s32.totalorder %s5443_s21, %s5443_s21 }
  0x4e   : > { %p5446_p7 = pnand %p5444_p5, %p5764_p8  ;;  %p5453_p1 = por %p5452_p10, %p5451_p4 }
  0x50   : > { %p5447_p9 = pneg %p5446_p7 }
  0x52   : > { %p5454_p3 = pnand %p5453_p1, %p5447_p9 }
  0x54   : > { %5457 = shalt.err (!%p5454_p3)
}
  0x55   : > { %5209 = dma.hbm_to_vmem [thread:$0]  (!%p5748_p6), %s6125_s5, 1024, %s270_s13, [#allocation12], %s5657_s22, %s5657_s22, %s5658_s23  }
  0x56   : > { %s5659_s28 = smov [#allocation7]   ;;  %s5660_s12 = smov [#allocation10]  }
  0x57   : > { %s235_s9 = sshll.u32 %s5659_s28, 4  ;;  %s259_s14 = sshll.u32 %s5660_s12, 4  ;;  %s236_s9 = int_to_ptr.vmem [resolvable:$true] %s235_s9  ;;  %s260_s14 = int_to_ptr.vmem [resolvable:$true] %s259_s14 }
  0x58   : > { %s5458_s17 = scalar_lea.hbm %s6122_s2, 128 }
  0x59   : > { %p5459_p1 = scmp.ne.s32.totalorder %s6122_s2, %s5458_s17  ;;  %p5465_p12 = scmp.lt.u32.totalorder %s5458_s17, %s6122_s2 }
  0x5b   : > { %p5461_p3 = pnand %p5459_p1, %p5764_p8 }
  0x5d   : > { %p5462_p11 = pneg %p5461_p3 }
  0x5f   : > { %p5467_p13 = pnand %p5465_p12, %p5462_p11 }
  0x61   : > { %5470 = shalt.err (!%p5467_p13)
}
  0x62   : > { %s5471_s13 = scalar_lea.vmem %s236_s9, 128  ;;  %p5479_p7 = scmp.lt.s32.totalorder %s236_s9, %s236_s9 }
  0x63   : > { %p5472_p0 = scmp.ne.s32.totalorder %s236_s9, %s5471_s13  ;;  %p5480_p9 = scmp.lt.s32.totalorder %s5471_s13, %s5471_s13 }
  0x65   : > { %p5474_p2 = pnand %p5472_p0, %p5764_p8  ;;  %p5481_p4 = por %p5480_p9, %p5479_p7 }
  0x67   : > { %p5475_p5 = pneg %p5474_p2 }
  0x69   : > { %p5482_p10 = pnand %p5481_p4, %p5475_p5 }
  0x6b   : > { %5485 = shalt.err (!%p5482_p10)
}
  0x6c   : > { %5200 = dma.hbm_to_vmem [thread:$0]  (!%p5748_p6), %s6122_s2, 128, %s236_s9, [#allocation6]  }
  0x6d   : > { %s5486_s12 = scalar_lea.hbm %s6124_s4, 16 }
  0x6e   : > { %p5487_p1 = scmp.ne.s32.totalorder %s6124_s4, %s5486_s12  ;;  %p5493_p12 = scmp.lt.u32.totalorder %s5486_s12, %s6124_s4 }
  0x70   : > { %p5489_p3 = pnand %p5487_p1, %p5764_p8 }
  0x72   : > { %p5490_p11 = pneg %p5489_p3 }
  0x74   : > { %p5495_p13 = pnand %p5493_p12, %p5490_p11 }
  0x76   : > { %5498 = shalt.err (!%p5495_p13)
}
  0x77   : > { %s5499_s20 = scalar_lea.vmem %s260_s14, 16  ;;  %s5506_s9 = scalar_lea.vmem %s260_s14, 32 }
  0x78   : > { %p5500_p0 = scmp.ne.s32.totalorder %s260_s14, %s5499_s20  ;;  %p5507_p7 = scmp.lt.s32.totalorder %s260_s14, %s260_s14 }
  0x79   : > { %p5508_p9 = scmp.lt.s32.totalorder %s5506_s9, %s5499_s20 }
  0x7a   : > { %p5502_p2 = pnand %p5500_p0, %p5764_p8 }
  0x7b   : > { %p5509_p4 = por %p5508_p9, %p5507_p7 }
  0x7c   : > { %p5503_p5 = pneg %p5502_p2 }
  0x7e   : > { %p5510_p10 = pnand %p5509_p4, %p5503_p5 }
  0x80   : > { %5513 = shalt.err (!%p5510_p10)
}
  0x81   : > { %5206 = dma.hbm_to_vmem [thread:$0]  (!%p5748_p6), %s6124_s4, 16, %s260_s14, [#allocation9]  }
  0x82   : > { %s5661_s13 = smov [#allocation13]   ;;  %s5514_s28 = scalar_lea.hbm %s6126_s6, 16 }
  0x83   : > { %s283_s22 = sshll.u32 %s5661_s13, 4  ;;  %p5515_p1 = scmp.ne.s32.totalorder %s6126_s6, %s5514_s28  ;;  %s284_s22 = int_to_ptr.vmem [resolvable:$true] %s283_s22 }
  0x84   : > { %p5521_p12 = scmp.lt.u32.totalorder %s5514_s28, %s6126_s6 }
  0x85   : > { %p5517_p3 = pnand %p5515_p1, %p5764_p8 }
  0x87   : > { %p5518_p11 = pneg %p5517_p3 }
  0x89   : > { %p5523_p13 = pnand %p5521_p12, %p5518_p11 }
  0x8b   : > { %5526 = shalt.err (!%p5523_p13)
}
  0x8c   : > { %s5527_s14 = scalar_lea.vmem %s284_s22, 16  ;;  %s5534_s18 = scalar_lea.vmem %s284_s22, 32 }
  0x8d   : > { %p5528_p0 = scmp.ne.s32.totalorder %s284_s22, %s5527_s14  ;;  %p5535_p7 = scmp.lt.s32.totalorder %s284_s22, %s284_s22 }
  0x8e   : > { %p5536_p9 = scmp.lt.s32.totalorder %s5534_s18, %s5527_s14 }
  0x8f   : > { %p5530_p2 = pnand %p5528_p0, %p5764_p8 }
  0x90   : > { %p5537_p4 = por %p5536_p9, %p5535_p7 }
  0x91   : > { %p5531_p5 = pneg %p5530_p2 }
  0x93   : > { %p5538_p10 = pnand %p5537_p4, %p5531_p5 }
  0x95   : > { %5541 = shalt.err (!%p5538_p10)
}
  0x96   : > { %5212 = dma.hbm_to_vmem [thread:$0]  (!%p5748_p6), %s6126_s6, 16, %s284_s22, [#allocation12]  }
  0x97   : > { %s4479_s19 = sadd.s32 4294967294, %s5650_s27   ;;  %s5883_s11 = sadd.s32 1, %s5650_s27  }
  0x98   : > { %s30_s21 = ssub.s32 %s5650_s27, %s5883_s11  ;;  %s33_s10 = sadd.s32 1, %s5646_s26 }
  0x99   : > { %p31_p8 = scmp.eq.s32.totalorder %s30_s21, 0  ;;  %p40_p1 = scmp.ne.s32.totalorder %s5646_s26, %s5642_s25 }
  0x9a   : > { %p41_p3 = scmp.eq.s32.totalorder %s5650_s27, 0  ;;  %p46_p11 = scmp.ne.s32.totalorder %s5642_s25, %s5638_s24 }
  0x9b   : > { %s5894_s13 = scalar_select %p31_p8, %s5646_s26, %s33_s10  }
  0x9c   : > { %p42_p12 = por %p41_p3, %p40_p1  ;;  %p6136_p13 = scmp.eq.s32.totalorder %s5732_s30, 0 }
  0x9d   : > { %p196_p6 = scmp.eq.s32.totalorder %s5732_s30, 1  ;;  %p202_p2 = scmp.eq.s32.totalorder %s4479_s19, 1 }
  0x9e   : > { %p5898_p0 = por %p6136_p13, %p46_p11  ;;  %p5227_p5 = scmp.lt.s32.totalorder %s5650_s27, 2 }
  0x9f   : > { %s294_s22 = sand.u32 1, %s5646_s26   ;;  %p5905_p7 = por %p196_p6, %p40_p1 }
  0xa0   : > { %p5909_p9 = por %p202_p2, %p46_p11  ;;  %s5163_s12 = smul.u32 56, %s294_s22 }
  0xa1   : > { %s6138_s29 = scalar_select %p5905_p7, 1, 0 }
  0xa2   : > { %s6139_s28 = scalar_select %p5909_p9, 1, 0 }
  0xa3   : > { %s5164_s15 = smul.u32 896, %s5650_s27  ;;  %p5914_p4 = pnand %p5227_p5, %p42_p12 }
  0xa4   : > { %s298_s20 = scalar_lea.vmem [#allocation2], %s5163_s12  ;;  %s5925_s19 = scalar_lea.sflag [#allocation3], %s294_s22 }
  0xa5   : > { %s5921_s18 = scalar_lea.hbm %s6120_s0, %s5164_s15  ;;  %s306_s9 = sshll.u32 %s298_s20, 4  ;;  %s5923_s9 = int_to_ptr.vmem [resolvable:$true] %s306_s9 }
  0xa6   : > { %s5542_s21 = scalar_lea.hbm %s5921_s18, 896  ;;  %p5544_p8 = pneg %p5914_p4 }
  0xa7   : > { %p5543_p10 = scmp.ne.s32.totalorder %s5921_s18, %s5542_s21  ;;  %s5547_s17 = scalar_lea.hbm %s6120_s0, 1792 }
  0xa8   : > { %p5548_p11 = scmp.lt.u32.totalorder %s5921_s18, %s6120_s0  ;;  %p5549_p12 = scmp.lt.u32.totalorder %s5547_s17, %s5542_s21 }
  0xa9   : > { %p5545_p1 = pnand %p5544_p8, %p5543_p10  ;;  %p5551_p6 = scmp.lt.u32.totalorder %s5542_s21, %s5921_s18 }
  0xaa   : > { %p5550_p13 = por %p5549_p12, %p5548_p11 }
  0xab   : > { %p5546_p3 = pneg %p5545_p1 }
  0xac   : > { %p5552_p2 = por %p5551_p6, %p5550_p13 }
  0xae   : > { %p5553_p5 = pnand %p5552_p2, %p5546_p3 }
  0xb0   : > { %5556 = shalt.err (!%p5553_p5)
}
  0xb1   : > { %s5557_s22 = scalar_lea.vmem %s5923_s9, 896  ;;  %s5662_s12 = smov [#allocation2]  }
  0xb2   : > { %p5558_p10 = scmp.ne.s32.totalorder %s5923_s9, %s5557_s22  ;;  %s5562_s20 = sshll.u32 %s5662_s12, 4  ;;  %s5563_s20 = int_to_ptr.vmem [resolvable:$false] %s5562_s20 }
  0xb3   : > { %s5564_s1 = scalar_lea.vmem %s5563_s20, 1792  ;;  %p5565_p7 = scmp.lt.s32.totalorder %s5923_s9, %s5563_s20 }
  0xb4   : > { %p5560_p1 = pnand %p5558_p10, %p5544_p8  ;;  %p5566_p11 = scmp.lt.s32.totalorder %s5564_s1, %s5557_s22 }
  0xb6   : > { %p5561_p9 = pneg %p5560_p1  ;;  %p5567_p12 = por %p5566_p11, %p5565_p7 }
  0xb8   : > { %p5568_p13 = pnand %p5567_p12, %p5561_p9 }
  0xba   : > { %5571 = shalt.err (!%p5568_p13)
}
  0xbb   : > { %s5663_s21 = smov 448   ;;  %s5664_s10 = smov 28  }
  0xbc   : > { %5216 = dma.hbm_to_vmem [thread:$0]  (!%p5914_p4), %s5921_s18, 896, %s5923_s9, %s5925_s19, %s5663_s21, %s5663_s21, %s5664_s10  }
  0xbd   : > { %p6141_p8 = scmp.ne.s32.totalorder %s6132_s8, 0 }
  0xbe   : > { %s5956_s15 = sand.u32 (!%p6141_p8), 1, %s5642_s25  }
  0xbf   : > { %318 = sbr.rel (%p6141_p8) target bundleno = 1311 (0x51f), region = 48  ;;  %s321_s14 = scalar_lea.sflag (!%p6141_p8), [#allocation3], %s5956_s15 }
  0xc0   : > { %s5165_s17 = smul.u32 (!%p6141_p8), 56, %s5956_s15 }
  0xc2   : > { %s5960_s22 = scalar_lea.vmem (!%p6141_p8), [#allocation2], %s5165_s17 }
  0xc6   : > { %5617 = dma.done.wait (%p5898_p0), %s321_s14, 896  }
  0xc7   : > { %5619 = vsyncadd (%p5898_p0), %s321_s14, 4294966400  ;;  %p6142_p7 = scmp.eq.s32.totalorder %s5732_s30, 0 }
  0xc9   : > { %5621 = dma.done.wait (%p6142_p7), [#allocation6], 50304   ;;  %p6143_p9 = pmov %p6142_p7 }
  0xca   : > { %p6144_p4 = pmov %p6142_p7 }
  0xcb   : > { %5623 = vsyncadd (%p6143_p9), [#allocation6], 4294916992 }
  0xcc   : > { %5625 = dma.done.wait (%p6144_p4), [#allocation9], 8208   ;;  %p6145_p3 = pmov %p6144_p4 }
  0xce   : > { %5627 = vsyncadd (%p6145_p3), [#allocation9], 4294959088  ;;  %p6146_p6 = pmov %p6145_p3 }
  0xcf   : > { %p6147_p2 = pmov %p6145_p3 }
  0xd0   : > { %5629 = dma.done.wait (%p6146_p6), [#allocation12], 1040  }
  0xd1   : > { %5631 = vsyncadd (%p6147_p2), [#allocation12], 4294966256  ;;  %v5665_v0 = vmov 0   ;;  %v390_v1 = vld [vmem:[#allocation5] sm:$0xff]  ;;  %v391_v13 = vld [vmem:[#allocation5 + $0x8] sm:$0xff]  ;;  %vm2819_vm0 = vcmask 130048  }
  0xd2   : > { %2984 = vmatprep.mubr.bf16.mxu1 %v5665_v0  ;;  %v394_v2 = vld [vmem:[#allocation5 + $0x20] sm:$0xff]  ;;  %v395_v14 = vld [vmem:[#allocation5 + $0x28] sm:$0xff]  ;;  %vm5667_vm1 = vmmov 0   ;;  %s4498_s8 = sshll.u32 %s5956_s15, 4  ;;  %s4981_s18 = sshll.u32 %s5732_s30, 8 }
  0xd3   : > { %v774_v3 = vld [vmem:[#allocation5 + $0xc00] sm:$0xff]  ;;  %v4507_v4 = vcombine.high %v390_v1, %v394_v2  ;;  %v4506_v6 = vcombine.low %v390_v1, %v394_v2  ;;  %v4509_v16 = vcombine.high %v391_v13, %v395_v14  ;;  %v399_v19 = vld [vmem:[#allocation5 + $0x48] sm:$0xff]  ;;  %v4508_v21 = vcombine.low %v391_v13, %v395_v14  ;;  %s378_s23 = scalar_lea.vmem [#allocation14], %s4498_s8  ;;  %s6076_s12 = scalar_lea.hbm %s6127_s7, %s4981_s18 }
  0xd4   : > { %v778_v5 = vld [vmem:[#allocation5 + $0xc20] sm:$0xff]  ;;  %v403_v20 = vld [vmem:[#allocation5 + $0x68] sm:$0xff]  ;;  %s4349_s16 = sshll.u32 %s378_s23, 4  ;;  %s4336_s20 = scalar_lea.sflag [#allocation4], %s5956_s15  ;;  %s6071_s16 = int_to_ptr.vmem [resolvable:$true] %s4349_s16 }
  0xd5   : > { %v398_v7 = vld [vmem:[#allocation5 + $0x40] sm:$0xff]  ;;  %v4891_v9 = vcombine.high %v774_v3, %v778_v5  ;;  %v4890_v10 = vcombine.low %v774_v3, %v778_v5  ;;  %2823 = vmatprep.subr.bf16.mxu0 %v4507_v4  ;;  %v4517_v23 = vcombine.high %v399_v19, %v403_v20  ;;  %v407_v26 = vld [vmem:[#allocation5 + $0x88] sm:$0xff]  ;;  %v4516_v29 = vcombine.low %v399_v19, %v403_v20  ;;  %s5572_s30 = scalar_lea.vmem %s6071_s16, 256  ;;  %p6148_p5 = scmp.ne.s32.totalorder %s6138_s29, 0 }
  0xd6   : > { %v402_v8 = vld [vmem:[#allocation5 + $0x60] sm:$0xff]  ;;  %2824 = vmatpush1.bf16.msra.mxu0 %v4506_v6  ;;  %v411_v27 = vld [vmem:[#allocation5 + $0xa8] sm:$0xff]  ;;  %p5573_p0 = scmp.ne.s32.totalorder %s6071_s16, %s5572_s30  ;;  %s5668_s1 = smov [#allocation14]  }
  0xd7   : > { %v4515_v11 = vcombine.high %v398_v7, %v402_v8  ;;  %v5284_v12 = vld [vmem:[%s5960_s22 + $0x18] ss:$28 sps:$4 sm:$0xff]   ;;  %2952 = vmatprep.subr.bf16.mxu1 %v4891_v9  ;;  %v4514_v17 = vcombine.low %v398_v7, %v402_v8  ;;  %v4525_v31 = vcombine.high %v407_v26, %v411_v27  ;;  %v4524_v37 = vcombine.low %v407_v26, %v411_v27  ;;  %v5285_v60 = vld [vmem:[%s5960_s22 + $0x4] ss:$28 sps:$4 sm:$0xff]   ;;  %s5576_s21 = sshll.u32 %s5668_s1, 4  ;;  %s5577_s21 = int_to_ptr.vmem [resolvable:$false] %s5576_s21 }
  0xd8   : > { %v406_v15 = vld [vmem:[#allocation5 + $0x80] sm:$0xff]  ;;  %2953 = vmatpush1.bf16.msra.mxu1 %v4890_v10  ;;  %v415_v34 = vld [vmem:[#allocation5 + $0xc8] sm:$0xff]  ;;  %2855 = vmatprep.mubr.bf16.mxu0 %v5285_v60  ;;  %p5574_p10 = pnand %p5573_p0, %p6148_p5  ;;  %s5578_s10 = scalar_lea.vmem %s5577_s21, 512 }
  0xd9   : > { %v410_v18 = vld [vmem:[#allocation5 + $0xa0] sm:$0xff]  ;;  %2825 = vmatprep.subr.bf16.mxu0 %v4515_v11  ;;  %2995 = vmatprep.subr.bf16.mxu1 %v4509_v16  ;;  %v419_v35 = vld [vmem:[#allocation5 + $0xe8] sm:$0xff]  ;;  %p5579_p11 = scmp.lt.s32.totalorder %s6071_s16, %s5577_s21  ;;  %p5580_p12 = scmp.lt.s32.totalorder %s5578_s10, %s5572_s30 }
  0xda   : > { %v4523_v22 = vcombine.high %v406_v15, %v410_v18  ;;  %v414_v24 = vld [vmem:[#allocation5 + $0xc0] sm:$0xff]  ;;  %2826 = vmatpush1.bf16.msra.mxu0 %v4514_v17  ;;  %v4522_v28 = vcombine.low %v406_v15, %v410_v18  ;;  %v4533_v39 = vcombine.high %v415_v34, %v419_v35  ;;  %v423_v42 = vld [vmem:[#allocation5 + $0x108] sm:$0xff]  ;;  %v4532_v45 = vcombine.low %v415_v34, %v419_v35  ;;  %p5575_p1 = pneg %p5574_p10 }
  0xdb   : > { %v418_v25 = vld [vmem:[#allocation5 + $0xe0] sm:$0xff]  ;;  %4898 = vmatmul.mubr.msk.bf16.vlgmr.msra.gmra.mrb[0].mxu1 %vm2819_vm0, %v5284_v12  ;;  %v427_v43 = vld [vmem:[#allocation5 + $0x128] sm:$0xff]  ;;  %p5581_p13 = por %p5580_p12, %p5579_p11 }
  0xdc   : > { %2996 = vmatpush1.bf16.msra.mxu1 %v4508_v21  ;;  %2827 = vmatprep.subr.bf16.mxu0 %v4523_v22  ;;  %v4531_v30 = vcombine.high %v414_v24, %v418_v25  ;;  %v422_v32 = vld [vmem:[#allocation5 + $0x100] sm:$0xff]  ;;  %v4530_v36 = vcombine.low %v414_v24, %v418_v25  ;;  %v4541_v47 = vcombine.high %v423_v42, %v427_v43  ;;  %v431_v50 = vld [vmem:[#allocation5 + $0x148] sm:$0xff] }
  0xdd   : > { %2997 = vmatprep.subr.bf16.mxu1 %v4517_v23  ;;  %v426_v33 = vld [vmem:[#allocation5 + $0x120] sm:$0xff]  ;;  %v435_v51 = vld [vmem:[#allocation5 + $0x168] sm:$0xff]  ;;  %v4540_v53 = vcombine.low %v423_v42, %v427_v43  ;;  %3027 = vmatprep.mubr.bf16.mxu1 %v5285_v60  ;;  %p5582_p8 = pnand %p5581_p13, %p5575_p1 }
  0xde   : > { %2828 = vmatpush1.bf16.msra.mxu0 %v4522_v28  ;;  %v4539_v38 = vcombine.high %v422_v32, %v426_v33  ;;  %v430_v40 = vld [vmem:[#allocation5 + $0x140] sm:$0xff]  ;;  %v4538_v44 = vcombine.low %v422_v32, %v426_v33  ;;  %v4549_v56 = vcombine.high %v431_v50, %v435_v51  ;;  %v439_v58 = vld [vmem:[#allocation5 + $0x188] sm:$0xff]  ;;  %v4548_v62 = vcombine.low %v431_v50, %v435_v51 }
  0xdf   : > { %2829 = vmatprep.subr.bf16.mxu0 %v4531_v30  ;;  %v434_v41 = vld [vmem:[#allocation5 + $0x160] sm:$0xff]  ;;  %v443_v59 = vld [vmem:[#allocation5 + $0x1a8] sm:$0xff] }
  0xe0   : > { %2998 = vmatpush1.bf16.msra.mxu1 %v4516_v29  ;;  %v4547_v46 = vcombine.high %v430_v40, %v434_v41  ;;  %v438_v48 = vld [vmem:[#allocation5 + $0x180] sm:$0xff]  ;;  %v4546_v52 = vcombine.low %v430_v40, %v434_v41  ;;  %v4557_v1 = vcombine.high %v439_v58, %v443_v59  ;;  %v447_v4 = vld [vmem:[#allocation5 + $0x1c8] sm:$0xff]  ;;  %v4556_v7 = vcombine.low %v439_v58, %v443_v59 }
  0xe1   : > { %2999 = vmatprep.subr.bf16.mxu1 %v4525_v31  ;;  %v442_v49 = vld [vmem:[#allocation5 + $0x1a0] sm:$0xff]  ;;  %v451_v5 = vld [vmem:[#allocation5 + $0x1e8] sm:$0xff] }
  0xe2   : > { %2830 = vmatpush1.bf16.msra.mxu0 %v4530_v36  ;;  %v4555_v54 = vcombine.high %v438_v48, %v442_v49  ;;  %v446_v55 = vld [vmem:[#allocation5 + $0x1c0] sm:$0xff]  ;;  %v4554_v61 = vcombine.low %v438_v48, %v442_v49  ;;  %v4565_v9 = vcombine.high %v447_v4, %v451_v5  ;;  %v455_v12 = vld [vmem:[#allocation5 + $0x208] sm:$0xff]  ;;  %v4564_v15 = vcombine.low %v447_v4, %v451_v5 }
  0xe3   : > { %2831 = vmatprep.subr.bf16.mxu0 %v4539_v38  ;;  %v450_v57 = vld [vmem:[#allocation5 + $0x1e0] sm:$0xff]  ;;  %v459_v13 = vld [vmem:[#allocation5 + $0x228] sm:$0xff] }
  0xe4   : > { %3000 = vmatpush1.bf16.msra.mxu1 %v4524_v37  ;;  %v4563_v63 = vcombine.high %v446_v55, %v450_v57  ;;  %v454_v2 = vld [vmem:[#allocation5 + $0x200] sm:$0xff]  ;;  %v4562_v6 = vcombine.low %v446_v55, %v450_v57  ;;  %v4573_v17 = vcombine.high %v455_v12, %v459_v13  ;;  %v463_v20 = vld [vmem:[#allocation5 + $0x248] sm:$0xff]  ;;  %v4572_v23 = vcombine.low %v455_v12, %v459_v13 }
  0xe5   : > { %3001 = vmatprep.subr.bf16.mxu1 %v4533_v39  ;;  %v458_v3 = vld [vmem:[#allocation5 + $0x220] sm:$0xff]  ;;  %v467_v21 = vld [vmem:[#allocation5 + $0x268] sm:$0xff] }
  0xe6   : > { %2832 = vmatpush1.bf16.msra.mxu0 %v4538_v44  ;;  %v4571_v8 = vcombine.high %v454_v2, %v458_v3  ;;  %v462_v10 = vld [vmem:[#allocation5 + $0x240] sm:$0xff]  ;;  %v4570_v14 = vcombine.low %v454_v2, %v458_v3  ;;  %v4581_v25 = vcombine.high %v463_v20, %v467_v21  ;;  %v471_v28 = vld [vmem:[#allocation5 + $0x288] sm:$0xff]  ;;  %v4580_v31 = vcombine.low %v463_v20, %v467_v21 }
  0xe7   : > { %2833 = vmatprep.subr.bf16.mxu0 %v4547_v46  ;;  %v466_v11 = vld [vmem:[#allocation5 + $0x260] sm:$0xff]  ;;  %v475_v29 = vld [vmem:[#allocation5 + $0x2a8] sm:$0xff] }
  0xe8   : > { %3002 = vmatpush1.bf16.msra.mxu1 %v4532_v45  ;;  %v4579_v16 = vcombine.high %v462_v10, %v466_v11  ;;  %v470_v18 = vld [vmem:[#allocation5 + $0x280] sm:$0xff]  ;;  %v4578_v22 = vcombine.low %v462_v10, %v466_v11  ;;  %v4589_v33 = vcombine.high %v471_v28, %v475_v29  ;;  %v479_v36 = vld [vmem:[#allocation5 + $0x2c8] sm:$0xff]  ;;  %v4588_v39 = vcombine.low %v471_v28, %v475_v29 }
  0xe9   : > { %3003 = vmatprep.subr.bf16.mxu1 %v4541_v47  ;;  %v474_v19 = vld [vmem:[#allocation5 + $0x2a0] sm:$0xff]  ;;  %v483_v37 = vld [vmem:[#allocation5 + $0x2e8] sm:$0xff] }
  0xea   : > { %2834 = vmatpush1.bf16.msra.mxu0 %v4546_v52  ;;  %v4587_v24 = vcombine.high %v470_v18, %v474_v19  ;;  %v478_v26 = vld [vmem:[#allocation5 + $0x2c0] sm:$0xff]  ;;  %v4586_v30 = vcombine.low %v470_v18, %v474_v19  ;;  %v4597_v41 = vcombine.high %v479_v36, %v483_v37  ;;  %v487_v44 = vld [vmem:[#allocation5 + $0x308] sm:$0xff]  ;;  %v4596_v47 = vcombine.low %v479_v36, %v483_v37 }
  0xeb   : > { %2835 = vmatprep.subr.bf16.mxu0 %v4555_v54  ;;  %v482_v27 = vld [vmem:[#allocation5 + $0x2e0] sm:$0xff]  ;;  %v491_v45 = vld [vmem:[#allocation5 + $0x328] sm:$0xff] }
  0xec   : > { %3004 = vmatpush1.bf16.msra.mxu1 %v4540_v53  ;;  %v4595_v32 = vcombine.high %v478_v26, %v482_v27  ;;  %v486_v34 = vld [vmem:[#allocation5 + $0x300] sm:$0xff]  ;;  %v4594_v38 = vcombine.low %v478_v26, %v482_v27  ;;  %v4605_v49 = vcombine.high %v487_v44, %v491_v45  ;;  %v495_v52 = vld [vmem:[#allocation5 + $0x348] sm:$0xff]  ;;  %v4604_v55 = vcombine.low %v487_v44, %v491_v45 }
  0xed   : > { %3005 = vmatprep.subr.bf16.mxu1 %v4549_v56  ;;  %v490_v35 = vld [vmem:[#allocation5 + $0x320] sm:$0xff]  ;;  %v499_v53 = vld [vmem:[#allocation5 + $0x368] sm:$0xff] }
  0xee   : > { %2836 = vmatpush1.bf16.msra.mxu0 %v4554_v61  ;;  %v4603_v40 = vcombine.high %v486_v34, %v490_v35  ;;  %v494_v42 = vld [vmem:[#allocation5 + $0x340] sm:$0xff]  ;;  %v4602_v46 = vcombine.low %v486_v34, %v490_v35  ;;  %v4613_v57 = vcombine.high %v495_v52, %v499_v53  ;;  %v503_v60 = vld [vmem:[#allocation5 + $0x388] sm:$0xff] }
  0xef   : > { %2837 = vmatprep.subr.bf16.mxu0 %v4563_v63  ;;  %v498_v43 = vld [vmem:[#allocation5 + $0x360] sm:$0xff]  ;;  %v507_v61 = vld [vmem:[#allocation5 + $0x3a8] sm:$0xff]  ;;  %v4612_v63 = vcombine.low %v495_v52, %v499_v53 }
  0xf0   : > { %3006 = vmatpush1.bf16.msra.mxu1 %v4548_v62  ;;  %v4611_v48 = vcombine.high %v494_v42, %v498_v43  ;;  %v502_v50 = vld [vmem:[#allocation5 + $0x380] sm:$0xff]  ;;  %v4610_v54 = vcombine.low %v494_v42, %v498_v43  ;;  %v4621_v2 = vcombine.high %v503_v60, %v507_v61  ;;  %v511_v5 = vld [vmem:[#allocation5 + $0x3c8] sm:$0xff] }
  0xf1   : > { %3007 = vmatprep.subr.bf16.mxu1 %v4557_v1  ;;  %v506_v51 = vld [vmem:[#allocation5 + $0x3a0] sm:$0xff] }
  0xf2   : > { %2838 = vmatpush1.bf16.msra.mxu0 %v4562_v6  ;;  %v4619_v56 = vcombine.high %v502_v50, %v506_v51  ;;  %v510_v58 = vld [vmem:[#allocation5 + $0x3c0] sm:$0xff]  ;;  %v4618_v62 = vcombine.low %v502_v50, %v506_v51  ;;  %v515_v6 = vld [vmem:[#allocation5 + $0x3e8] sm:$0xff] }
  0xf3   : > { %2839 = vmatprep.subr.bf16.mxu0 %v4571_v8  ;;  %v514_v59 = vld [vmem:[#allocation5 + $0x3e0] sm:$0xff]  ;;  %v4620_v8 = vcombine.low %v503_v60, %v507_v61  ;;  %v4629_v10 = vcombine.high %v511_v5, %v515_v6  ;;  %v4628_v18 = vcombine.low %v511_v5, %v515_v6 }
  0xf4   : > { %3008 = vmatpush1.bf16.msra.mxu1 %v4556_v7  ;;  %v4627_v1 = vcombine.high %v510_v58, %v514_v59  ;;  %v518_v3 = vld [vmem:[#allocation5 + $0x400] sm:$0xff]  ;;  %v4626_v7 = vcombine.low %v510_v58, %v514_v59 }
  0xf5   : > { %3009 = vmatprep.subr.bf16.mxu1 %v4565_v9  ;;  %v522_v4 = vld [vmem:[#allocation5 + $0x420] sm:$0xff] }
  0xf6   : > { %2840 = vmatpush1.bf16.msra.mxu0 %v4570_v14  ;;  %v4635_v9 = vcombine.high %v518_v3, %v522_v4  ;;  %v526_v11 = vld [vmem:[#allocation5 + $0x440] sm:$0xff]  ;;  %v519_v14 = vld [vmem:[#allocation5 + $0x408] sm:$0xff] }
  0xf7   : > { %2841 = vmatprep.subr.bf16.mxu0 %v4579_v16  ;;  %v530_v12 = vld [vmem:[#allocation5 + $0x460] sm:$0xff]  ;;  %v4634_v16 = vcombine.low %v518_v3, %v522_v4 }
  0xf8   : > { %3010 = vmatpush1.bf16.msra.mxu1 %v4564_v15  ;;  %v5287_v13 = vld [vmem:[%s5960_s22] ss:$28 sps:$4 sm:$0xff]   ;;  %v4643_v19 = vcombine.high %v526_v11, %v530_v12 }
  0xf9   : > { %3011 = vmatprep.subr.bf16.mxu1 %v4573_v17  ;;  %v523_v15 = vld [vmem:[#allocation5 + $0x428] sm:$0xff]  ;;  %v5288_v17 = vld [vmem:[%s5960_s22 + $0xc] ss:$28 sps:$4 sm:$0xff]   ;;  %v534_v21 = vld [vmem:[#allocation5 + $0x480] sm:$0xff] }
  0xfa   : > { %2842 = vmatpush1.bf16.msra.mxu0 %v4578_v22  ;;  %v4637_v20 = vcombine.high %v519_v14, %v523_v15  ;;  %v538_v22 = vld [vmem:[#allocation5 + $0x4a0] sm:$0xff]  ;;  %v4636_v26 = vcombine.low %v519_v14, %v523_v15 }
  0xfb   : > { %2843 = vmatprep.subr.bf16.mxu0 %v4587_v24  ;;  %v531_v24 = vld [vmem:[#allocation5 + $0x468] sm:$0xff]  ;;  %v4651_v27 = vcombine.high %v534_v21, %v538_v22  ;;  %v542_v28 = vld [vmem:[#allocation5 + $0x4c0] sm:$0xff] }
  0xfc   : > { %3012 = vmatpush1.bf16.msra.mxu1 %v4572_v23  ;;  %v527_v23 = vld [vmem:[#allocation5 + $0x448] sm:$0xff]  ;;  %v550_v34 = vld [vmem:[#allocation5 + $0x500] sm:$0xff] }
  0xfd   : > { %3013 = vmatprep.subr.bf16.mxu1 %v4581_v25  ;;  %v4642_v25 = vcombine.low %v526_v11, %v530_v12  ;;  %v4645_v29 = vcombine.high %v527_v23, %v531_v24  ;;  %v554_v35 = vld [vmem:[#allocation5 + $0x520] sm:$0xff]  ;;  %v4644_v36 = vcombine.low %v527_v23, %v531_v24  ;;  %v591_v24 = vld [vmem:[#allocation5 + $0x648] sm:$0xff] }
  0xfe   : > { %2844 = vmatpush1.bf16.msra.mxu0 %v4586_v30  ;;  %v546_v30 = vld [vmem:[#allocation5 + $0x4e0] sm:$0xff]  ;;  %v4667_v45 = vcombine.high %v550_v34, %v554_v35 }
  0xff   : > { %2845 = vmatprep.subr.bf16.mxu0 %v4595_v32  ;;  %v539_v32 = vld [vmem:[#allocation5 + $0x4a8] sm:$0xff]  ;;  %v4659_v37 = vcombine.high %v542_v28, %v546_v30  ;;  %v558_v42 = vld [vmem:[#allocation5 + $0x540] sm:$0xff] }
 0x100   : > { %3014 = vmatpush1.bf16.msra.mxu1 %v4580_v31  ;;  %v535_v31 = vld [vmem:[#allocation5 + $0x488] sm:$0xff]  ;;  %v562_v43 = vld [vmem:[#allocation5 + $0x560] sm:$0xff] }
 0x101   : > { %3015 = vmatprep.subr.bf16.mxu1 %v4589_v33  ;;  %v4650_v33 = vcombine.low %v534_v21, %v538_v22  ;;  %v4652_v44 = vcombine.low %v535_v31, %v539_v32  ;;  %v566_v50 = vld [vmem:[#allocation5 + $0x580] sm:$0xff]  ;;  %v4675_v53 = vcombine.high %v558_v42, %v562_v43 }
 0x102   : > { %2846 = vmatpush1.bf16.msra.mxu0 %v4594_v38  ;;  %v543_v38 = vld [vmem:[#allocation5 + $0x4c8] sm:$0xff]  ;;  %v570_v51 = vld [vmem:[#allocation5 + $0x5a0] sm:$0xff] }
 0x103   : > { %2847 = vmatprep.subr.bf16.mxu0 %v4603_v40  ;;  %v4653_v40 = vcombine.high %v535_v31, %v539_v32  ;;  %v574_v58 = vld [vmem:[#allocation5 + $0x5c0] sm:$0xff]  ;;  %v4683_v61 = vcombine.high %v566_v50, %v570_v51  ;;  %v599_v32 = vld [vmem:[#allocation5 + $0x688] sm:$0xff] }
 0x104   : > { %3016 = vmatpush1.bf16.msra.mxu1 %v4588_v39  ;;  %v547_v39 = vld [vmem:[#allocation5 + $0x4e8] sm:$0xff]  ;;  %v578_v59 = vld [vmem:[#allocation5 + $0x5e0] sm:$0xff] }
 0x105   : > { %3017 = vmatprep.subr.bf16.mxu1 %v4597_v41  ;;  %v4658_v41 = vcombine.low %v542_v28, %v546_v30  ;;  %v4660_v52 = vcombine.low %v543_v38, %v547_v39  ;;  %v582_v3 = vld [vmem:[#allocation5 + $0x600] sm:$0xff]  ;;  %v4691_v6 = vcombine.high %v574_v58, %v578_v59 }
 0x106   : > { %2848 = vmatpush1.bf16.msra.mxu0 %v4602_v46  ;;  %v551_v46 = vld [vmem:[#allocation5 + $0x508] sm:$0xff]  ;;  %v586_v4 = vld [vmem:[#allocation5 + $0x620] sm:$0xff] }
 0x107   : > { %2849 = vmatprep.subr.bf16.mxu0 %v4611_v48  ;;  %v4661_v48 = vcombine.high %v543_v38, %v547_v39  ;;  %v4699_v12 = vcombine.high %v582_v3, %v586_v4  ;;  %v594_v14 = vld [vmem:[#allocation5 + $0x660] sm:$0xff] }
 0x108   : > { %3018 = vmatpush1.bf16.msra.mxu1 %v4596_v47  ;;  %v555_v47 = vld [vmem:[#allocation5 + $0x528] sm:$0xff]  ;;  %v598_v21 = vld [vmem:[#allocation5 + $0x680] sm:$0xff] }
 0x109   : > { %3019 = vmatprep.subr.bf16.mxu1 %v4605_v49  ;;  %v4666_v49 = vcombine.low %v550_v34, %v554_v35  ;;  %v4668_v60 = vcombine.low %v551_v46, %v555_v47  ;;  %v602_v22 = vld [vmem:[#allocation5 + $0x6a0] sm:$0xff] }
 0x10a   : > { %2850 = vmatpush1.bf16.msra.mxu0 %v4610_v54  ;;  %v559_v54 = vld [vmem:[#allocation5 + $0x548] sm:$0xff]  ;;  %v4715_v28 = vcombine.high %v598_v21, %v602_v22  ;;  %v610_v30 = vld [vmem:[#allocation5 + $0x6e0] sm:$0xff]  ;;  %v4714_v34 = vcombine.low %v598_v21, %v602_v22 }
 0x10b   : > { %2851 = vmatprep.subr.bf16.mxu0 %v4619_v56  ;;  %v4669_v56 = vcombine.high %v551_v46, %v555_v47  ;;  %v618_v38 = vld [vmem:[#allocation5 + $0x720] sm:$0xff] }
 0x10c   : > { %3020 = vmatpush1.bf16.msra.mxu1 %v4604_v55  ;;  %v563_v55 = vld [vmem:[#allocation5 + $0x568] sm:$0xff]  ;;  %v626_v46 = vld [vmem:[#allocation5 + $0x760] sm:$0xff] }
 0x10d   : > { %3021 = vmatprep.subr.bf16.mxu1 %v4613_v57  ;;  %v4674_v57 = vcombine.low %v558_v42, %v562_v43  ;;  %v4676_v5 = vcombine.low %v559_v54, %v563_v55 }
 0x10e   : > { %2852 = vmatpush1.bf16.msra.mxu0 %v4618_v62  ;;  %v567_v62 = vld [vmem:[#allocation5 + $0x588] sm:$0xff] }
 0x10f   : > { %2853 = vmatprep.subr.bf16.mxu0 %v4627_v1  ;;  %v4677_v1 = vcombine.high %v559_v54, %v563_v55  ;;  %v634_v54 = vld [vmem:[#allocation5 + $0x7a0] sm:$0xff] }
 0x110   : > { %3022 = vmatpush1.bf16.msra.mxu1 %v4612_v63  ;;  %v571_v63 = vld [vmem:[#allocation5 + $0x5a8] sm:$0xff] }
 0x111   : > { %3023 = vmatprep.subr.bf16.mxu1 %v4621_v2  ;;  %v4682_v2 = vcombine.low %v566_v50, %v570_v51  ;;  %v4684_v11 = vcombine.low %v567_v62, %v571_v63 }
 0x112   : > { %2854 = vmatpush1.bf16.msra.mxu0 %v4626_v7  ;;  %v575_v7 = vld [vmem:[#allocation5 + $0x5c8] sm:$0xff] }
 0x113   : > { %2866 = vmatprep.subr.bf16.mxu0 %v4635_v9  ;;  %v4685_v9 = vcombine.high %v567_v62, %v571_v63  ;;  %v642_v62 = vld [vmem:[#allocation5 + $0x7e0] sm:$0xff] }
 0x114   : > { %3024 = vmatpush1.bf16.msra.mxu1 %v4620_v8  ;;  %v579_v8 = vld [vmem:[#allocation5 + $0x5e8] sm:$0xff] }
 0x115   : > { %3025 = vmatprep.subr.bf16.mxu1 %v4629_v10  ;;  %2856 = vmatmul.mubr.bf16.vlgmr.msra.gmra.mrb[0].mxu0 %v5287_v13  ;;  %v4690_v10 = vcombine.low %v574_v58, %v578_v59  ;;  %v4693_v15 = vcombine.high %v575_v7, %v579_v8 }
 0x116   : > { %2867 = vmatpush1.bf16.msra.mxu0 %v4634_v16  ;;  %2898 = vmatprep.mubr.bf16.mxu0 %v5288_v17  ;;  %v583_v16 = vld [vmem:[#allocation5 + $0x608] sm:$0xff] }
 0x117   : > { %2868 = vmatprep.subr.bf16.mxu0 %v4643_v19  ;;  %v4692_v19 = vcombine.low %v575_v7, %v579_v8  ;;  %v650_v7 = vld [vmem:[#allocation5 + $0x820] sm:$0xff] }
 0x118   : > { %3026 = vmatpush1.bf16.msra.mxu1 %v4628_v18  ;;  %v4698_v18 = vcombine.low %v582_v3, %v586_v4 }
 0x119   : > { %3038 = vmatprep.subr.bf16.mxu1 %v4637_v20 }
 0x11a   : > { %2869 = vmatpush1.bf16.msra.mxu0 %v4642_v25  ;;  %v595_v25 = vld [vmem:[#allocation5 + $0x668] sm:$0xff] }
 0x11b   : > { %3028 = vmatmul.mubr.bf16.vlgmr.msra.gmra.mrb[4].mxu1 %v5287_v13  ;;  %2870 = vmatprep.subr.bf16.mxu0 %v4651_v27  ;;  %v590_v13 = vld [vmem:[#allocation5 + $0x640] sm:$0xff]  ;;  %v4709_v31 = vcombine.high %v591_v24, %v595_v25  ;;  %v4708_v35 = vcombine.low %v591_v24, %v595_v25 }
 0x11c   : > { %3039 = vmatpush1.bf16.msra.mxu1 %v4636_v26  ;;  %3070 = vmatprep.mubr.bf16.mxu1 %v5288_v17  ;;  %v587_v17 = vld [vmem:[#allocation5 + $0x628] sm:$0xff]  ;;  %v4707_v20 = vcombine.high %v590_v13, %v594_v14  ;;  %v4706_v26 = vcombine.low %v590_v13, %v594_v14  ;;  %v662_v24 = vld [vmem:[#allocation5 + $0x880] sm:$0xff] }
 0x11d   : > { %3040 = vmatprep.subr.bf16.mxu1 %v4645_v29  ;;  %v4701_v23 = vcombine.high %v583_v16, %v587_v17  ;;  %v4700_v27 = vcombine.low %v583_v16, %v587_v17  ;;  %v606_v29 = vld [vmem:[#allocation5 + $0x6c0] sm:$0xff]  ;;  %v647_v17 = vld [vmem:[#allocation5 + $0x808] sm:$0xff] }
 0x11e   : > { %2871 = vmatpush1.bf16.msra.mxu0 %v4650_v33  ;;  %v603_v33 = vld [vmem:[#allocation5 + $0x6a8] sm:$0xff]  ;;  %v4722_v42 = vcombine.low %v606_v29, %v610_v30  ;;  %v658_v16 = vld [vmem:[#allocation5 + $0x860] sm:$0xff] }
 0x11f   : > { %2872 = vmatprep.subr.bf16.mxu0 %v4659_v37  ;;  %v614_v37 = vld [vmem:[#allocation5 + $0x700] sm:$0xff]  ;;  %v4717_v39 = vcombine.high %v599_v32, %v603_v33  ;;  %v4716_v43 = vcombine.low %v599_v32, %v603_v33 }
 0x120   : > { %3041 = vmatpush1.bf16.msra.mxu1 %v4644_v36  ;;  %v4723_v36 = vcombine.high %v606_v29, %v610_v30  ;;  %v4730_v50 = vcombine.low %v614_v37, %v618_v38  ;;  %v666_v25 = vld [vmem:[#allocation5 + $0x8a0] sm:$0xff] }
 0x121   : > { %3042 = vmatprep.subr.bf16.mxu1 %v4653_v40  ;;  %v607_v40 = vld [vmem:[#allocation5 + $0x6c8] sm:$0xff]  ;;  %v670_v32 = vld [vmem:[#allocation5 + $0x8c0] sm:$0xff] }
 0x122   : > { %2873 = vmatpush1.bf16.msra.mxu0 %v4658_v41  ;;  %v611_v41 = vld [vmem:[#allocation5 + $0x6e8] sm:$0xff]  ;;  %v674_v33 = vld [vmem:[#allocation5 + $0x8e0] sm:$0xff] }
 0x123   : > { %2874 = vmatprep.subr.bf16.mxu0 %v4667_v45  ;;  %v622_v45 = vld [vmem:[#allocation5 + $0x740] sm:$0xff]  ;;  %v4725_v47 = vcombine.high %v607_v40, %v611_v41  ;;  %v4724_v51 = vcombine.low %v607_v40, %v611_v41 }
 0x124   : > { %3043 = vmatpush1.bf16.msra.mxu1 %v4652_v44  ;;  %v4731_v44 = vcombine.high %v614_v37, %v618_v38  ;;  %v4738_v58 = vcombine.low %v622_v45, %v626_v46  ;;  %v4778_v37 = vcombine.low %v662_v24, %v666_v25  ;;  %v678_v40 = vld [vmem:[#allocation5 + $0x900] sm:$0xff] }
 0x125   : > { %3044 = vmatprep.subr.bf16.mxu1 %v4661_v48  ;;  %v615_v48 = vld [vmem:[#allocation5 + $0x708] sm:$0xff]  ;;  %v682_v41 = vld [vmem:[#allocation5 + $0x920] sm:$0xff] }
 0x126   : > { %2875 = vmatpush1.bf16.msra.mxu0 %v4666_v49  ;;  %v619_v49 = vld [vmem:[#allocation5 + $0x728] sm:$0xff] }
 0x127   : > { %2876 = vmatprep.subr.bf16.mxu0 %v4675_v53  ;;  %v630_v53 = vld [vmem:[#allocation5 + $0x780] sm:$0xff]  ;;  %v4733_v55 = vcombine.high %v615_v48, %v619_v49  ;;  %v4732_v59 = vcombine.low %v615_v48, %v619_v49 }
 0x128   : > { %3045 = vmatpush1.bf16.msra.mxu1 %v4660_v52  ;;  %v4739_v52 = vcombine.high %v622_v45, %v626_v46  ;;  %v4746_v3 = vcombine.low %v630_v53, %v634_v54  ;;  %v4786_v45 = vcombine.low %v670_v32, %v674_v33  ;;  %v686_v49 = vld [vmem:[#allocation5 + $0x940] sm:$0xff] }
 0x129   : > { %3046 = vmatprep.subr.bf16.mxu1 %v4669_v56  ;;  %v623_v56 = vld [vmem:[#allocation5 + $0x748] sm:$0xff] }
 0x12a   : > { %2877 = vmatpush1.bf16.msra.mxu0 %v4674_v57  ;;  %v627_v57 = vld [vmem:[#allocation5 + $0x768] sm:$0xff] }
 0x12b   : > { %2878 = vmatprep.subr.bf16.mxu0 %v4683_v61  ;;  %v638_v61 = vld [vmem:[#allocation5 + $0x7c0] sm:$0xff]  ;;  %v4741_v63 = vcombine.high %v623_v56, %v627_v57  ;;  %v4740_v4 = vcombine.low %v623_v56, %v627_v57 }
 0x12c   : > { %3047 = vmatpush1.bf16.msra.mxu1 %v4668_v60  ;;  %v4747_v60 = vcombine.high %v630_v53, %v634_v54  ;;  %v4794_v53 = vcombine.low %v678_v40, %v682_v41  ;;  %v694_v57 = vld [vmem:[#allocation5 + $0x980] sm:$0xff] }
 0x12d   : > { %3048 = vmatprep.subr.bf16.mxu1 %v4677_v1  ;;  %v631_v1 = vld [vmem:[#allocation5 + $0x788] sm:$0xff] }
 0x12e   : > { %2879 = vmatpush1.bf16.msra.mxu0 %v4682_v2  ;;  %v635_v2 = vld [vmem:[#allocation5 + $0x7a8] sm:$0xff] }
 0x12f   : > { %2880 = vmatprep.subr.bf16.mxu0 %v4691_v6  ;;  %v646_v6 = vld [vmem:[#allocation5 + $0x800] sm:$0xff]  ;;  %v4749_v8 = vcombine.high %v631_v1, %v635_v2  ;;  %v4748_v13 = vcombine.low %v631_v1, %v635_v2 }
 0x130   : > { %3049 = vmatpush1.bf16.msra.mxu1 %v4676_v5  ;;  %v4755_v5 = vcombine.high %v638_v61, %v642_v62  ;;  %v4763_v14 = vcombine.high %v646_v6, %v650_v7  ;;  %v4762_v21 = vcombine.low %v646_v6, %v650_v7  ;;  %v702_v2 = vld [vmem:[#allocation5 + $0x9c0] sm:$0xff] }
 0x131   : > { %3050 = vmatprep.subr.bf16.mxu1 %v4685_v9  ;;  %v639_v9 = vld [vmem:[#allocation5 + $0x7c8] sm:$0xff] }
 0x132   : > { %2881 = vmatpush1.bf16.msra.mxu0 %v4690_v10  ;;  %v643_v10 = vld [vmem:[#allocation5 + $0x7e8] sm:$0xff] }
 0x133   : > { %2882 = vmatprep.subr.bf16.mxu0 %v4699_v12  ;;  %v654_v12 = vld [vmem:[#allocation5 + $0x840] sm:$0xff]  ;;  %v4756_v22 = vcombine.low %v639_v9, %v643_v10 }
 0x134   : > { %3051 = vmatpush1.bf16.msra.mxu1 %v4684_v11  ;;  %v4754_v11 = vcombine.low %v638_v61, %v642_v62  ;;  %v4770_v29 = vcombine.low %v654_v12, %v658_v16 }
 0x135   : > { %3052 = vmatprep.subr.bf16.mxu1 %v4693_v15  ;;  %v5290_v15 = vld [vmem:[%s5960_s22 + $0x8] ss:$28 sps:$4 sm:$0xff]  }
 0x136   : > { %2883 = vmatpush1.bf16.msra.mxu0 %v4698_v18  ;;  %v4757_v18 = vcombine.high %v639_v9, %v643_v10  ;;  %v710_v10 = vld [vmem:[#allocation5 + $0xa00] sm:$0xff] }
 0x137   : > { %2884 = vmatprep.subr.bf16.mxu0 %v4707_v20  ;;  %v5291_v20 = vld [vmem:[%s5960_s22 + $0x14] ss:$28 sps:$4 sm:$0xff]  }
 0x138   : > { %3053 = vmatpush1.bf16.msra.mxu1 %v4692_v19  ;;  %v651_v19 = vld [vmem:[#allocation5 + $0x828] sm:$0xff] }
 0x139   : > { %3054 = vmatprep.subr.bf16.mxu1 %v4701_v23  ;;  %v4771_v23 = vcombine.high %v654_v12, %v658_v16  ;;  %v4764_v30 = vcombine.low %v647_v17, %v651_v19  ;;  %v703_v12 = vld [vmem:[#allocation5 + $0x9c8] sm:$0xff] }
 0x13a   : > { %2885 = vmatpush1.bf16.msra.mxu0 %v4706_v26  ;;  %v4765_v26 = vcombine.high %v647_v17, %v651_v19  ;;  %v722_v19 = vld [vmem:[#allocation5 + $0xa60] sm:$0xff] }
 0x13b   : > { %2886 = vmatprep.subr.bf16.mxu0 %v4715_v28  ;;  %v659_v28 = vld [vmem:[#allocation5 + $0x868] sm:$0xff] }
 0x13c   : > { %3055 = vmatpush1.bf16.msra.mxu1 %v4700_v27  ;;  %v655_v27 = vld [vmem:[#allocation5 + $0x848] sm:$0xff] }
 0x13d   : > { %3056 = vmatprep.subr.bf16.mxu1 %v4709_v31  ;;  %v4779_v31 = vcombine.high %v662_v24, %v666_v25  ;;  %v4772_v38 = vcombine.low %v655_v27, %v659_v28 }
 0x13e   : > { %2887 = vmatpush1.bf16.msra.mxu0 %v4714_v34  ;;  %v4773_v34 = vcombine.high %v655_v27, %v659_v28  ;;  %v730_v27 = vld [vmem:[#allocation5 + $0xaa0] sm:$0xff]  ;;  %v719_v28 = vld [vmem:[#allocation5 + $0xa48] sm:$0xff] }
 0x13f   : > { %2888 = vmatprep.subr.bf16.mxu0 %v4723_v36  ;;  %v667_v36 = vld [vmem:[#allocation5 + $0x8a8] sm:$0xff] }
 0x140   : > { %3057 = vmatpush1.bf16.msra.mxu1 %v4708_v35  ;;  %v663_v35 = vld [vmem:[#allocation5 + $0x888] sm:$0xff] }
 0x141   : > { %3058 = vmatprep.subr.bf16.mxu1 %v4717_v39  ;;  %v4787_v39 = vcombine.high %v670_v32, %v674_v33  ;;  %v4780_v46 = vcombine.low %v663_v35, %v667_v36 }
 0x142   : > { %2889 = vmatpush1.bf16.msra.mxu0 %v4722_v42  ;;  %v4781_v42 = vcombine.high %v663_v35, %v667_v36  ;;  %v738_v35 = vld [vmem:[#allocation5 + $0xae0] sm:$0xff]  ;;  %v727_v36 = vld [vmem:[#allocation5 + $0xa88] sm:$0xff] }
 0x143   : > { %2890 = vmatprep.subr.bf16.mxu0 %v4731_v44  ;;  %v675_v44 = vld [vmem:[#allocation5 + $0x8e8] sm:$0xff] }
 0x144   : > { %3059 = vmatpush1.bf16.msra.mxu1 %v4716_v43  ;;  %v671_v43 = vld [vmem:[#allocation5 + $0x8c8] sm:$0xff] }
 0x145   : > { %3060 = vmatprep.subr.bf16.mxu1 %v4725_v47  ;;  %v4795_v47 = vcombine.high %v678_v40, %v682_v41  ;;  %v4789_v48 = vcombine.high %v671_v43, %v675_v44  ;;  %v4788_v54 = vcombine.low %v671_v43, %v675_v44  ;;  %v746_v43 = vld [vmem:[#allocation5 + $0xb20] sm:$0xff]  ;;  %v735_v44 = vld [vmem:[#allocation5 + $0xac8] sm:$0xff] }
 0x146   : > { %2891 = vmatpush1.bf16.msra.mxu0 %v4730_v50  ;;  %v690_v50 = vld [vmem:[#allocation5 + $0x960] sm:$0xff] }
 0x147   : > { %2892 = vmatprep.subr.bf16.mxu0 %v4739_v52  ;;  %v683_v52 = vld [vmem:[#allocation5 + $0x928] sm:$0xff]  ;;  %v4802_v61 = vcombine.low %v686_v49, %v690_v50 }
 0x148   : > { %3061 = vmatpush1.bf16.msra.mxu1 %v4724_v51  ;;  %v679_v51 = vld [vmem:[#allocation5 + $0x908] sm:$0xff] }
 0x149   : > { %3062 = vmatprep.subr.bf16.mxu1 %v4733_v55  ;;  %v4803_v55 = vcombine.high %v686_v49, %v690_v50  ;;  %v4797_v56 = vcombine.high %v679_v51, %v683_v52  ;;  %v4796_v62 = vcombine.low %v679_v51, %v683_v52  ;;  %v750_v50 = vld [vmem:[#allocation5 + $0xb40] sm:$0xff]  ;;  %v743_v52 = vld [vmem:[#allocation5 + $0xb08] sm:$0xff] }
 0x14a   : > { %2893 = vmatpush1.bf16.msra.mxu0 %v4738_v58  ;;  %v698_v58 = vld [vmem:[#allocation5 + $0x9a0] sm:$0xff] }
 0x14b   : > { %2894 = vmatprep.subr.bf16.mxu0 %v4747_v60  ;;  %v691_v60 = vld [vmem:[#allocation5 + $0x968] sm:$0xff]  ;;  %v4810_v6 = vcombine.low %v694_v57, %v698_v58  ;;  %v754_v51 = vld [vmem:[#allocation5 + $0xb60] sm:$0xff] }
 0x14c   : > { %3063 = vmatpush1.bf16.msra.mxu1 %v4732_v59  ;;  %v687_v59 = vld [vmem:[#allocation5 + $0x948] sm:$0xff] }
 0x14d   : > { %3064 = vmatprep.subr.bf16.mxu1 %v4741_v63  ;;  %v4811_v63 = vcombine.high %v694_v57, %v698_v58  ;;  %v4805_v1 = vcombine.high %v687_v59, %v691_v60  ;;  %v4804_v7 = vcombine.low %v687_v59, %v691_v60  ;;  %v758_v58 = vld [vmem:[#allocation5 + $0xb80] sm:$0xff]  ;;  %v751_v60 = vld [vmem:[#allocation5 + $0xb48] sm:$0xff] }
 0x14e   : > { %2895 = vmatpush1.bf16.msra.mxu0 %v4746_v3  ;;  %v706_v3 = vld [vmem:[#allocation5 + $0x9e0] sm:$0xff] }
 0x14f   : > { %2896 = vmatprep.subr.bf16.mxu0 %v4755_v5  ;;  %v699_v5 = vld [vmem:[#allocation5 + $0x9a8] sm:$0xff]  ;;  %v762_v59 = vld [vmem:[#allocation5 + $0xba0] sm:$0xff] }
 0x150   : > { %3065 = vmatpush1.bf16.msra.mxu1 %v4740_v4  ;;  %v695_v4 = vld [vmem:[#allocation5 + $0x988] sm:$0xff] }
 0x151   : > { %3066 = vmatprep.subr.bf16.mxu1 %v4749_v8  ;;  %v4819_v8 = vcombine.high %v702_v2, %v706_v3  ;;  %v4813_v9 = vcombine.high %v695_v4, %v699_v5 }
 0x152   : > { %2897 = vmatpush1.bf16.msra.mxu0 %v4754_v11  ;;  %v714_v11 = vld [vmem:[#allocation5 + $0xa20] sm:$0xff] }
 0x153   : > { %2909 = vmatprep.subr.bf16.mxu0 %v4763_v14  ;;  %v4818_v14 = vcombine.low %v702_v2, %v706_v3  ;;  %v4827_v16 = vcombine.high %v710_v10, %v714_v11  ;;  %v766_v3 = vld [vmem:[#allocation5 + $0xbc0] sm:$0xff] }
 0x154   : > { %3067 = vmatpush1.bf16.msra.mxu1 %v4748_v13  ;;  %v707_v13 = vld [vmem:[#allocation5 + $0x9e8] sm:$0xff] }
 0x155   : > { %3068 = vmatprep.subr.bf16.mxu1 %v4757_v18  ;;  %2899 = vmatmul.mubr.bf16.vlgmr.msra.gmra.mrb[0].mxu0 %v5290_v15  ;;  %v4821_v17 = vcombine.high %v703_v12, %v707_v13  ;;  %v718_v18 = vld [vmem:[#allocation5 + $0xa40] sm:$0xff] }
 0x156   : > { %2910 = vmatpush1.bf16.msra.mxu0 %v4762_v21  ;;  %2941 = vmatprep.mubr.bf16.mxu0 %v5291_v20  ;;  %v715_v21 = vld [vmem:[#allocation5 + $0xa28] sm:$0xff]  ;;  %v4835_v24 = vcombine.high %v718_v18, %v722_v19 }
 0x157   : > { %2911 = vmatprep.subr.bf16.mxu0 %v4771_v23  ;;  %v4820_v23 = vcombine.low %v703_v12, %v707_v13  ;;  %v396_v12 = vld [vmem:[#allocation5 + $0x30] sm:$0xff]  ;;  %v767_v13 = vld [vmem:[#allocation5 + $0xbc8] sm:$0xff] }
 0x158   : > { %3069 = vmatpush1.bf16.msra.mxu1 %v4756_v22  ;;  %v4826_v22 = vcombine.low %v710_v10, %v714_v11  ;;  %v392_v11 = vld [vmem:[#allocation5 + $0x10] sm:$0xff] }
 0x159   : > { %3081 = vmatprep.subr.bf16.mxu1 %v4765_v26  ;;  %v726_v26 = vld [vmem:[#allocation5 + $0xa80] sm:$0xff] }
 0x15a   : > { %2912 = vmatpush1.bf16.msra.mxu0 %v4770_v29  ;;  %v723_v29 = vld [vmem:[#allocation5 + $0xa68] sm:$0xff]  ;;  %v4843_v32 = vcombine.high %v726_v26, %v730_v27 }
 0x15b   : > { %3071 = vmatmul.mubr.bf16.vlgmr.msra.gmra.mrb[4].mxu1 %v5290_v15  ;;  %2913 = vmatprep.subr.bf16.mxu0 %v4779_v31  ;;  %v4812_v15 = vcombine.low %v695_v4, %v699_v5  ;;  %v4837_v33 = vcombine.high %v719_v28, %v723_v29  ;;  %v770_v4 = vld [vmem:[#allocation5 + $0xbe0] sm:$0xff]  ;;  %v759_v5 = vld [vmem:[#allocation5 + $0xb88] sm:$0xff] }
 0x15c   : > { %3082 = vmatpush1.bf16.msra.mxu1 %v4764_v30  ;;  %3113 = vmatprep.mubr.bf16.mxu1 %v5291_v20  ;;  %v711_v20 = vld [vmem:[#allocation5 + $0xa08] sm:$0xff]  ;;  %v4834_v30 = vcombine.low %v718_v18, %v722_v19  ;;  %v400_v19 = vld [vmem:[#allocation5 + $0x50] sm:$0xff] }
 0x15d   : > { %3083 = vmatprep.subr.bf16.mxu1 %v4773_v34  ;;  %v4829_v25 = vcombine.high %v711_v20, %v715_v21  ;;  %v4828_v31 = vcombine.low %v711_v20, %v715_v21  ;;  %v734_v34 = vld [vmem:[#allocation5 + $0xac0] sm:$0xff]  ;;  %v404_v20 = vld [vmem:[#allocation5 + $0x70] sm:$0xff] }
 0x15e   : > { %2914 = vmatpush1.bf16.msra.mxu0 %v4778_v37  ;;  %v731_v37 = vld [vmem:[#allocation5 + $0xaa8] sm:$0xff]  ;;  %v4851_v40 = vcombine.high %v734_v34, %v738_v35  ;;  %v5293_v21 = vld [vmem:[%s5960_s22 + $0x10] ss:$28 sps:$4 sm:$0xff]  }
 0x15f   : > { %2915 = vmatprep.subr.bf16.mxu0 %v4787_v39  ;;  %v4836_v39 = vcombine.low %v719_v28, %v723_v29  ;;  %v4845_v41 = vcombine.high %v727_v36, %v731_v37  ;;  %v408_v28 = vld [vmem:[#allocation5 + $0x90] sm:$0xff] }
 0x160   : > { %3084 = vmatpush1.bf16.msra.mxu1 %v4772_v38  ;;  %v4842_v38 = vcombine.low %v726_v26, %v730_v27  ;;  %v4519_v26 = vcombine.high %v400_v19, %v404_v20  ;;  %v412_v29 = vld [vmem:[#allocation5 + $0xb0] sm:$0xff] }
 0x161   : > { %3085 = vmatprep.subr.bf16.mxu1 %v4781_v42  ;;  %v742_v42 = vld [vmem:[#allocation5 + $0xb00] sm:$0xff] }
 0x162   : > { %2916 = vmatpush1.bf16.msra.mxu0 %v4786_v45  ;;  %v739_v45 = vld [vmem:[#allocation5 + $0xae8] sm:$0xff] }
 0x163   : > { %2917 = vmatprep.subr.bf16.mxu0 %v4795_v47  ;;  %v4844_v47 = vcombine.low %v727_v36, %v731_v37  ;;  %v4853_v49 = vcombine.high %v735_v44, %v739_v45  ;;  %v416_v36 = vld [vmem:[#allocation5 + $0xd0] sm:$0xff] }
 0x164   : > { %3086 = vmatpush1.bf16.msra.mxu1 %v4780_v46  ;;  %v4850_v46 = vcombine.low %v734_v34, %v738_v35  ;;  %v4527_v35 = vcombine.high %v408_v28, %v412_v29  ;;  %v420_v37 = vld [vmem:[#allocation5 + $0xf0] sm:$0xff] }
 0x165   : > { %3087 = vmatprep.subr.bf16.mxu1 %v4789_v48  ;;  %v4859_v48 = vcombine.high %v742_v42, %v746_v43 }
 0x166   : > { %2918 = vmatpush1.bf16.msra.mxu0 %v4794_v53  ;;  %v747_v53 = vld [vmem:[#allocation5 + $0xb28] sm:$0xff] }
 0x167   : > { %2919 = vmatprep.subr.bf16.mxu0 %v4803_v55  ;;  %v4852_v55 = vcombine.low %v735_v44, %v739_v45  ;;  %v4861_v57 = vcombine.high %v743_v52, %v747_v53  ;;  %v432_v45 = vld [vmem:[#allocation5 + $0x150] sm:$0xff] }
 0x168   : > { %3088 = vmatpush1.bf16.msra.mxu1 %v4788_v54  ;;  %v4858_v54 = vcombine.low %v742_v42, %v746_v43  ;;  %v428_v42 = vld [vmem:[#allocation5 + $0x130] sm:$0xff]  ;;  %v4534_v43 = vcombine.low %v416_v36, %v420_v37 }
 0x169   : > { %3089 = vmatprep.subr.bf16.mxu1 %v4797_v56  ;;  %v4867_v56 = vcombine.high %v750_v50, %v754_v51 }
 0x16a   : > { %2920 = vmatpush1.bf16.msra.mxu0 %v4802_v61  ;;  %v755_v61 = vld [vmem:[#allocation5 + $0xb68] sm:$0xff] }
 0x16b   : > { %2921 = vmatprep.subr.bf16.mxu0 %v4811_v63  ;;  %v4860_v63 = vcombine.low %v743_v52, %v747_v53  ;;  %v4869_v2 = vcombine.high %v751_v60, %v755_v61  ;;  %v440_v53 = vld [vmem:[#allocation5 + $0x190] sm:$0xff] }
 0x16c   : > { %3090 = vmatpush1.bf16.msra.mxu1 %v4796_v62  ;;  %v4866_v62 = vcombine.low %v750_v50, %v754_v51 }
 0x16d   : > { %3091 = vmatprep.subr.bf16.mxu1 %v4805_v1  ;;  %v4875_v1 = vcombine.high %v758_v58, %v762_v59 }
 0x16e   : > { %2922 = vmatpush1.bf16.msra.mxu0 %v4810_v6  ;;  %v763_v6 = vld [vmem:[#allocation5 + $0xba8] sm:$0xff] }
 0x16f   : > { %2923 = vmatprep.subr.bf16.mxu0 %v4819_v8  ;;  %v4868_v8 = vcombine.low %v751_v60, %v755_v61  ;;  %v4877_v10 = vcombine.high %v759_v5, %v763_v6  ;;  %v401_v60 = vld [vmem:[#allocation5 + $0x58] sm:$0xff] }
 0x170   : > { %3092 = vmatpush1.bf16.msra.mxu1 %v4804_v7  ;;  %v4874_v7 = vcombine.low %v758_v58, %v762_v59  ;;  %v448_v58 = vld [vmem:[#allocation5 + $0x1d0] sm:$0xff]  ;;  %v405_v61 = vld [vmem:[#allocation5 + $0x78] sm:$0xff] }
 0x171   : > { %3093 = vmatprep.subr.bf16.mxu1 %v4813_v9  ;;  %v4883_v9 = vcombine.high %v766_v3, %v770_v4  ;;  %v452_v59 = vld [vmem:[#allocation5 + $0x1f0] sm:$0xff] }
 0x172   : > { %2924 = vmatpush1.bf16.msra.mxu0 %v4818_v14  ;;  %v771_v14 = vld [vmem:[#allocation5 + $0xbe8] sm:$0xff] }
 0x173   : > { %2925 = vmatprep.subr.bf16.mxu0 %v4827_v16  ;;  %v4876_v16 = vcombine.low %v759_v5, %v763_v6  ;;  %v4885_v18 = vcombine.high %v767_v13, %v771_v14  ;;  %v409_v6 = vld [vmem:[#allocation5 + $0x98] sm:$0xff] }
 0x174   : > { %3094 = vmatpush1.bf16.msra.mxu1 %v4812_v15  ;;  %v4882_v15 = vcombine.low %v766_v3, %v770_v4  ;;  %v456_v3 = vld [vmem:[#allocation5 + $0x210] sm:$0xff] }
 0x175   : > { %3095 = vmatprep.subr.bf16.mxu1 %v4821_v17  ;;  %v4511_v17 = vcombine.high %v392_v11, %v396_v12  ;;  %v460_v4 = vld [vmem:[#allocation5 + $0x230] sm:$0xff] }
 0x176   : > { %2926 = vmatpush1.bf16.msra.mxu0 %v4826_v22  ;;  %v775_v22 = vld [vmem:[#allocation5 + $0xc08] sm:$0xff] }
 0x177   : > { %2927 = vmatprep.subr.bf16.mxu0 %v4835_v24  ;;  %v4510_v24 = vcombine.low %v392_v11, %v396_v12  ;;  %v4520_v11 = vcombine.low %v401_v60, %v405_v61  ;;  %v4575_v12 = vcombine.high %v456_v3, %v460_v4 }
 0x178   : > { %3096 = vmatpush1.bf16.msra.mxu1 %v4820_v23  ;;  %v779_v23 = vld [vmem:[#allocation5 + $0xc28] sm:$0xff] }
 0x179   : > { %3097 = vmatprep.subr.bf16.mxu1 %v4829_v25  ;;  %v4884_v25 = vcombine.low %v767_v13, %v771_v14  ;;  %v4893_v27 = vcombine.high %v775_v22, %v779_v23  ;;  %v4892_v34 = vcombine.low %v775_v22, %v779_v23  ;;  %v472_v23 = vld [vmem:[#allocation5 + $0x290] sm:$0xff] }
 0x17a   : > { %2928 = vmatpush1.bf16.msra.mxu0 %v4834_v30  ;;  %v776_v30 = vld [vmem:[#allocation5 + $0xc10] sm:$0xff] }
 0x17b   : > { %2929 = vmatprep.subr.bf16.mxu0 %v4843_v32  ;;  %v4518_v32 = vcombine.low %v400_v19, %v404_v20  ;;  %v4574_v19 = vcombine.low %v456_v3, %v460_v4  ;;  %v469_v3 = vld [vmem:[#allocation5 + $0x278] sm:$0xff] }
 0x17c   : > { %3098 = vmatpush1.bf16.msra.mxu1 %v4828_v31  ;;  %v780_v31 = vld [vmem:[#allocation5 + $0xc30] sm:$0xff] }
 0x17d   : > { %3099 = vmatprep.subr.bf16.mxu1 %v4837_v33  ;;  %v5988_v33 = vld [vmem:[%s5960_s22 + $0x4] ss:$28 sps:$4 sm:$0xff]   ;;  %v4894_v50 = vcombine.low %v776_v30, %v780_v31 }
 0x17e   : > { %2930 = vmatpush1.bf16.msra.mxu0 %v4842_v38  ;;  %v4895_v38 = vcombine.high %v776_v30, %v780_v31  ;;  %v480_v31 = vld [vmem:[#allocation5 + $0x2d0] sm:$0xff] }
 0x17f   : > { %2931 = vmatprep.subr.bf16.mxu0 %v4851_v40  ;;  %v4535_v40 = vcombine.high %v416_v36, %v420_v37 }
 0x180   : > { %3100 = vmatpush1.bf16.msra.mxu1 %v4836_v39  ;;  %v4526_v39 = vcombine.low %v408_v28, %v412_v29 }
 0x181   : > { %3101 = vmatprep.subr.bf16.mxu1 %v4845_v41  ;;  %v424_v41 = vld [vmem:[#allocation5 + $0x110] sm:$0xff] }
 0x182   : > { %2932 = vmatpush1.bf16.msra.mxu0 %v4850_v46  ;;  %v4543_v44 = vcombine.high %v424_v41, %v428_v42  ;;  %v436_v46 = vld [vmem:[#allocation5 + $0x170] sm:$0xff] }
 0x183   : > { %2933 = vmatprep.subr.bf16.mxu0 %v4859_v48  ;;  %v397_v48 = vld [vmem:[#allocation5 + $0x38] sm:$0xff]  ;;  %v4551_v51 = vcombine.high %v432_v45, %v436_v46 }
 0x184   : > { %3102 = vmatpush1.bf16.msra.mxu1 %v4844_v47  ;;  %v393_v47 = vld [vmem:[#allocation5 + $0x18] sm:$0xff] }
 0x185   : > { %3103 = vmatprep.subr.bf16.mxu1 %v4853_v49  ;;  %v4542_v49 = vcombine.low %v424_v41, %v428_v42  ;;  %v4513_v52 = vcombine.high %v393_v47, %v397_v48  ;;  %v441_v41 = vld [vmem:[#allocation5 + $0x198] sm:$0xff] }
 0x186   : > { %2934 = vmatpush1.bf16.msra.mxu0 %v4858_v54  ;;  %v444_v54 = vld [vmem:[#allocation5 + $0x1b0] sm:$0xff]  ;;  %v445_v42 = vld [vmem:[#allocation5 + $0x1b8] sm:$0xff] }
 0x187   : > { %2935 = vmatprep.subr.bf16.mxu0 %v4867_v56  ;;  %v4550_v56 = vcombine.low %v432_v45, %v436_v46  ;;  %v4561_v46 = vcombine.high %v441_v41, %v445_v42 }
 0x188   : > { %3104 = vmatpush1.bf16.msra.mxu1 %v4852_v55  ;;  %v5367_v55 = vld [vmem:[%s5960_s22 + $0x18] ss:$28 sps:$4 sm:$0xff]  }
 0x189   : > { %3105 = vmatprep.subr.bf16.mxu1 %v4861_v57  ;;  %v4559_v57 = vcombine.high %v440_v53, %v444_v54 }
 0x18a   : > { %2936 = vmatpush1.bf16.msra.mxu0 %v4866_v62  ;;  %v4558_v62 = vcombine.low %v440_v53, %v444_v54 }
 0x18b   : > { %2937 = vmatprep.subr.bf16.mxu0 %v4875_v1  ;;  %v4567_v1 = vcombine.high %v448_v58, %v452_v59 }
 0x18c   : > { %3106 = vmatpush1.bf16.msra.mxu1 %v4860_v63  ;;  %v4512_v63 = vcombine.low %v393_v47, %v397_v48  ;;  %v496_v47 = vld [vmem:[#allocation5 + $0x350] sm:$0xff] }
 0x18d   : > { %3107 = vmatprep.subr.bf16.mxu1 %v4869_v2  ;;  %v4521_v2 = vcombine.high %v401_v60, %v405_v61  ;;  %v500_v48 = vld [vmem:[#allocation5 + $0x370] sm:$0xff] }
 0x18e   : > { %2938 = vmatpush1.bf16.msra.mxu0 %v4874_v7  ;;  %v413_v7 = vld [vmem:[#allocation5 + $0xb8] sm:$0xff]  ;;  %v4615_v53 = vcombine.high %v496_v47, %v500_v48 }
 0x18f   : > { %2939 = vmatprep.subr.bf16.mxu0 %v4883_v9  ;;  %v4566_v9 = vcombine.low %v448_v58, %v452_v59  ;;  %v4529_v14 = vcombine.high %v409_v6, %v413_v7  ;;  %v4528_v20 = vcombine.low %v409_v6, %v413_v7  ;;  %v461_v58 = vld [vmem:[#allocation5 + $0x238] sm:$0xff]  ;;  %v4614_v59 = vcombine.low %v496_v47, %v500_v48  ;;  %v556_v47 = vld [vmem:[#allocation5 + $0x530] sm:$0xff] }
 0x190   : > { %3108 = vmatpush1.bf16.msra.mxu1 %v4868_v8  ;;  %v505_v48 = vld [vmem:[#allocation5 + $0x398] sm:$0xff] }
 0x191   : > { %3109 = vmatprep.subr.bf16.mxu1 %v4877_v10 }
 0x192   : > { %2940 = vmatpush1.bf16.msra.mxu0 %v4882_v15  ;;  %v464_v15 = vld [vmem:[#allocation5 + $0x250] sm:$0xff] }
 0x193   : > { %3167 = vmatprep.subr.bf16.mxu0 %v4511_v17  ;;  %v417_v17 = vld [vmem:[#allocation5 + $0xd8] sm:$0xff] }
 0x194   : > { %3110 = vmatpush1.bf16.msra.mxu1 %v4876_v16  ;;  %v468_v16 = vld [vmem:[#allocation5 + $0x270] sm:$0xff] }
 0x195   : > { %3111 = vmatprep.subr.bf16.mxu1 %v4885_v18  ;;  %2942 = vmatmul.mubr.bf16.vlgmr.msra.gmra.mrb[0].mxu0 %v5293_v21  ;;  %v421_v18 = vld [vmem:[#allocation5 + $0xf8] sm:$0xff] }
 0x196   : > { %3168 = vmatpush1.bf16.msra.mxu0 %v4510_v24  ;;  %3199 = vmatprep.mubr.bf16.mxu0 %v5988_v33  ;;  %v4537_v22 = vcombine.high %v417_v17, %v421_v18  ;;  %v476_v24 = vld [vmem:[#allocation5 + $0x2b0] sm:$0xff]  ;;  %v4536_v28 = vcombine.low %v417_v17, %v421_v18 }
 0x197   : > { %3169 = vmatprep.subr.bf16.mxu0 %v4519_v26  ;;  %v429_v26 = vld [vmem:[#allocation5 + $0x138] sm:$0xff]  ;;  %v4591_v29 = vcombine.high %v472_v23, %v476_v24 }
 0x198   : > { %3112 = vmatpush1.bf16.msra.mxu1 %v4884_v25  ;;  %v425_v25 = vld [vmem:[#allocation5 + $0x118] sm:$0xff] }
 0x199   : > { %3124 = vmatprep.subr.bf16.mxu1 %v4893_v27  ;;  %v4582_v27 = vcombine.low %v464_v15, %v468_v16  ;;  %v4545_v30 = vcombine.high %v425_v25, %v429_v26  ;;  %v4544_v36 = vcombine.low %v425_v25, %v429_v26 }
 0x19a   : > { %3170 = vmatpush1.bf16.msra.mxu0 %v4518_v32  ;;  %v484_v32 = vld [vmem:[#allocation5 + $0x2f0] sm:$0xff] }
 0x19b   : > { %3114 = vmatmul.mubr.bf16.vlgmr.msra.gmra.mrb[4].mxu1 %v5293_v21  ;;  %3171 = vmatprep.subr.bf16.mxu0 %v4527_v35  ;;  %v4583_v21 = vcombine.high %v464_v15, %v468_v16  ;;  %v4590_v35 = vcombine.low %v472_v23, %v476_v24  ;;  %v4599_v37 = vcombine.high %v480_v31, %v484_v32  ;;  %v477_v15 = vld [vmem:[#allocation5 + $0x2b8] sm:$0xff] }
 0x19c   : > { %3125 = vmatpush1.bf16.msra.mxu1 %v4892_v34  ;;  %3156 = vmatprep.mubr.bf16.mxu1 %v5665_v0  ;;  %v437_v34 = vld [vmem:[#allocation5 + $0x178] sm:$0xff] }
 0x19d   : > { %3296 = vmatprep.subr.bf16.mxu1 %v4895_v38  ;;  %v485_v23 = vld [vmem:[#allocation5 + $0x2f8] sm:$0xff] }
 0x19e   : > { %3172 = vmatpush1.bf16.msra.mxu0 %v4526_v39  ;;  %v488_v39 = vld [vmem:[#allocation5 + $0x310] sm:$0xff] }
 0x19f   : > { %3173 = vmatprep.subr.bf16.mxu0 %v4535_v40  ;;  %v492_v40 = vld [vmem:[#allocation5 + $0x330] sm:$0xff] }
 0x1a0   : > { %v4607_v45 = vcombine.high %v488_v39, %v492_v40 }
 0x1a2   : > { %3174 = vmatpush1.bf16.msra.mxu0 %v4534_v43  ;;  %v4598_v43 = vcombine.low %v480_v31, %v484_v32  ;;  %v489_v31 = vld [vmem:[#allocation5 + $0x318] sm:$0xff] }
 0x1a3   : > { %3175 = vmatprep.subr.bf16.mxu0 %v4543_v44  ;;  %v493_v32 = vld [vmem:[#allocation5 + $0x338] sm:$0xff] }
 0x1a6   : > { %3176 = vmatpush1.bf16.msra.mxu0 %v4542_v49  ;;  %v449_v49 = vld [vmem:[#allocation5 + $0x1d8] sm:$0xff] }
 0x1a7   : > { %4899 = vmatmul.mubr.msk.bf16.vlgmr.msra.gmra.mrb[4].mxu1 %vm2819_vm0, %v5367_v55  ;;  %3177 = vmatprep.subr.bf16.mxu0 %v4551_v51  ;;  %v4606_v51 = vcombine.low %v488_v39, %v492_v40  ;;  %v548_v39 = vld [vmem:[#allocation5 + $0x4f0] sm:$0xff]  ;;  %v497_v40 = vld [vmem:[#allocation5 + $0x358] sm:$0xff] }
 0x1a8   : > { %3297 = vmatpush1.bf16.msra.mxu1 %v4894_v50  ;;  %3328 = vmatprep.mubr.bf16.mxu1 %v5665_v0  ;;  %v453_v50 = vld [vmem:[#allocation5 + $0x1f8] sm:$0xff] }
 0x1a9   : > { %3339 = vmatprep.subr.bf16.mxu1 %v4513_v52  ;;  %v4560_v52 = vcombine.low %v441_v41, %v445_v42  ;;  %v4569_v54 = vcombine.high %v449_v49, %v453_v50  ;;  %v4568_v60 = vcombine.low %v449_v49, %v453_v50  ;;  %v501_v41 = vld [vmem:[#allocation5 + $0x378] sm:$0xff] }
 0x1aa   : > { %3178 = vmatpush1.bf16.msra.mxu0 %v4550_v56  ;;  %v508_v56 = vld [vmem:[#allocation5 + $0x3b0] sm:$0xff]  ;;  %v509_v49 = vld [vmem:[#allocation5 + $0x3b8] sm:$0xff] }
 0x1ab   : > { %3179 = vmatprep.subr.bf16.mxu0 %v4559_v57  ;;  %v457_v57 = vld [vmem:[#allocation5 + $0x218] sm:$0xff] }
 0x1ac   : > { %v4576_v6 = vcombine.low %v457_v57, %v461_v58 }
 0x1ae   : > { %v5995_v5 = vpop.f32.mrb[0].mxu1  ;;  %3180 = vmatpush1.bf16.msra.mxu0 %v4558_v62  ;;  %v4577_v62 = vcombine.high %v457_v57, %v461_v58  ;;  %v517_v57 = vld [vmem:[#allocation5 + $0x3f8] sm:$0xff] }
 0x1af   : > { %v5997_v8 = vpop.f32.mrb[1].mxu1  ;;  %4900 = vmatmul.mubr.msk.bf16.vlgmr.msra.gmra.mrb[8].mxu1 %vm2819_vm0, %v5367_v55  ;;  %3181 = vmatprep.subr.bf16.mxu0 %v4567_v1  ;;  %v504_v55 = vld [vmem:[#allocation5 + $0x390] sm:$0xff] }
 0x1b0   : > { %3340 = vmatpush1.bf16.msra.mxu1 %v4512_v63  ;;  %v6000_v10 = vpop.f32.mrb[2].mxu1  ;;  %3371 = vmatprep.mubr.bf16.mxu1 %v5988_v33  ;;  %v433_v33 = vld [vmem:[#allocation5 + $0x158] sm:$0xff]  ;;  %v4623_v61 = vcombine.high %v504_v55, %v508_v56  ;;  %v512_v63 = vld [vmem:[#allocation5 + $0x3d0] sm:$0xff]  ;;  %v4622_v4 = vcombine.low %v504_v55, %v508_v56 }
 0x1b1   : > { %v6002_v13 = vpop.f32.mrb[3].mxu1  ;;  %3341 = vmatprep.subr.bf16.mxu1 %v4521_v2  ;;  %v4553_v38 = vcombine.high %v433_v33, %v437_v34  ;;  %v4552_v44 = vcombine.low %v433_v33, %v437_v34  ;;  %v516_v1 = vld [vmem:[#allocation5 + $0x3f0] sm:$0xff]  ;;  %v465_v2 = vld [vmem:[#allocation5 + $0x258] sm:$0xff] }
 0x1b2   : > { %3182 = vmatpush1.bf16.msra.mxu0 %v4566_v9  ;;  %v4631_v7 = vcombine.high %v512_v63, %v516_v1  ;;  %v4585_v9 = vcombine.high %v465_v2, %v469_v3  ;;  %v4630_v16 = vcombine.low %v512_v63, %v516_v1  ;;  %v4584_v17 = vcombine.low %v465_v2, %v469_v3  ;;  %v6010_v34 = vld [vmem:[%s5960_s22 + $0xc] ss:$28 sps:$4 sm:$0xff]  }
 0x1b3   : > { %3183 = vmatprep.subr.bf16.mxu0 %v4575_v12  ;;  %v524_v12 = vld [vmem:[#allocation5 + $0x430] sm:$0xff]  ;;  %v513_v56 = vld [vmem:[#allocation5 + $0x3d8] sm:$0xff] }
 0x1b4   : > { %3342 = vmatpush1.bf16.msra.mxu1 %v4520_v11  ;;  %v520_v11 = vld [vmem:[#allocation5 + $0x410] sm:$0xff]  ;;  %v521_v1 = vld [vmem:[#allocation5 + $0x418] sm:$0xff] }
 0x1b5   : > { %3343 = vmatprep.subr.bf16.mxu1 %v4529_v14  ;;  %v473_v14 = vld [vmem:[#allocation5 + $0x298] sm:$0xff]  ;;  %v4639_v18 = vcombine.high %v520_v11, %v524_v12  ;;  %v4638_v24 = vcombine.low %v520_v11, %v524_v12  ;;  %v564_v55 = vld [vmem:[#allocation5 + $0x570] sm:$0xff] }
 0x1b6   : > { %3184 = vmatpush1.bf16.msra.mxu0 %v4574_v19  ;;  %v4593_v19 = vcombine.high %v473_v14, %v477_v15  ;;  %v4592_v25 = vcombine.low %v473_v14, %v477_v15  ;;  %v572_v63 = vld [vmem:[#allocation5 + $0x5b0] sm:$0xff]  ;;  %v525_v2 = vld [vmem:[#allocation5 + $0x438] sm:$0xff] }
 0x1b7   : > { %3185 = vmatprep.subr.bf16.mxu0 %v4583_v21  ;;  %v532_v21 = vld [vmem:[#allocation5 + $0x470] sm:$0xff]  ;;  %v529_v12 = vld [vmem:[#allocation5 + $0x458] sm:$0xff] }
 0x1b8   : > { %3344 = vmatpush1.bf16.msra.mxu1 %v4528_v20  ;;  %v528_v20 = vld [vmem:[#allocation5 + $0x450] sm:$0xff]  ;;  %v533_v14 = vld [vmem:[#allocation5 + $0x478] sm:$0xff] }
 0x1b9   : > { %3345 = vmatprep.subr.bf16.mxu1 %v4537_v22  ;;  %v481_v22 = vld [vmem:[#allocation5 + $0x2d8] sm:$0xff]  ;;  %v4647_v26 = vcombine.high %v528_v20, %v532_v21  ;;  %v4646_v33 = vcombine.low %v528_v20, %v532_v21  ;;  %v580_v11 = vld [vmem:[#allocation5 + $0x5f0] sm:$0xff] }
 0x1ba   : > { %3186 = vmatpush1.bf16.msra.mxu0 %v4582_v27  ;;  %v4601_v27 = vcombine.high %v481_v22, %v485_v23  ;;  %v588_v20 = vld [vmem:[#allocation5 + $0x630] sm:$0xff]  ;;  %v537_v21 = vld [vmem:[#allocation5 + $0x498] sm:$0xff] }
 0x1bb   : > { %3187 = vmatprep.subr.bf16.mxu0 %v4591_v29  ;;  %v540_v29 = vld [vmem:[#allocation5 + $0x4b0] sm:$0xff] }
 0x1bc   : > { %3346 = vmatpush1.bf16.msra.mxu1 %v4536_v28  ;;  %v536_v28 = vld [vmem:[#allocation5 + $0x490] sm:$0xff] }
 0x1bd   : > { %3347 = vmatprep.subr.bf16.mxu1 %v4545_v30  ;;  %v6006_v30 = vld [vmem:[%s5960_s22] ss:$28 sps:$4 sm:$0xff]   ;;  %v4654_v42 = vcombine.low %v536_v28, %v540_v29 }
 0x1be   : > { %3188 = vmatpush1.bf16.msra.mxu0 %v4590_v35  ;;  %v4600_v35 = vcombine.low %v481_v22, %v485_v23  ;;  %v541_v22 = vld [vmem:[#allocation5 + $0x4b8] sm:$0xff] }
 0x1bf   : > { %3189 = vmatprep.subr.bf16.mxu0 %v4599_v37  ;;  %v4609_v37 = vcombine.high %v489_v31, %v493_v32 }
 0x1c0   : > { %3348 = vmatpush1.bf16.msra.mxu1 %v4544_v36  ;;  %v4655_v36 = vcombine.high %v536_v28, %v540_v29  ;;  %v596_v28 = vld [vmem:[#allocation5 + $0x670] sm:$0xff]  ;;  %v545_v29 = vld [vmem:[#allocation5 + $0x4d8] sm:$0xff] }
 0x1c1   : > { %3349 = vmatprep.subr.bf16.mxu1 %v4553_v38  ;;  %v544_v38 = vld [vmem:[#allocation5 + $0x4d0] sm:$0xff] }
 0x1c2   : > { %3190 = vmatpush1.bf16.msra.mxu0 %v4598_v43  ;;  %v4608_v43 = vcombine.low %v489_v31, %v493_v32  ;;  %v4662_v50 = vcombine.low %v544_v38, %v548_v39  ;;  %v549_v31 = vld [vmem:[#allocation5 + $0x4f8] sm:$0xff] }
 0x1c3   : > { %3191 = vmatprep.subr.bf16.mxu0 %v4607_v45  ;;  %v4617_v45 = vcombine.high %v497_v40, %v501_v41 }
 0x1c4   : > { %3350 = vmatpush1.bf16.msra.mxu1 %v4552_v44  ;;  %v4663_v44 = vcombine.high %v544_v38, %v548_v39  ;;  %v553_v38 = vld [vmem:[#allocation5 + $0x518] sm:$0xff] }
 0x1c5   : > { %3351 = vmatprep.subr.bf16.mxu1 %v4561_v46  ;;  %v552_v46 = vld [vmem:[#allocation5 + $0x510] sm:$0xff]  ;;  %v557_v39 = vld [vmem:[#allocation5 + $0x538] sm:$0xff] }
 0x1c6   : > { %3192 = vmatpush1.bf16.msra.mxu0 %v4606_v51  ;;  %v4616_v51 = vcombine.low %v497_v40, %v501_v41  ;;  %v4670_v58 = vcombine.low %v552_v46, %v556_v47  ;;  %v4664_v41 = vcombine.low %v545_v29, %v549_v31 }
 0x1c7   : > { %3193 = vmatprep.subr.bf16.mxu0 %v4615_v53  ;;  %v4625_v53 = vcombine.high %v505_v48, %v509_v49 }
 0x1c8   : > { %3352 = vmatpush1.bf16.msra.mxu1 %v4560_v52  ;;  %v4671_v52 = vcombine.high %v552_v46, %v556_v47  ;;  %v565_v46 = vld [vmem:[#allocation5 + $0x578] sm:$0xff] }
 0x1c9   : > { %3353 = vmatprep.subr.bf16.mxu1 %v4569_v54  ;;  %v560_v54 = vld [vmem:[#allocation5 + $0x550] sm:$0xff] }
 0x1ca   : > { %3194 = vmatpush1.bf16.msra.mxu0 %v4614_v59  ;;  %v4624_v59 = vcombine.low %v505_v48, %v509_v49  ;;  %v4678_v3 = vcombine.low %v560_v54, %v564_v55  ;;  %v4672_v48 = vcombine.low %v553_v38, %v557_v39 }
 0x1cb   : > { %3195 = vmatprep.subr.bf16.mxu0 %v4623_v61  ;;  %v4633_v61 = vcombine.high %v513_v56, %v517_v57 }
 0x1cc   : > { %3354 = vmatpush1.bf16.msra.mxu1 %v4568_v60  ;;  %v4679_v60 = vcombine.high %v560_v54, %v564_v55  ;;  %v573_v54 = vld [vmem:[#allocation5 + $0x5b8] sm:$0xff] }
 0x1cd   : > { %3355 = vmatprep.subr.bf16.mxu1 %v4577_v62  ;;  %v568_v62 = vld [vmem:[#allocation5 + $0x590] sm:$0xff] }
 0x1ce   : > { %3196 = vmatpush1.bf16.msra.mxu0 %v4622_v4  ;;  %v4632_v4 = vcombine.low %v513_v56, %v517_v57  ;;  %v4686_v15 = vcombine.low %v568_v62, %v572_v63 }
 0x1cf   : > { %3197 = vmatprep.subr.bf16.mxu0 %v4631_v7  ;;  %v4641_v7 = vcombine.high %v521_v1, %v525_v2 }
 0x1d0   : > { %3356 = vmatpush1.bf16.msra.mxu1 %v4576_v6  ;;  %v4687_v6 = vcombine.high %v568_v62, %v572_v63  ;;  %v581_v62 = vld [vmem:[#allocation5 + $0x5f8] sm:$0xff] }
 0x1d1   : > { %3357 = vmatprep.subr.bf16.mxu1 %v4585_v9  ;;  %v576_v9 = vld [vmem:[#allocation5 + $0x5d0] sm:$0xff] }
 0x1d2   : > { %3198 = vmatpush1.bf16.msra.mxu0 %v4630_v16  ;;  %v4640_v16 = vcombine.low %v521_v1, %v525_v2  ;;  %v4694_v23 = vcombine.low %v576_v9, %v580_v11 }
 0x1d3   : > { %3210 = vmatprep.subr.bf16.mxu0 %v4639_v18  ;;  %v4649_v18 = vcombine.high %v529_v12, %v533_v14 }
 0x1d4   : > { %3358 = vmatpush1.bf16.msra.mxu1 %v4584_v17  ;;  %v4695_v17 = vcombine.high %v576_v9, %v580_v11  ;;  %v589_v9 = vld [vmem:[#allocation5 + $0x638] sm:$0xff] }
 0x1d5   : > { %3359 = vmatprep.subr.bf16.mxu1 %v4593_v19  ;;  %3200 = vmatmul.mubr.bf16.vlgmr.msra.gmra.mrb[4].mxu0 %v6006_v30  ;;  %v584_v19 = vld [vmem:[#allocation5 + $0x610] sm:$0xff] }
 0x1d6   : > { %3211 = vmatpush1.bf16.msra.mxu0 %v4638_v24  ;;  %3242 = vmatprep.mubr.bf16.mxu0 %v6010_v34  ;;  %v4648_v24 = vcombine.low %v529_v12, %v533_v14  ;;  %v4702_v32 = vcombine.low %v584_v19, %v588_v20 }
 0x1d7   : > { %3212 = vmatprep.subr.bf16.mxu0 %v4647_v26  ;;  %v4657_v26 = vcombine.high %v537_v21, %v541_v22 }
 0x1d8   : > { %3360 = vmatpush1.bf16.msra.mxu1 %v4592_v25  ;;  %v4703_v25 = vcombine.high %v584_v19, %v588_v20  ;;  %v597_v19 = vld [vmem:[#allocation5 + $0x678] sm:$0xff] }
 0x1d9   : > { %3361 = vmatprep.subr.bf16.mxu1 %v4601_v27  ;;  %v592_v27 = vld [vmem:[#allocation5 + $0x650] sm:$0xff] }
 0x1da   : > { %3213 = vmatpush1.bf16.msra.mxu0 %v4646_v33  ;;  %v4656_v33 = vcombine.low %v537_v21, %v541_v22  ;;  %v4710_v40 = vcombine.low %v592_v27, %v596_v28 }
 0x1db   : > { %3214 = vmatprep.subr.bf16.mxu0 %v4655_v36  ;;  %v600_v36 = vld [vmem:[#allocation5 + $0x690] sm:$0xff] }
 0x1dc   : > { %3362 = vmatpush1.bf16.msra.mxu1 %v4600_v35  ;;  %v4665_v35 = vcombine.high %v545_v29, %v549_v31 }
 0x1dd   : > { %3363 = vmatprep.subr.bf16.mxu1 %v4609_v37  ;;  %v604_v37 = vld [vmem:[#allocation5 + $0x6b0] sm:$0xff] }
 0x1de   : > { %3215 = vmatpush1.bf16.msra.mxu0 %v4654_v42  ;;  %v4673_v42 = vcombine.high %v553_v38, %v557_v39  ;;  %v4718_v47 = vcombine.low %v600_v36, %v604_v37 }
 0x1df   : > { %3216 = vmatprep.subr.bf16.mxu0 %v4663_v44  ;;  %v612_v44 = vld [vmem:[#allocation5 + $0x6f0] sm:$0xff] }
 0x1e0   : > { %3364 = vmatpush1.bf16.msra.mxu1 %v4608_v43  ;;  %v608_v43 = vld [vmem:[#allocation5 + $0x6d0] sm:$0xff] }
 0x1e1   : > { %3365 = vmatprep.subr.bf16.mxu1 %v4617_v45  ;;  %v561_v45 = vld [vmem:[#allocation5 + $0x558] sm:$0xff]  ;;  %v4727_v49 = vcombine.high %v608_v43, %v612_v44  ;;  %v4726_v55 = vcombine.low %v608_v43, %v612_v44 }
 0x1e2   : > { %3217 = vmatpush1.bf16.msra.mxu0 %v4662_v50  ;;  %v4681_v50 = vcombine.high %v561_v45, %v565_v46  ;;  %v4680_v56 = vcombine.low %v561_v45, %v565_v46  ;;  %v617_v43 = vld [vmem:[#allocation5 + $0x718] sm:$0xff] }
 0x1e3   : > { %3218 = vmatprep.subr.bf16.mxu0 %v4671_v52  ;;  %v620_v52 = vld [vmem:[#allocation5 + $0x730] sm:$0xff]  ;;  %v621_v44 = vld [vmem:[#allocation5 + $0x738] sm:$0xff] }
 0x1e4   : > { %3366 = vmatpush1.bf16.msra.mxu1 %v4616_v51  ;;  %v616_v51 = vld [vmem:[#allocation5 + $0x710] sm:$0xff]  ;;  %v6020_v46 = vld [vmem:[%s5960_s22 + $0x14] ss:$28 sps:$4 sm:$0xff]  }
 0x1e5   : > { %3367 = vmatprep.subr.bf16.mxu1 %v4625_v53  ;;  %v569_v53 = vld [vmem:[#allocation5 + $0x598] sm:$0xff]  ;;  %v4735_v57 = vcombine.high %v616_v51, %v620_v52  ;;  %v4734_v63 = vcombine.low %v616_v51, %v620_v52  ;;  %v676_v51 = vld [vmem:[#allocation5 + $0x8f0] sm:$0xff] }
 0x1e6   : > { %3219 = vmatpush1.bf16.msra.mxu0 %v4670_v58  ;;  %v4689_v58 = vcombine.high %v569_v53, %v573_v54  ;;  %v4688_v1 = vcombine.low %v569_v53, %v573_v54  ;;  %v625_v52 = vld [vmem:[#allocation5 + $0x758] sm:$0xff] }
 0x1e7   : > { %3220 = vmatprep.subr.bf16.mxu0 %v4679_v60  ;;  %v628_v60 = vld [vmem:[#allocation5 + $0x770] sm:$0xff]  ;;  %v629_v53 = vld [vmem:[#allocation5 + $0x778] sm:$0xff] }
 0x1e8   : > { %3368 = vmatpush1.bf16.msra.mxu1 %v4624_v59  ;;  %v624_v59 = vld [vmem:[#allocation5 + $0x750] sm:$0xff] }
 0x1e9   : > { %3369 = vmatprep.subr.bf16.mxu1 %v4633_v61  ;;  %v577_v61 = vld [vmem:[#allocation5 + $0x5d8] sm:$0xff]  ;;  %v4743_v2 = vcombine.high %v624_v59, %v628_v60  ;;  %v4742_v11 = vcombine.low %v624_v59, %v628_v60  ;;  %v684_v59 = vld [vmem:[#allocation5 + $0x930] sm:$0xff] }
 0x1ea   : > { %3221 = vmatpush1.bf16.msra.mxu0 %v4678_v3  ;;  %v4697_v3 = vcombine.high %v577_v61, %v581_v62  ;;  %v4696_v12 = vcombine.low %v577_v61, %v581_v62  ;;  %v633_v60 = vld [vmem:[#allocation5 + $0x798] sm:$0xff] }
 0x1eb   : > { %3222 = vmatprep.subr.bf16.mxu0 %v4687_v6  ;;  %v636_v6 = vld [vmem:[#allocation5 + $0x7b0] sm:$0xff]  ;;  %v637_v61 = vld [vmem:[#allocation5 + $0x7b8] sm:$0xff] }
 0x1ec   : > { %3370 = vmatpush1.bf16.msra.mxu1 %v4632_v4  ;;  %v632_v4 = vld [vmem:[#allocation5 + $0x790] sm:$0xff] }
 0x1ed   : > { %3382 = vmatprep.subr.bf16.mxu1 %v4641_v7  ;;  %v585_v7 = vld [vmem:[#allocation5 + $0x618] sm:$0xff]  ;;  %v4751_v14 = vcombine.high %v632_v4, %v636_v6  ;;  %v4750_v20 = vcombine.low %v632_v4, %v636_v6  ;;  %v692_v4 = vld [vmem:[#allocation5 + $0x970] sm:$0xff] }
 0x1ee   : > { %3223 = vmatpush1.bf16.msra.mxu0 %v4686_v15  ;;  %v4705_v15 = vcombine.high %v585_v7, %v589_v9  ;;  %v4704_v21 = vcombine.low %v585_v7, %v589_v9  ;;  %v641_v6 = vld [vmem:[#allocation5 + $0x7d8] sm:$0xff] }
 0x1ef   : > { %3372 = vmatmul.mubr.bf16.vlgmr.msra.gmra.mrb[12].mxu1 %v6006_v30  ;;  %3224 = vmatprep.subr.bf16.mxu0 %v4695_v17  ;;  %v4711_v30 = vcombine.high %v592_v27, %v596_v28  ;;  %v644_v17 = vld [vmem:[#allocation5 + $0x7f0] sm:$0xff]  ;;  %v605_v27 = vld [vmem:[#allocation5 + $0x6b8] sm:$0xff] }
 0x1f0   : > { %3383 = vmatpush1.bf16.msra.mxu1 %v4640_v16  ;;  %3414 = vmatprep.mubr.bf16.mxu1 %v6010_v34  ;;  %v4719_v34 = vcombine.high %v600_v36, %v604_v37  ;;  %v640_v16 = vld [vmem:[#allocation5 + $0x7d0] sm:$0xff]  ;;  %v613_v36 = vld [vmem:[#allocation5 + $0x6f8] sm:$0xff] }
 0x1f1   : > { %3384 = vmatprep.subr.bf16.mxu1 %v4649_v18  ;;  %v593_v18 = vld [vmem:[#allocation5 + $0x658] sm:$0xff]  ;;  %v4759_v22 = vcombine.high %v640_v16, %v644_v17  ;;  %v4758_v28 = vcombine.low %v640_v16, %v644_v17  ;;  %v700_v16 = vld [vmem:[#allocation5 + $0x9b0] sm:$0xff] }
 0x1f2   : > { %3225 = vmatpush1.bf16.msra.mxu0 %v4694_v23  ;;  %v4713_v23 = vcombine.high %v593_v18, %v597_v19  ;;  %v4712_v29 = vcombine.low %v593_v18, %v597_v19  ;;  %v645_v7 = vld [vmem:[#allocation5 + $0x7f8] sm:$0xff] }
 0x1f3   : > { %3226 = vmatprep.subr.bf16.mxu0 %v4703_v25  ;;  %v652_v25 = vld [vmem:[#allocation5 + $0x830] sm:$0xff]  ;;  %v649_v17 = vld [vmem:[#allocation5 + $0x818] sm:$0xff] }
 0x1f4   : > { %3385 = vmatpush1.bf16.msra.mxu1 %v4648_v24  ;;  %v648_v24 = vld [vmem:[#allocation5 + $0x810] sm:$0xff]  ;;  %v653_v18 = vld [vmem:[#allocation5 + $0x838] sm:$0xff] }
 0x1f5   : > { %3386 = vmatprep.subr.bf16.mxu1 %v4657_v26  ;;  %v601_v26 = vld [vmem:[#allocation5 + $0x698] sm:$0xff]  ;;  %v4767_v31 = vcombine.high %v648_v24, %v652_v25  ;;  %v4766_v37 = vcombine.low %v648_v24, %v652_v25  ;;  %v708_v24 = vld [vmem:[#allocation5 + $0x9f0] sm:$0xff] }
 0x1f6   : > { %3227 = vmatpush1.bf16.msra.mxu0 %v4702_v32  ;;  %v4721_v32 = vcombine.high %v601_v26, %v605_v27  ;;  %v4720_v38 = vcombine.low %v601_v26, %v605_v27  ;;  %v657_v25 = vld [vmem:[#allocation5 + $0x858] sm:$0xff] }
 0x1f7   : > { %3228 = vmatprep.subr.bf16.mxu0 %v4711_v30  ;;  %v660_v30 = vld [vmem:[#allocation5 + $0x870] sm:$0xff]  ;;  %v661_v26 = vld [vmem:[#allocation5 + $0x878] sm:$0xff] }
 0x1f8   : > { %3387 = vmatpush1.bf16.msra.mxu1 %v4656_v33  ;;  %v656_v33 = vld [vmem:[#allocation5 + $0x850] sm:$0xff] }
 0x1f9   : > { %3388 = vmatprep.subr.bf16.mxu1 %v4665_v35  ;;  %v609_v35 = vld [vmem:[#allocation5 + $0x6d8] sm:$0xff]  ;;  %v4775_v39 = vcombine.high %v656_v33, %v660_v30  ;;  %v4774_v45 = vcombine.low %v656_v33, %v660_v30  ;;  %v716_v33 = vld [vmem:[#allocation5 + $0xa30] sm:$0xff] }
 0x1fa   : > { %3229 = vmatpush1.bf16.msra.mxu0 %v4710_v40  ;;  %v4729_v40 = vcombine.high %v609_v35, %v613_v36  ;;  %v665_v30 = vld [vmem:[#allocation5 + $0x898] sm:$0xff] }
 0x1fb   : > { %3230 = vmatprep.subr.bf16.mxu0 %v4719_v34  ;;  %v668_v34 = vld [vmem:[#allocation5 + $0x8b0] sm:$0xff] }
 0x1fc   : > { %3389 = vmatpush1.bf16.msra.mxu1 %v4664_v41  ;;  %v664_v41 = vld [vmem:[#allocation5 + $0x890] sm:$0xff] }
 0x1fd   : > { %3390 = vmatprep.subr.bf16.mxu1 %v4673_v42  ;;  %v6016_v42 = vld [vmem:[%s5960_s22 + $0x8] ss:$28 sps:$4 sm:$0xff]   ;;  %v4782_v54 = vcombine.low %v664_v41, %v668_v34 }
 0x1fe   : > { %3231 = vmatpush1.bf16.msra.mxu0 %v4718_v47  ;;  %v4728_v47 = vcombine.low %v609_v35, %v613_v36  ;;  %v669_v35 = vld [vmem:[#allocation5 + $0x8b8] sm:$0xff] }
 0x1ff   : > { %3232 = vmatprep.subr.bf16.mxu0 %v4727_v49  ;;  %v4737_v49 = vcombine.high %v617_v43, %v621_v44 }
 0x200   : > { %3391 = vmatpush1.bf16.msra.mxu1 %v4672_v48  ;;  %v4783_v48 = vcombine.high %v664_v41, %v668_v34  ;;  %v724_v41 = vld [vmem:[#allocation5 + $0xa70] sm:$0xff]  ;;  %v673_v34 = vld [vmem:[#allocation5 + $0x8d8] sm:$0xff] }
 0x201   : > { %3392 = vmatprep.subr.bf16.mxu1 %v4681_v50  ;;  %v672_v50 = vld [vmem:[#allocation5 + $0x8d0] sm:$0xff] }
 0x202   : > { %3233 = vmatpush1.bf16.msra.mxu0 %v4726_v55  ;;  %v4736_v55 = vcombine.low %v617_v43, %v621_v44  ;;  %v4790_v62 = vcombine.low %v672_v50, %v676_v51  ;;  %v677_v43 = vld [vmem:[#allocation5 + $0x8f8] sm:$0xff] }
 0x203   : > { %3234 = vmatprep.subr.bf16.mxu0 %v4735_v57  ;;  %v4745_v57 = vcombine.high %v625_v52, %v629_v53 }
 0x204   : > { %3393 = vmatpush1.bf16.msra.mxu1 %v4680_v56  ;;  %v4791_v56 = vcombine.high %v672_v50, %v676_v51  ;;  %v681_v50 = vld [vmem:[#allocation5 + $0x918] sm:$0xff] }
 0x205   : > { %3394 = vmatprep.subr.bf16.mxu1 %v4689_v58  ;;  %v680_v58 = vld [vmem:[#allocation5 + $0x910] sm:$0xff]  ;;  %v685_v51 = vld [vmem:[#allocation5 + $0x938] sm:$0xff] }
 0x206   : > { %3235 = vmatpush1.bf16.msra.mxu0 %v4734_v63  ;;  %v4744_v63 = vcombine.low %v625_v52, %v629_v53  ;;  %v4798_v9 = vcombine.low %v680_v58, %v684_v59  ;;  %v4792_v53 = vcombine.low %v673_v34, %v677_v43 }
 0x207   : > { %3236 = vmatprep.subr.bf16.mxu0 %v4743_v2  ;;  %v4753_v2 = vcombine.high %v633_v60, %v637_v61 }
 0x208   : > { %3395 = vmatpush1.bf16.msra.mxu1 %v4688_v1  ;;  %v4799_v1 = vcombine.high %v680_v58, %v684_v59  ;;  %v693_v58 = vld [vmem:[#allocation5 + $0x978] sm:$0xff] }
 0x209   : > { %3396 = vmatprep.subr.bf16.mxu1 %v4697_v3  ;;  %v688_v3 = vld [vmem:[#allocation5 + $0x950] sm:$0xff] }
 0x20a   : > { %3237 = vmatpush1.bf16.msra.mxu0 %v4742_v11  ;;  %v4752_v11 = vcombine.low %v633_v60, %v637_v61  ;;  %v4806_v19 = vcombine.low %v688_v3, %v692_v4  ;;  %v4800_v60 = vcombine.low %v681_v50, %v685_v51 }
 0x20b   : > { %3238 = vmatprep.subr.bf16.mxu0 %v4751_v14  ;;  %v4761_v14 = vcombine.high %v641_v6, %v645_v7 }
 0x20c   : > { %3397 = vmatpush1.bf16.msra.mxu1 %v4696_v12  ;;  %v4807_v12 = vcombine.high %v688_v3, %v692_v4  ;;  %v701_v3 = vld [vmem:[#allocation5 + $0x9b8] sm:$0xff] }
 0x20d   : > { %3398 = vmatprep.subr.bf16.mxu1 %v4705_v15  ;;  %v696_v15 = vld [vmem:[#allocation5 + $0x990] sm:$0xff] }
 0x20e   : > { %3239 = vmatpush1.bf16.msra.mxu0 %v4750_v20  ;;  %v4760_v20 = vcombine.low %v641_v6, %v645_v7  ;;  %v4814_v27 = vcombine.low %v696_v15, %v700_v16 }
 0x20f   : > { %3240 = vmatprep.subr.bf16.mxu0 %v4759_v22  ;;  %v4769_v22 = vcombine.high %v649_v17, %v653_v18 }
 0x210   : > { %3399 = vmatpush1.bf16.msra.mxu1 %v4704_v21  ;;  %v4815_v21 = vcombine.high %v696_v15, %v700_v16  ;;  %v709_v15 = vld [vmem:[#allocation5 + $0x9f8] sm:$0xff] }
 0x211   : > { %3400 = vmatprep.subr.bf16.mxu1 %v4713_v23  ;;  %v704_v23 = vld [vmem:[#allocation5 + $0x9d0] sm:$0xff] }
 0x212   : > { %3241 = vmatpush1.bf16.msra.mxu0 %v4758_v28  ;;  %v4768_v28 = vcombine.low %v649_v17, %v653_v18  ;;  %v4822_v36 = vcombine.low %v704_v23, %v708_v24 }
 0x213   : > { %3253 = vmatprep.subr.bf16.mxu0 %v4767_v31  ;;  %v4777_v31 = vcombine.high %v657_v25, %v661_v26 }
 0x214   : > { %3401 = vmatpush1.bf16.msra.mxu1 %v4712_v29  ;;  %v4823_v29 = vcombine.high %v704_v23, %v708_v24  ;;  %v717_v23 = vld [vmem:[#allocation5 + $0xa38] sm:$0xff] }
 0x215   : > { %3402 = vmatprep.subr.bf16.mxu1 %v4721_v32  ;;  %3243 = vmatmul.mubr.bf16.vlgmr.msra.gmra.mrb[4].mxu0 %v6016_v42  ;;  %v712_v32 = vld [vmem:[#allocation5 + $0xa10] sm:$0xff] }
 0x216   : > { %3254 = vmatpush1.bf16.msra.mxu0 %v4766_v37  ;;  %3285 = vmatprep.mubr.bf16.mxu0 %v6020_v46  ;;  %v4776_v37 = vcombine.low %v657_v25, %v661_v26  ;;  %v4830_v44 = vcombine.low %v712_v32, %v716_v33 }
 0x217   : > { %3255 = vmatprep.subr.bf16.mxu0 %v4775_v39  ;;  %v4785_v39 = vcombine.high %v665_v30, %v669_v35 }
 0x218   : > { %3403 = vmatpush1.bf16.msra.mxu1 %v4720_v38  ;;  %v4831_v38 = vcombine.high %v712_v32, %v716_v33  ;;  %v725_v32 = vld [vmem:[#allocation5 + $0xa78] sm:$0xff] }
 0x219   : > { %3404 = vmatprep.subr.bf16.mxu1 %v4729_v40  ;;  %v720_v40 = vld [vmem:[#allocation5 + $0xa50] sm:$0xff] }
 0x21a   : > { %3256 = vmatpush1.bf16.msra.mxu0 %v4774_v45  ;;  %v4784_v45 = vcombine.low %v665_v30, %v669_v35  ;;  %v4838_v52 = vcombine.low %v720_v40, %v724_v41 }
 0x21b   : > { %3257 = vmatprep.subr.bf16.mxu0 %v4783_v48  ;;  %v728_v48 = vld [vmem:[#allocation5 + $0xa90] sm:$0xff] }
 0x21c   : > { %3405 = vmatpush1.bf16.msra.mxu1 %v4728_v47  ;;  %v4793_v47 = vcombine.high %v673_v34, %v677_v43  ;;  %v737_v43 = vld [vmem:[#allocation5 + $0xad8] sm:$0xff] }
 0x21d   : > { %3406 = vmatprep.subr.bf16.mxu1 %v4737_v49  ;;  %v732_v49 = vld [vmem:[#allocation5 + $0xab0] sm:$0xff] }
 0x21e   : > { %3258 = vmatpush1.bf16.msra.mxu0 %v4782_v54  ;;  %v4801_v54 = vcombine.high %v681_v50, %v685_v51  ;;  %v4846_v59 = vcombine.low %v728_v48, %v732_v49  ;;  %v745_v50 = vld [vmem:[#allocation5 + $0xb18] sm:$0xff] }
 0x21f   : > { %3259 = vmatprep.subr.bf16.mxu0 %v4791_v56  ;;  %v740_v56 = vld [vmem:[#allocation5 + $0xaf0] sm:$0xff]  ;;  %v749_v51 = vld [vmem:[#allocation5 + $0xb38] sm:$0xff] }
 0x220   : > { %3407 = vmatpush1.bf16.msra.mxu1 %v4736_v55  ;;  %v736_v55 = vld [vmem:[#allocation5 + $0xad0] sm:$0xff] }
 0x221   : > { %3408 = vmatprep.subr.bf16.mxu1 %v4745_v57  ;;  %v689_v57 = vld [vmem:[#allocation5 + $0x958] sm:$0xff]  ;;  %v4855_v61 = vcombine.high %v736_v55, %v740_v56  ;;  %v4854_v4 = vcombine.low %v736_v55, %v740_v56 }
 0x222   : > { %3260 = vmatpush1.bf16.msra.mxu0 %v4790_v62  ;;  %v4809_v62 = vcombine.high %v689_v57, %v693_v58  ;;  %v4808_v6 = vcombine.low %v689_v57, %v693_v58  ;;  %v753_v55 = vld [vmem:[#allocation5 + $0xb58] sm:$0xff]  ;;  %v784_v57 = vlaneseq }
 0x223   : > { %3261 = vmatprep.subr.bf16.mxu0 %v4799_v1  ;;  %v748_v1 = vld [vmem:[#allocation5 + $0xb30] sm:$0xff]  ;;  %v757_v56 = vld [vmem:[#allocation5 + $0xb78] sm:$0xff] }
 0x224   : > { %3409 = vmatpush1.bf16.msra.mxu1 %v4744_v63  ;;  %v744_v63 = vld [vmem:[#allocation5 + $0xb10] sm:$0xff]  ;;  %v5299_v58 = vld [vmem:[#allocation8 + $0x10] sm:$0xff]  }
 0x225   : > { %3410 = vmatprep.subr.bf16.mxu1 %v4753_v2  ;;  %v697_v2 = vld [vmem:[#allocation5 + $0x998] sm:$0xff]  ;;  %v4863_v7 = vcombine.high %v744_v63, %v748_v1  ;;  %v4862_v16 = vcombine.low %v744_v63, %v748_v1  ;;  %v6029_v1 = vshrl.u32 %v784_v57, 7 }
 0x226   : > { %3262 = vmatpush1.bf16.msra.mxu0 %v4798_v9  ;;  %v4817_v9 = vcombine.high %v697_v2, %v701_v3  ;;  %v4816_v17 = vcombine.low %v697_v2, %v701_v3  ;;  %v765_v63 = vld [vmem:[#allocation5 + $0xbb8] sm:$0xff]  ;;  %v5301_v2 = vld [vmem:[#allocation8 + $0x18] sm:$0xff]   ;;  %v4872_v3 = vcombine.low %v753_v55, %v757_v56 }
 0x227   : > { %3263 = vmatprep.subr.bf16.mxu0 %v4807_v12  ;;  %v756_v12 = vld [vmem:[#allocation5 + $0xb70] sm:$0xff] }
 0x228   : > { %3411 = vmatpush1.bf16.msra.mxu1 %v4752_v11  ;;  %v752_v11 = vld [vmem:[#allocation5 + $0xb50] sm:$0xff] }
 0x229   : > { %3412 = vmatprep.subr.bf16.mxu1 %v4761_v14  ;;  %v705_v14 = vld [vmem:[#allocation5 + $0x9d8] sm:$0xff]  ;;  %v4871_v18 = vcombine.high %v752_v11, %v756_v12  ;;  %v4870_v24 = vcombine.low %v752_v11, %v756_v12  ;;  %v5303_v12 = vld [vmem:[#allocation8 + $0x20] sm:$0xff]  }
 0x22a   : > { %3264 = vmatpush1.bf16.msra.mxu0 %v4806_v19  ;;  %v4825_v19 = vcombine.high %v705_v14, %v709_v15  ;;  %v4824_v25 = vcombine.low %v705_v14, %v709_v15  ;;  %v773_v11 = vld [vmem:[#allocation5 + $0xbf8] sm:$0xff]  ;;  %v6032_v14 = vld [vmem:[#allocation7] sm:$0xff]  ;;  %v790_v15 = vsub.s32 1, %v6029_v1 }
 0x22b   : > { %3265 = vmatprep.subr.bf16.mxu0 %v4815_v21  ;;  %v764_v21 = vld [vmem:[#allocation5 + $0xbb0] sm:$0xff] }
 0x22c   : > { %3413 = vmatpush1.bf16.msra.mxu1 %v4760_v20  ;;  %v760_v20 = vld [vmem:[#allocation5 + $0xb90] sm:$0xff] }
 0x22d   : > { %3425 = vmatprep.subr.bf16.mxu1 %v4769_v22  ;;  %v713_v22 = vld [vmem:[#allocation5 + $0xa18] sm:$0xff]  ;;  %v4879_v26 = vcombine.high %v760_v20, %v764_v21  ;;  %v4878_v33 = vcombine.low %v760_v20, %v764_v21 }
 0x22e   : > { %3266 = vmatpush1.bf16.msra.mxu0 %v4814_v27  ;;  %v4833_v27 = vcombine.high %v713_v22, %v717_v23  ;;  %v4832_v30 = vcombine.low %v713_v22, %v717_v23  ;;  %v777_v20 = vld [vmem:[#allocation5 + $0xc18] sm:$0xff]  ;;  %v791_v22 = vrot.slane %v6032_v14, %v790_v15  ;;  %v5305_v23 = vld [vmem:[#allocation8 + $0x28] sm:$0xff]  }
 0x22f   : > { %3415 = vmatmul.mubr.bf16.vlgmr.msra.gmra.mrb[12].mxu1 %v6016_v42  ;;  %3267 = vmatprep.subr.bf16.mxu0 %v4823_v29  ;;  %v4839_v42 = vcombine.high %v720_v40, %v724_v41  ;;  %v772_v29 = vld [vmem:[#allocation5 + $0xbf0] sm:$0xff]  ;;  %v5294_v41 = vld [vmem:[#allocation8 + $0x40] sm:$0xff]   ;;  %v781_v21 = vld [vmem:[#allocation5 + $0xc38] sm:$0xff] }
 0x230   : > { %3426 = vmatpush1.bf16.msra.mxu1 %v4768_v28  ;;  %3457 = vmatprep.mubr.bf16.mxu1 %v6020_v46  ;;  %v4847_v46 = vcombine.high %v728_v48, %v732_v49  ;;  %v768_v28 = vld [vmem:[#allocation5 + $0xbd0] sm:$0xff] }
 0x231   : > { %3427 = vmatprep.subr.bf16.mxu1 %v4777_v31  ;;  %v721_v31 = vld [vmem:[#allocation5 + $0xa58] sm:$0xff]  ;;  %v4887_v35 = vcombine.high %v768_v28, %v772_v29 }
 0x232   : > { %3268 = vmatpush1.bf16.msra.mxu0 %v4822_v36  ;;  %v4841_v36 = vcombine.high %v721_v31, %v725_v32  ;;  %v4840_v40 = vcombine.low %v721_v31, %v725_v32  ;;  %v6026_v49 = vld [vmem:[%s5960_s22 + $0x10] ss:$28 sps:$4 sm:$0xff]  }
 0x233   : > { %3269 = vmatprep.subr.bf16.mxu0 %v4831_v38  ;;  %v733_v38 = vld [vmem:[#allocation5 + $0xab8] sm:$0xff] }
 0x234   : > { %3428 = vmatpush1.bf16.msra.mxu1 %v4776_v37  ;;  %v729_v37 = vld [vmem:[#allocation5 + $0xa98] sm:$0xff] }
 0x235   : > { %3429 = vmatprep.subr.bf16.mxu1 %v4785_v39  ;;  %v4886_v39 = vcombine.low %v768_v28, %v772_v29  ;;  %v4849_v34 = vcombine.high %v729_v37, %v733_v38 }
 0x236   : > { %3270 = vmatpush1.bf16.msra.mxu0 %v4830_v44  ;;  %v741_v44 = vld [vmem:[#allocation5 + $0xaf8] sm:$0xff] }
 0x237   : > { %3271 = vmatprep.subr.bf16.mxu0 %v4839_v42  ;;  %v4848_v42 = vcombine.low %v729_v37, %v733_v38  ;;  %v4857_v48 = vcombine.high %v737_v43, %v741_v44  ;;  %v4896_v37 = vcombine.low %v777_v20, %v781_v21  ;;  %v5308_v38 = vld [vmem:[#allocation8 + $0x78] sm:$0xff]  }
 0x238   : > { %3430 = vmatpush1.bf16.msra.mxu1 %v4784_v45  ;;  %v5295_v45 = vld [vmem:[#allocation8] sm:$0xff]  }
 0x239   : > { %3431 = vmatprep.subr.bf16.mxu1 %v4793_v47  ;;  %v5296_v47 = vld [vmem:[#allocation8 + $0x48] sm:$0xff]  }
 0x23a   : > { %3272 = vmatpush1.bf16.msra.mxu0 %v4838_v52  ;;  %v5297_v52 = vld [vmem:[#allocation8 + $0x8] sm:$0xff]  }
 0x23b   : > { %3273 = vmatprep.subr.bf16.mxu0 %v4847_v46  ;;  %v5298_v46 = vld [vmem:[#allocation8 + $0x50] sm:$0xff]  }
 0x23c   : > { %3432 = vmatpush1.bf16.msra.mxu1 %v4792_v53  ;;  %v4856_v53 = vcombine.low %v737_v43, %v741_v44  ;;  %v5309_v44 = vld [vmem:[#allocation8 + $0x38] sm:$0xff]  }
 0x23d   : > { %3433 = vmatprep.subr.bf16.mxu1 %v4801_v54  ;;  %v4865_v54 = vcombine.high %v745_v50, %v749_v51 }
 0x23e   : > { %3274 = vmatpush1.bf16.msra.mxu0 %v4846_v59  ;;  %v4864_v59 = vcombine.low %v745_v50, %v749_v51  ;;  %v5328_v51 = vld [vmem:[#allocation8 + $0x148] sm:$0xff]  }
 0x23f   : > { %3275 = vmatprep.subr.bf16.mxu0 %v4855_v61  ;;  %v4873_v61 = vcombine.high %v753_v55, %v757_v56  ;;  %v5312_v55 = vld [vmem:[#allocation8 + $0xc8] sm:$0xff]  }
 0x240   : > { %3434 = vmatpush1.bf16.msra.mxu1 %v4800_v60  ;;  %v5300_v60 = vld [vmem:[#allocation8 + $0x58] sm:$0xff]  }
 0x241   : > { %3435 = vmatprep.subr.bf16.mxu1 %v4809_v62  ;;  %v761_v62 = vld [vmem:[#allocation5 + $0xb98] sm:$0xff] }
 0x242   : > { %3276 = vmatpush1.bf16.msra.mxu0 %v4854_v4  ;;  %v5302_v4 = vld [vmem:[#allocation8 + $0x60] sm:$0xff]  }
 0x243   : > { %3277 = vmatprep.subr.bf16.mxu0 %v4863_v7  ;;  %v786_v7 = vsub.s32 0, %v6029_v1 }
 0x244   : > { %3436 = vmatpush1.bf16.msra.mxu1 %v4808_v6  ;;  %v4881_v6 = vcombine.high %v761_v62, %v765_v63 }
 0x245   : > { %3437 = vmatprep.subr.bf16.mxu1 %v4817_v9  ;;  %v769_v9 = vld [vmem:[#allocation5 + $0xbd8] sm:$0xff] }
 0x246   : > { %3278 = vmatpush1.bf16.msra.mxu0 %v4862_v16  ;;  %v4880_v16 = vcombine.low %v761_v62, %v765_v63  ;;  %v5313_v63 = vld [vmem:[#allocation8 + $0x88] sm:$0xff]  }
 0x247   : > { %3279 = vmatprep.subr.bf16.mxu0 %v4871_v18  ;;  %v4889_v18 = vcombine.high %v769_v9, %v773_v11 }
 0x248   : > { %3438 = vmatpush1.bf16.msra.mxu1 %v4816_v17  ;;  %v5304_v17 = vld [vmem:[#allocation8 + $0x68] sm:$0xff]  }
 0x249   : > { %3439 = vmatprep.subr.bf16.mxu1 %v4825_v19  ;;  %v787_v19 = vrot.slane %v6032_v14, %v786_v7 }
 0x24a   : > { %3280 = vmatpush1.bf16.msra.mxu0 %v4870_v24  ;;  %v4888_v24 = vcombine.low %v769_v9, %v773_v11 }
 0x24b   : > { %3281 = vmatprep.subr.bf16.mxu0 %v4879_v26 }
 0x24c   : > { %3440 = vmatpush1.bf16.msra.mxu1 %v4824_v25  ;;  %v5306_v25 = vld [vmem:[#allocation8 + $0x70] sm:$0xff]  }
 0x24d   : > { %3441 = vmatprep.subr.bf16.mxu1 %v4833_v27  ;;  %v4897_v27 = vcombine.high %v777_v20, %v781_v21  ;;  %v5334_v20 = vld [vmem:[#allocation8 + $0x160] sm:$0xff]  }
 0x24e   : > { %3282 = vmatpush1.bf16.msra.mxu0 %v4878_v33  ;;  %v5307_v33 = vld [vmem:[#allocation8 + $0x30] sm:$0xff]  }
 0x24f   : > { %3283 = vmatprep.subr.bf16.mxu0 %v4887_v35 }
 0x250   : > { %3442 = vmatpush1.bf16.msra.mxu1 %v4832_v30 }
 0x251   : > { %3443 = vmatprep.subr.bf16.mxu1 %v4841_v36 }
 0x252   : > { %3284 = vmatpush1.bf16.msra.mxu0 %v4886_v39 }
 0x253   : > { %4982 = vmatprep.subr.bf16.mxu0 %v5294_v41  ;;  %v5310_v41 = vld [vmem:[#allocation8 + $0xc0] sm:$0xff]  }
 0x254   : > { %3444 = vmatpush1.bf16.msra.mxu1 %v4840_v40 }
 0x255   : > { %3445 = vmatprep.subr.bf16.mxu1 %v4849_v34  ;;  %3286 = vmatmul.mubr.bf16.vlgmr.msra.gmra.mrb[4].mxu0 %v6026_v49 }
 0x256   : > { %4983 = vmatpush3.bf16.msra.mxu0 %v5295_v45 }
 0x257   : > { %4984 = vmatprep.subr.bf16.mxu0 %v5296_v47 }
 0x258   : > { %3446 = vmatpush1.bf16.msra.mxu1 %v4848_v42  ;;  %v5326_v42 = vld [vmem:[#allocation8 + $0x140] sm:$0xff]  }
 0x259   : > { %3447 = vmatprep.subr.bf16.mxu1 %v4857_v48 }
 0x25a   : > { %4985 = vmatpush3.bf16.msra.mxu0 %v5297_v52 }
 0x25b   : > { %4986 = vmatprep.subr.bf16.mxu0 %v5298_v46  ;;  %v5311_v46 = vld [vmem:[#allocation8 + $0x80] sm:$0xff]  }
 0x25c   : > { %3448 = vmatpush1.bf16.msra.mxu1 %v4856_v53  ;;  %v5329_v53 = vld [vmem:[#allocation8 + $0x108] sm:$0xff]  }
 0x25d   : > { %3449 = vmatprep.subr.bf16.mxu1 %v4865_v54  ;;  %v5330_v54 = vld [vmem:[#allocation8 + $0x150] sm:$0xff]  }
 0x25e   : > { %4987 = vmatpush3.bf16.msra.mxu0 %v5299_v58  ;;  %v5373_v58 = vld [vmem:[%s5960_s22 + $0x18] ss:$28 sps:$4 sm:$0xff]  }
 0x25f   : > { %4988 = vmatprep.subr.bf16.mxu0 %v5300_v60  ;;  %v5331_v60 = vld [vmem:[#allocation8 + $0x110] sm:$0xff]  }
 0x260   : > { %3450 = vmatpush1.bf16.msra.mxu1 %v4864_v59 }
 0x261   : > { %3451 = vmatprep.subr.bf16.mxu1 %v4873_v61 }
 0x262   : > { %4989 = vmatpush3.bf16.msra.mxu0 %v5301_v2  ;;  %v5332_v2 = vld [vmem:[#allocation8 + $0x158] sm:$0xff]  }
 0x263   : > { %4990 = vmatprep.subr.bf16.mxu0 %v5302_v4 }
 0x264   : > { %3452 = vmatpush1.bf16.msra.mxu1 %v4872_v3 }
 0x265   : > { %3453 = vmatprep.subr.bf16.mxu1 %v4881_v6  ;;  %v5314_v6 = vld [vmem:[#allocation8 + $0xd0] sm:$0xff]  }
 0x266   : > { %4991 = vmatpush3.bf16.msra.mxu0 %v5303_v12  ;;  %v5333_v12 = vld [vmem:[#allocation8 + $0x118] sm:$0xff]  }
 0x267   : > { %4992 = vmatprep.subr.bf16.mxu0 %v5304_v17  ;;  %v5315_v17 = vld [vmem:[#allocation8 + $0x90] sm:$0xff]  }
 0x268   : > { %3454 = vmatpush1.bf16.msra.mxu1 %v4880_v16  ;;  %v2943_v26 = vpop.f32.mrb[0].mxu0 }
 0x269   : > { %3455 = vmatprep.subr.bf16.mxu1 %v4889_v18  ;;  %v5099_v28 = vadd.f32 %v2943_v26, %v787_v19  ;;  %v2945_v29 = vpop.f32.mrb[1].mxu0  ;;  %v5317_v26 = vld [vmem:[#allocation8 + $0x98] sm:$0xff]  }
 0x26a   : > { %v5101_v31 = vadd.f32 %v2945_v29, %v791_v22  ;;  %v2947_v32 = vpop.f32.mrb[2].mxu0  ;;  %4993 = vmatpush3.bf16.msra.mxu0 %v5305_v23  ;;  %v5319_v29 = vld [vmem:[#allocation8 + $0xa0] sm:$0xff]  }
 0x26b   : > { %v5100_v30 = vadd.f32 %v5099_v28, %v5995_v5  ;;  %v5103_v35 = vadd.f32 %v2947_v32, %v787_v19  ;;  %v2949_v36 = vpop.f32.mrb[3].mxu0  ;;  %4994 = vmatprep.subr.bf16.mxu0 %v5306_v25  ;;  %v5316_v19 = vld [vmem:[#allocation8 + $0xd8] sm:$0xff]   ;;  %v5318_v28 = vld [vmem:[#allocation8 + $0xe0] sm:$0xff]   ;;  %v5321_v32 = vld [vmem:[#allocation8 + $0xa8] sm:$0xff]  }
 0x26c   : > { %3456 = vmatpush1.bf16.msra.mxu1 %v4888_v24  ;;  %v5102_v39 = vadd.f32 %v5101_v31, %v5997_v8  ;;  %v5105_v40 = vadd.f32 %v2949_v36, %v791_v22  ;;  %v5335_v24 = vld [vmem:[#allocation8 + $0x120] sm:$0xff]   ;;  %v5320_v31 = vld [vmem:[#allocation8 + $0xe8] sm:$0xff]   ;;  %v5325_v36 = vld [vmem:[#allocation8 + $0xb8] sm:$0xff]  }
 0x26d   : > { %3468 = vmatprep.subr.bf16.mxu1 %v4897_v27  ;;  %v5104_v34 = vadd.f32 %v5103_v35, %v6000_v10  ;;  %v3511_v5 = vmax.f32 %v5100_v30, 0.0  ;;  %v794_v10 = vsub.s32 2, %v6029_v1  ;;  %v5323_v30 = vld [vmem:[#allocation8 + $0xb0] sm:$0xff]   ;;  %v5324_v35 = vld [vmem:[#allocation8 + $0xf8] sm:$0xff]  }
 0x26e   : > { %v5106_v43 = vadd.f32 %v5105_v40, %v6002_v13  ;;  %4995 = vmatpush3.bf16.msra.mxu0 %v5307_v33  ;;  %v3512_v47 = vmax.f32 %v5102_v39, 0.0  ;;  %v5327_v13 = vld [vmem:[#allocation8 + $0x100] sm:$0xff]   ;;  %v5322_v33 = vld [vmem:[#allocation8 + $0xf0] sm:$0xff]  }
 0x26f   : > { %3458 = vmatmul.mubr.bf16.vlgmr.msra.gmra.mrb[12].mxu1 %v6026_v49  ;;  %v3519_v45 = vmax.f32 %v5104_v34, 0.0  ;;  %4996 = vmatprep.subr.bf16.mxu0 %v5308_v38  ;;  %v798_v49 = vsub.s32 3, %v6029_v1  ;;  %v795_v52 = vrot.slane %v6032_v14, %v794_v10  ;;  %v5337_v38 = vld [vmem:[#allocation8 + $0x128] sm:$0xff]   ;;  %v5338_v39 = vld [vmem:[#allocation8 + $0x170] sm:$0xff]   ;;  %v5341_v34 = vld [vmem:[#allocation8 + $0x138] sm:$0xff]  }
 0x270   : > { %3469 = vmatpush1.bf16.msra.mxu1 %v4896_v37  ;;  %v3520_v48 = vmax.f32 %v5106_v43, 0.0  ;;  %3500 = vmatprep.mubr.bf16.mxu1 %v5665_v0  ;;  %v5336_v37 = vld [vmem:[#allocation8 + $0x168] sm:$0xff]   ;;  %v5339_v40 = vld [vmem:[#allocation8 + $0x130] sm:$0xff]   ;;  %v5342_v43 = vld [vmem:[#allocation8 + $0x1c0] sm:$0xff]  }
 0x271   : > { %5004 = vmatprep.subr.bf16.mxu1 %v5310_v41  ;;  %v3527_v8 = vpack.c.bf16 %v3519_v45, %v3511_v5  ;;  %v799_v0 = vrot.slane %v6032_v14, %v798_v49  ;;  %v5340_v41 = vld [vmem:[#allocation8 + $0x178] sm:$0xff]   ;;  %v5344_v5 = vld [vmem:[#allocation8 + $0x1c8] sm:$0xff]   ;;  %v5351_v10 = vld [vmem:[#allocation8 + $0x1a0] sm:$0xff]  }
 0x272   : > { %4997 = vmatpush3.bf16.msra.mxu0 %v5309_v44  ;;  %v3528_v50 = vpack.c.bf16 %v3520_v48, %v3512_v47  ;;  %v5343_v44 = vld [vmem:[#allocation8 + $0x180] sm:$0xff]   ;;  %v5345_v45 = vld [vmem:[#allocation8 + $0x188] sm:$0xff]   ;;  %v5347_v47 = vld [vmem:[#allocation8 + $0x190] sm:$0xff]  }
 0x273   : > { %5026 = vmatprep.subr.bf16.mxu0 %v5326_v42  ;;  %v5346_v42 = vld [vmem:[#allocation8 + $0x1d0] sm:$0xff]   ;;  %v5348_v48 = vld [vmem:[#allocation8 + $0x1d8] sm:$0xff]   ;;  %v5353_v49 = vld [vmem:[#allocation8 + $0x1a8] sm:$0xff]  }
 0x274   : > { %4086 = vmatprep.mubr.bf16.mxu0 %v3528_v50  ;;  %v5350_v50 = vld [vmem:[#allocation8 + $0x1e0] sm:$0xff]  }
 0x275   : > { %4087 = vmatmul.mubr.bf16.vlgmr.msra.gmra.mrb[8].mxu0 %v3527_v8  ;;  %v5349_v8 = vld [vmem:[#allocation8 + $0x198] sm:$0xff]  }
 0x276   : > { %5027 = vmatpush3.bf16.msra.mxu0 %v5327_v13  ;;  %v5352_v13 = vld [vmem:[#allocation8 + $0x1e8] sm:$0xff]  }
 0x277   : > { %5028 = vmatprep.subr.bf16.mxu0 %v5328_v51  ;;  %v5354_v51 = vld [vmem:[#allocation8 + $0x1f0] sm:$0xff]  }
 0x27a   : > { %v3158_v56 = vpop.f32.mrb[4].mxu1  ;;  %5029 = vmatpush3.bf16.msra.mxu0 %v5329_v53  ;;  %v5356_v53 = vld [vmem:[#allocation8 + $0x1f8] sm:$0xff]  }
 0x27b   : > { %v5107_v57 = vadd.f32 %v3158_v56, %v795_v52  ;;  %4901 = vmatmul.mubr.msk.bf16.vlgmr.msra.gmra.mrb[12].mxu1 %vm2819_vm0, %v5373_v58  ;;  %v3160_v59 = vpop.f32.mrb[5].mxu1  ;;  %5030 = vmatprep.subr.bf16.mxu0 %v5330_v54  ;;  %v806_v54 = vsub.s32 5, %v6029_v1 }
 0x27c   : > { %5005 = vmatpush3.bf16.msra.mxu1 %v5311_v46  ;;  %v5108_v61 = vadd.f32 %v3160_v59, %v799_v0  ;;  %v3162_v62 = vpop.f32.mrb[6].mxu1  ;;  %v5357_v46 = vld [vmem:[#allocation8 + $0x1b8] sm:$0xff]  }
 0x27d   : > { %v5109_v3 = vadd.f32 %v3162_v62, %v795_v52  ;;  %v3164_v4 = vpop.f32.mrb[7].mxu1  ;;  %5006 = vmatprep.subr.bf16.mxu1 %v5312_v55  ;;  %v3513_v9 = vmax.f32 %v5107_v57, 0.0  ;;  %v5355_v52 = vld [vmem:[#allocation8 + $0x1b0] sm:$0xff]   ;;  %v807_v56 = vrot.slane %v6032_v14, %v806_v54  ;;  %v5365_v54 = vld [vmem:[#allocation11 + $0x38] sm:$0xff]  }
 0x27e   : > { %v5110_v7 = vadd.f32 %v3164_v4, %v799_v0  ;;  %5031 = vmatpush3.bf16.msra.mxu0 %v5331_v60  ;;  %v3514_v15 = vmax.f32 %v5108_v61, 0.0  ;;  %v802_v0 = vsub.s32 4, %v6029_v1 }
 0x27f   : > { %v3521_v11 = vmax.f32 %v5109_v3, 0.0  ;;  %5032 = vmatprep.subr.bf16.mxu0 %v5332_v2 }
 0x280   : > { %v3522_v16 = vmax.f32 %v5110_v7, 0.0  ;;  %5007 = vmatpush3.bf16.msra.mxu1 %v5313_v63  ;;  %v803_v55 = vrot.slane %v6032_v14, %v802_v0  ;;  %v5364_v0 = vld [vmem:[#allocation11 + $0x30] sm:$0xff]  }
 0x281   : > { %v3529_v18 = vpack.c.bf16 %v3521_v11, %v3513_v9  ;;  %5008 = vmatprep.subr.bf16.mxu1 %v5314_v6 }
 0x282   : > { %v3530_v21 = vpack.c.bf16 %v3522_v16, %v3514_v15  ;;  %v6049_v22 = vpop.f32.mrb[8].mxu1  ;;  %5033 = vmatpush3.bf16.msra.mxu0 %v5333_v12 }
 0x283   : > { %v6051_v23 = vpop.f32.mrb[9].mxu1  ;;  %5034 = vmatprep.subr.bf16.mxu0 %v5334_v20 }
 0x284   : > { %5009 = vmatpush3.bf16.msra.mxu1 %v5315_v17  ;;  %v6053_v25 = vpop.f32.mrb[10].mxu1  ;;  %4127 = vmatprep.mubr.bf16.mxu1 %v3530_v21 }
 0x285   : > { %v6055_v27 = vpop.f32.mrb[11].mxu1  ;;  %5010 = vmatprep.subr.bf16.mxu1 %v5316_v19  ;;  %v814_v19 = vsub.s32 7, %v6029_v1 }
 0x286   : > { %5035 = vmatpush3.bf16.msra.mxu0 %v5335_v24 }
 0x287   : > { %5036 = vmatprep.subr.bf16.mxu0 %v5336_v37 }
 0x288   : > { %5011 = vmatpush3.bf16.msra.mxu1 %v5317_v26  ;;  %v815_v26 = vrot.slane %v6032_v14, %v814_v19 }
 0x289   : > { %5012 = vmatprep.subr.bf16.mxu1 %v5318_v28 }
 0x28a   : > { %5037 = vmatpush3.bf16.msra.mxu0 %v5337_v38 }
 0x28b   : > { %5038 = vmatprep.subr.bf16.mxu0 %v5338_v39 }
 0x28c   : > { %5013 = vmatpush3.bf16.msra.mxu1 %v5319_v29 }
 0x28d   : > { %5014 = vmatprep.subr.bf16.mxu1 %v5320_v31 }
 0x28e   : > { %5039 = vmatpush3.bf16.msra.mxu0 %v5339_v40 }
 0x28f   : > { %5040 = vmatprep.subr.bf16.mxu0 %v5340_v41 }
 0x290   : > { %5015 = vmatpush3.bf16.msra.mxu1 %v5321_v32 }
 0x291   : > { %5016 = vmatprep.subr.bf16.mxu1 %v5322_v33 }
 0x292   : > { %5041 = vmatpush3.bf16.msra.mxu0 %v5341_v34  ;;  %v4902_v34 = vld [vmem:[#allocation10] ss:$0 sm:$0xff] }
 0x294   : > { %5017 = vmatpush3.bf16.msra.mxu1 %v5323_v30 }
 0x295   : > { %5018 = vmatprep.subr.bf16.mxu1 %v5324_v35 }
 0x298   : > { %5019 = vmatpush3.bf16.msra.mxu1 %v5325_v36 }
 0x299   : > { %5048 = vmatprep.subr.bf16.mxu1 %v5342_v43 }
 0x29b   : > { %4128 = vmatmul.mubr.bf16.vlgmr.msra.gmra.mrb[16].mxu1 %v3529_v18  ;;  %v810_v18 = vsub.s32 6, %v6029_v1 }
 0x29c   : > { %5049 = vmatpush3.bf16.msra.mxu1 %v5343_v44 }
 0x29d   : > { %5050 = vmatprep.subr.bf16.mxu1 %v5344_v5  ;;  %v811_v24 = vrot.slane %v6032_v14, %v810_v18 }
 0x2a0   : > { %5051 = vmatpush3.bf16.msra.mxu1 %v5345_v45 }
 0x2a1   : > { %5052 = vmatprep.subr.bf16.mxu1 %v5346_v42 }
 0x2a4   : > { %5053 = vmatpush3.bf16.msra.mxu1 %v5347_v47 }
 0x2a5   : > { %5054 = vmatprep.subr.bf16.mxu1 %v5348_v48 }
 0x2a8   : > { %5055 = vmatpush3.bf16.msra.mxu1 %v5349_v8 }
 0x2a9   : > { %5056 = vmatprep.subr.bf16.mxu1 %v5350_v50 }
 0x2ac   : > { %5057 = vmatpush3.bf16.msra.mxu1 %v5351_v10  ;;  %v5358_v10 = vld [vmem:[#allocation11] sm:$0xff]  }
 0x2ad   : > { %5058 = vmatprep.subr.bf16.mxu1 %v5352_v13  ;;  %v5666_v13 = vmov 0.0  }
 0x2ae   : > { %5079 = vmatprep.subr.bf16.mxu0 %v5666_v13 }
 0x2b0   : > { %5059 = vmatpush3.bf16.msra.mxu1 %v5353_v49  ;;  %v5359_v49 = vld [vmem:[#allocation11 + $0x8] sm:$0xff]  }
 0x2b1   : > { %5060 = vmatprep.subr.bf16.mxu1 %v5354_v51  ;;  %v5360_v51 = vld [vmem:[#allocation11 + $0x10] sm:$0xff]  }
 0x2b4   : > { %5061 = vmatpush3.bf16.msra.mxu1 %v5355_v52  ;;  %v5361_v52 = vld [vmem:[#allocation11 + $0x18] sm:$0xff]  }
 0x2b5   : > { %5062 = vmatprep.subr.bf16.mxu1 %v5356_v53  ;;  %v5362_v53 = vld [vmem:[#allocation11 + $0x20] sm:$0xff]  }
 0x2b8   : > { %5063 = vmatpush3.bf16.msra.mxu1 %v5357_v46  ;;  %v5363_v46 = vld [vmem:[#allocation11 + $0x28] sm:$0xff]  }
 0x328   : > { %v3287_v57 = vpop.f32.mrb[4].mxu0 }
 0x329   : > { %v5111_v58 = vadd.f32 %v3287_v57, %v803_v55  ;;  %v3289_v59 = vpop.f32.mrb[5].mxu0 }
 0x32a   : > { %v5113_v60 = vadd.f32 %v3289_v59, %v807_v56  ;;  %v3291_v61 = vpop.f32.mrb[6].mxu0 }
 0x32b   : > { %v5112_v62 = vadd.f32 %v5111_v58, %v6049_v22  ;;  %v5115_v63 = vadd.f32 %v3291_v61, %v803_v55  ;;  %v3293_v2 = vpop.f32.mrb[7].mxu0 }
 0x32c   : > { %v5114_v3 = vadd.f32 %v5113_v60, %v6051_v23  ;;  %v5117_v4 = vadd.f32 %v3293_v2, %v807_v56 }
 0x32d   : > { %v5116_v6 = vadd.f32 %v5115_v63, %v6053_v25  ;;  %v3515_v9 = vmax.f32 %v5112_v62, 0.0 }
 0x32e   : > { %v5118_v7 = vadd.f32 %v5117_v4, %v6055_v27  ;;  %v3516_v12 = vmax.f32 %v5114_v3, 0.0 }
 0x32f   : > { %v3523_v11 = vmax.f32 %v5116_v6, 0.0 }
 0x330   : > { %v3524_v15 = vmax.f32 %v5118_v7, 0.0 }
 0x331   : > { %v3531_v16 = vpack.c.bf16 %v3523_v11, %v3515_v9 }
 0x332   : > { %v3532_v17 = vpack.c.bf16 %v3524_v15, %v3516_v12 }
 0x334   : > { %4168 = vmatprep.mubr.bf16.mxu0 %v3532_v17  ;;  %v4967_v17 = vld [vmem:[#allocation13] ss:$0 sm:$0xff] }
 0x335   : > { %4169 = vmatmul.mubr.bf16.vlgmr.msra.gmra.mrb[12].mxu0 %v3531_v16 }
 0x336   : > { %5080 = vmatpush3.bf16.msra.mxu0 %v5358_v10  ;;  %5095 = vmatprep.mubr.msk.bf16.mxu0 %vm5667_vm1, %v5666_v13 }
 0x337   : > { %5081 = vmatprep.subr.bf16.mxu0 %v5666_v13 }
 0x33a   : > { %5082 = vmatpush3.bf16.msra.mxu0 %v5359_v49 }
 0x33b   : > { %5083 = vmatprep.subr.bf16.mxu0 %v5666_v13 }
 0x33e   : > { %5084 = vmatpush3.bf16.msra.mxu0 %v5360_v51 }
 0x33f   : > { %5085 = vmatprep.subr.bf16.mxu0 %v5666_v13 }
 0x342   : > { %5086 = vmatpush3.bf16.msra.mxu0 %v5361_v52 }
 0x343   : > { %5087 = vmatprep.subr.bf16.mxu0 %v5666_v13 }
 0x346   : > { %5088 = vmatpush3.bf16.msra.mxu0 %v5362_v53 }
 0x347   : > { %5089 = vmatprep.subr.bf16.mxu0 %v5666_v13 }
 0x348   : > { %v4998_v20 = vpop.f32.mrb[8].mxu0 }
 0x349   : > { %v4999_v21 = vpop.f32.mrb[9].mxu0 }
 0x34a   : > { %v5000_v22 = vadd.f32 %v4999_v21, %v4998_v20  ;;  %v5001_v23 = vpop.f32.mrb[10].mxu0  ;;  %5090 = vmatpush3.bf16.msra.mxu0 %v5363_v46 }
 0x34b   : > { %v5002_v25 = vpop.f32.mrb[11].mxu0  ;;  %5091 = vmatprep.subr.bf16.mxu0 %v5666_v13 }
 0x34c   : > { %v5003_v27 = vadd.f32 %v5002_v25, %v5001_v23  ;;  %v4089_v44 = vadd.f32 %v5000_v22, %v4902_v34 }
 0x34e   : > { %v3502_v28 = vpop.f32.mrb[12].mxu1  ;;  %v4092_v47 = vadd.f32 %v5003_v27, %v4902_v34  ;;  %5092 = vmatpush3.bf16.msra.mxu0 %v5364_v0 }
 0x34f   : > { %v5119_v29 = vadd.f32 %v3502_v28, %v811_v24  ;;  %v3504_v31 = vpop.f32.mrb[13].mxu1  ;;  %5093 = vmatprep.subr.bf16.mxu0 %v5666_v13 }
 0x350   : > { %v5120_v32 = vadd.f32 %v3504_v31, %v815_v26  ;;  %v3506_v33 = vpop.f32.mrb[14].mxu1 }
 0x351   : > { %v5121_v30 = vadd.f32 %v3506_v33, %v811_v24  ;;  %v3508_v35 = vpop.f32.mrb[15].mxu1  ;;  %v3517_v37 = vmax.f32 %v5119_v29, 0.0 }
 0x352   : > { %v5122_v36 = vadd.f32 %v3508_v35, %v815_v26  ;;  %v3518_v38 = vmax.f32 %v5120_v32, 0.0  ;;  %5094 = vmatpush3.bf16.msra.mxu0 %v5365_v54 }
 0x353   : > { %v3525_v1 = vmax.f32 %v5121_v30, 0.0 }
 0x354   : > { %v3526_v39 = vmax.f32 %v5122_v36, 0.0 }
 0x355   : > { %v3533_v40 = vpack.c.bf16 %v3525_v1, %v3517_v37 }
 0x356   : > { %v3534_v41 = vpack.c.bf16 %v3526_v39, %v3518_v38 }
 0x358   : > { %4209 = vmatprep.mubr.bf16.mxu1 %v3534_v41 }
 0x359   : > { %4210 = vmatmul.mubr.bf16.vlgmr.msra.gmra.mrb[20].mxu1 %v3533_v40 }
 0x36e   : > { %v5020_v43 = vpop.f32.mrb[16].mxu1 }
 0x36f   : > { %v5021_v14 = vpop.f32.mrb[17].mxu1 }
 0x370   : > { %v5022_v5 = vadd.f32 %v5021_v14, %v5020_v43  ;;  %v5023_v45 = vpop.f32.mrb[18].mxu1 }
 0x371   : > { %v5024_v42 = vpop.f32.mrb[19].mxu1 }
 0x372   : > { %v4130_v48 = vadd.f32 %v5022_v5, %v4089_v44  ;;  %v5025_v8 = vadd.f32 %v5024_v42, %v5023_v45 }
 0x374   : > { %v4133_v50 = vadd.f32 %v5025_v8, %v4092_v47 }
 0x408   : > { %v5042_v55 = vpop.f32.mrb[12].mxu0 }
 0x409   : > { %v5043_v56 = vpop.f32.mrb[13].mxu0 }
 0x40a   : > { %v5044_v57 = vadd.f32 %v5043_v56, %v5042_v55  ;;  %v5045_v58 = vpop.f32.mrb[14].mxu0 }
 0x40b   : > { %v5046_v59 = vpop.f32.mrb[15].mxu0 }
 0x40c   : > { %v4171_v60 = vadd.f32 %v5044_v57, %v4130_v48  ;;  %v5047_v61 = vadd.f32 %v5046_v59, %v5045_v58 }
 0x40e   : > { %v4174_v62 = vadd.f32 %v5047_v61, %v4133_v50 }
 0x42c   : > { %v5064_v63 = vpop.f32.mrb[20].mxu1 }
 0x42d   : > { %v5065_v2 = vpop.f32.mrb[21].mxu1 }
 0x42e   : > { %v5066_v3 = vadd.f32 %v5065_v2, %v5064_v63  ;;  %v5067_v4 = vpop.f32.mrb[22].mxu1 }
 0x42f   : > { %v5068_v6 = vpop.f32.mrb[23].mxu1 }
 0x430   : > { %v4212_v7 = vadd.f32 %v5066_v3, %v4171_v60  ;;  %v5069_v9 = vadd.f32 %v5068_v6, %v5067_v4 }
 0x432   : > { %v4215_v11 = vadd.f32 %v5069_v9, %v4174_v62  ;;  %v4218_v12 = vmax.f32 %v4212_v7, 0.0 }
 0x434   : > { %v4219_v15 = vmax.f32 %v4215_v11, 0.0 }
 0x436   : > { %v4220_v16 = vpack.c.bf16 %v4219_v15, %v4218_v12 }
 0x438   : > { %5096 = vmatmul.mubr.bf16.vlgmr.msra.gmra.mrb[16].mxu0 %v4220_v16 }
 0x50b   : > { %v4326_v18 = vpop.f32.mrb[16].mxu0 }
 0x50c   : > { %v4327_v19 = vadd.f32 %v4967_v17, %v4326_v18  ;;  %v5097_v20 = vpop.f32.mrb[17].mxu0 }
 0x50d   : > { %v4329_v21 = vpop.f32.mrb[18].mxu0 }
 0x50e   : > { %4333 = vst [vmem:[%s378_s23] sm:$0xff] %v4327_v19  ;;  %v4330_v22 = vadd.f32 %v4967_v17, %v4329_v21  ;;  %v5098_v23 = vpop.f32.mrb[19].mxu0 }
 0x510   : > { %4334 = vst [vmem:[%s378_s23 + $0x8] sm:$0xff] %v4330_v22 }
 0x511   : > { %5585 = shalt.err (!%p5582_p8)
}
 0x512   : > { %s5586_s17 = scalar_lea.hbm %s6076_s12, 256  ;;  %s5590_s8 = scalar_lea.hbm %s6127_s7, 512 }
 0x513   : > { %p5587_p7 = scmp.ne.s32.totalorder %s6076_s12, %s5586_s17  ;;  %p5591_p3 = scmp.lt.u32.totalorder %s6076_s12, %s6127_s7 }
 0x514   : > { %p5592_p6 = scmp.lt.u32.totalorder %s5590_s8, %s5586_s17  ;;  %p5594_p0 = scmp.lt.u32.totalorder %s5586_s17, %s6076_s12 }
 0x515   : > { %p5588_p9 = pnand %p5587_p7, %p6148_p5 }
 0x516   : > { %p5593_p2 = por %p5592_p6, %p5591_p3 }
 0x517   : > { %p5589_p4 = pneg %p5588_p9 }
 0x518   : > { %p5595_p10 = por %p5594_p0, %p5593_p2 }
 0x51a   : > { %p5596_p1 = pnand %p5595_p10, %p5589_p4 }
 0x51c   : > { %5599 = shalt.err (!%p5596_p1)
}
 0x51d   : > { %s5669_s9 = smov 128   ;;  %s5670_s19 = smov 8  }
 0x51e   : > { %5192 = dma.vmem_to_hbm [thread:$0]  (%p6148_p5), %s6071_s16, 256, %s6076_s12, %s4336_s20, %s5669_s9, %s5669_s9, %s5670_s19  }
 0x51f PF: > { %s4364_s30 = sand.u32 1, %s5638_s24   ;;  %p6149_p11 = scmp.ne.s32.totalorder %s6139_s28, 0 }
 0x520   : > { %p6150_p12 = scmp.ge.s32.totalorder %s5650_s27, 2  ;;  %s4365_s1 = scalar_lea.sflag [#allocation4], %s4364_s30 }
 0x522   : > { %p5218_p13 = pnand %p6150_p12, %p6149_p11 }
 0x524   : > { %5633 = dma.done.wait (!%p5218_p13), %s4365_s1, 256  }
 0x525   : > { %5635 = vsyncadd (!%p5218_p13), %s4365_s1, 4294967040  ;;  %p23_p8 = scmp.ge.s32.totalorder %s5883_s11, 4   ;;  %s6151_s24 = smov %s5642_s25 }
 0x526   : > { %s6152_s25 = smov %s5646_s26  ;;  %s6153_s26 = smov %s5894_s13 }
 0x527   : > { %s6154_s27 = smov %s5883_s11  ;;  %25 = sbr.rel (!%p23_p8) target bundleno = 10 (0xa), region = 117 }
 0x52e   :  { %4370 = vsyncpa [#allocation3], 1 }
 0x52f   :  { %4372 = vsyncpa [#allocation3 + $0x1], 1 }
 0x530   :  { %4373 = vsyncpa [#allocation6], 1 }
 0x531   :  { %4374 = vsyncpa [#allocation9], 1 }
 0x532   :  { %4375 = vsyncpa [#allocation12], 1 }
 0x533   :  { %4376 = vsyncpa [#allocation4], 1 }
 0x534   :  { %4378 = vsyncpa [#allocation4 + $0x1], 1 }

</bundles_post_ra>
